<compile_context>
chip_gen: v7x
topology: tpu7x:2x2x1
jax: 0.10.0
libtpu: 0.0.40
codegen_flags: <defaults>
</compile_context>

<pallas_src>
import jax
import jax.numpy as jnp
from jax.experimental import pallas as pl
from jax.experimental.pallas import tpu as pltpu


# ---------------------------------------------------------------------------
# Fused Pallas kernel (whole encoder forward for one batch tile)
# ---------------------------------------------------------------------------

def _encoder_fused_kernel(x_ref, w1b_ref, se1_ref, so1_ref, re1_ref, ro1_ref,
                          b1_ref, w2b_ref, se2_ref, so2_ref, re2_ref, ro2_ref,
                          b2_ref, fsel_ref, fw1_ref, fb1_ref, fw2_ref, fb2_ref,
                          o_ref, a1_scr):
    """One batch tile (BT images) end-to-end.

    Layouts (channel-minor, batch rows stacked along the sublane axis):
      x_ref  : (BT*28, 28)  f32   input rows, (b, h) x (w)           [Cin = 1]
      w1b    : (5, 28, 240) bf16  banded conv1 weights  (w,ci) -> (ow,co)
      se1/so1: (BT*12, BT*28-4)   block-diag even/odd H-pool row selectors
      re1/ro1: (240, 120)         even/odd W-pool column selectors
      b1     : (1, 120)     f32   conv1 bias tiled over pooled W positions
      w2b    : (5, 120, 160) bf16 banded conv2 weights
      se2/so2: (BT*4, BT*12-4)    H-pool selectors (stage 2)
      re2/ro2: (160, 80)          W-pool selectors (stage 2)
      b2     : (1, 80)      f32
      fsel   : (4, BT, BT*4) bf16 row selectors flattening h2 into features
      fw1    : (4, 80, 50)  bf16  fc1 weights split by h2, rows in (w,c) order
      fb1    : (1, 50)      f32
      fw2    : (50, 128)    bf16  fc2 weights, lane-padded to 128
      fb2    : (1, 128)     f32
      o_ref  : (BT, 128)    f32   L2-normalized output (cols >= latent are 0)
      a1_scr : (BT*12, 120) f32   VMEM scratch holding the conv1 stage output
    """
    f32, bf16 = jnp.float32, jnp.bfloat16
    k = w1b_ref.shape[0]                                   # 5

    # ---- conv1 (banded Toeplitz over stacked batch rows) ----
    rows1 = x_ref.shape[0] - (k - 1)                       # BT*28 - 4
    acc1 = jnp.dot(x_ref[0:rows1, :].astype(bf16), w1b_ref[0],
                   preferred_element_type=f32)
    for ki in range(1, k):
        acc1 = acc1 + jnp.dot(x_ref[ki:ki + rows1, :].astype(bf16), w1b_ref[ki],
                              preferred_element_type=f32)
    acc1 = acc1.astype(bf16)
    # 2x2 max-pool: H via block-diagonal selectors (valid rows only -> the
    # cross-image garbage rows are never selected), W via right selectors.
    hp1 = jnp.maximum(
        jnp.dot(se1_ref[...], acc1, preferred_element_type=f32),
        jnp.dot(so1_ref[...], acc1, preferred_element_type=f32)).astype(bf16)
    p1 = jnp.maximum(
        jnp.dot(hp1, re1_ref[...], preferred_element_type=f32),
        jnp.dot(hp1, ro1_ref[...], preferred_element_type=f32))
    # Bias commutes with max-pool; ReLU last (conv -> pool -> relu).
    a1_scr[...] = jnp.maximum(p1 + b1_ref[...], 0.0)       # (BT*12, 120) f32

    # TODO(synk): Dropout2d (after conv2) is applied as identity (eval mode).

    # ---- conv2 (banded Toeplitz) ----
    rows2 = a1_scr.shape[0] - (k - 1)                      # BT*12 - 4
    acc2 = jnp.dot(a1_scr[0:rows2, :].astype(bf16), w2b_ref[0],
                   preferred_element_type=f32)
    for ki in range(1, k):
        acc2 = acc2 + jnp.dot(a1_scr[ki:ki + rows2, :].astype(bf16),
                              w2b_ref[ki], preferred_element_type=f32)
    acc2 = acc2.astype(bf16)
    hp2 = jnp.maximum(
        jnp.dot(se2_ref[...], acc2, preferred_element_type=f32),
        jnp.dot(so2_ref[...], acc2, preferred_element_type=f32)).astype(bf16)
    p2 = jnp.maximum(
        jnp.dot(hp2, re2_ref[...], preferred_element_type=f32),
        jnp.dot(hp2, ro2_ref[...], preferred_element_type=f32))
    a2 = jnp.maximum(p2 + b2_ref[...], 0.0).astype(bf16)   # (BT*4, 80)

    # ---- flatten (h2, w2, c) + fc1 + ReLU ----
    # Row-selector matmuls pick rows b*4 + h2; fc1 weights are pre-split by h2
    # so the flatten never needs a cross-tile reshape.
    nh = fsel_ref.shape[0]                                 # 4
    bt = fsel_ref.shape[1]
    h_acc = jnp.zeros((bt, fw1_ref.shape[2]), f32)
    for hh in range(nh):
        rows = jnp.dot(fsel_ref[hh], a2,
                       preferred_element_type=f32).astype(bf16)   # (BT, 80)
        h_acc = h_acc + jnp.dot(rows, fw1_ref[hh], preferred_element_type=f32)
    h1 = jnp.maximum(h_acc + fb1_ref[...], 0.0).astype(bf16)      # (BT, 50)

    # TODO(synk): F.dropout between fc1 and fc2 is applied as identity (eval).

    # ---- fc2 + L2 normalization (lane-padded to 128 -> dense stores) ----
    z = jnp.dot(h1, fw2_ref[...], preferred_element_type=f32) + fb2_ref[...]
    nrm = jnp.sqrt(jnp.sum(z * z, axis=1, keepdims=True))   # padded cols are 0
    o_ref[...] = (z / (nrm + 1e-4)).astype(o_ref.dtype)


# ---------------------------------------------------------------------------
# Weight / selector preparation (done once, outside the forward pass)
# ---------------------------------------------------------------------------

def _banded_conv_weights(w_oihw, w_in):
    """PyTorch (Cout, Cin, K, K) conv weights -> banded (K, W*Cin, OW*Cout)."""
    cout, cin, kh, kw = w_oihw.shape
    ow = w_in - kw + 1
    wp = jnp.arange(w_in)[None, :, None]       # input column
    owi = jnp.arange(ow)[None, None, :]        # output column
    kj = jnp.arange(kw)[:, None, None]
    sel = (wp == owi + kj).astype(jnp.float32)                 # (kw, W, OW)
    banded = jnp.einsum("xwv,oiyx->ywivo", sel, w_oihw)        # (kh,W,Cin,OW,Cout)
    return banded.reshape(kh, w_in * cin, ow * cout)


def _hpool_selectors(bt, rows_per_image, conv_oh, dtype):
    """Block-diagonal even/odd row selectors for a batch tile of BT images.

    Input rows are (b*rows_per_image + h); output rows are (b*conv_oh//2 + r)
    selecting input row b*rows_per_image + 2r (+1 for the odd selector).
    """
    oh2 = conv_oh // 2
    n_out = bt * oh2
    n_in = bt * rows_per_image - 4          # conv output rows actually computed
    out_idx = jnp.arange(n_out)
    b = out_idx // oh2
    r = out_idx % oh2
    even_col = b * rows_per_image + 2 * r
    cols = jnp.arange(n_in)[None, :]
    se = (cols == even_col[:, None]).astype(dtype)
    so = (cols == (even_col + 1)[:, None]).astype(dtype)
    return se, so


def _wpool_selectors(ow, c, dtype):
    """Even/odd column selectors ((ow*c) -> (ow//2*c)) for a 2x2 stride-2 pool."""
    ow2 = ow // 2
    w = jnp.arange(ow)[:, None]
    q = jnp.arange(ow2)[None, :]
    qe = (w == 2 * q).astype(jnp.float32)
    qo = (w == 2 * q + 1).astype(jnp.float32)
    eye = jnp.eye(c, dtype=jnp.float32)
    return jnp.kron(qe, eye).astype(dtype), jnp.kron(qo, eye).astype(dtype)


def _flatten_selectors(bt, h, dtype):
    """(h, BT, BT*h) selectors: fsel[k, b, b*h + k] = 1 (pick row h2=k of image b)."""
    cols = jnp.arange(bt * h)[None, None, :]
    b = jnp.arange(bt)[None, :, None]
    k = jnp.arange(h)[:, None, None]
    return (cols == b * h + k).astype(dtype)


def init_params(latent_size, key):
    ks = jax.random.split(key, 8)
    s = 0.1
    return {
        "conv1_w": s * jax.random.normal(ks[0], (10, 1, 5, 5), jnp.float32),
        "conv1_b": s * jax.random.normal(ks[1], (10,), jnp.float32),
        "conv2_w": s * jax.random.normal(ks[2], (20, 10, 5, 5), jnp.float32),
        "conv2_b": s * jax.random.normal(ks[3], (20,), jnp.float32),
        "fc1_w": s * jax.random.normal(ks[4], (50, 320), jnp.float32),
        "fc1_b": s * jax.random.normal(ks[5], (50,), jnp.float32),
        "fc2_w": s * jax.random.normal(ks[6], (latent_size, 50), jnp.float32),
        "fc2_b": s * jax.random.normal(ks[7], (latent_size,), jnp.float32),
    }


def prepare_params(params, block_b=8):
    """One-time preprocessing into kernel-ready layouts (bf16 matmul operands)."""
    assert block_b % 2 == 0, "block_b must be even (sublane alignment)"
    bf16, f32 = jnp.bfloat16, jnp.float32
    latent = params["fc2_w"].shape[0]
    assert latent <= 128
    p = {"block_b": block_b, "latent": latent}

    # conv1: H=W=28, Cin=1, Cout=10, OH=OW=24, pooled 12x12
    p["conv1_wb"] = _banded_conv_weights(params["conv1_w"], 28).astype(bf16)
    p["conv1_bias"] = jnp.tile(params["conv1_b"], 12).reshape(1, 120).astype(f32)
    p["se1"], p["so1"] = _hpool_selectors(block_b, 28, 24, bf16)
    p["re1"], p["ro1"] = _wpool_selectors(24, 10, bf16)

    # conv2: H=W=12, Cin=10, Cout=20, OH=OW=8, pooled 4x4
    p["conv2_wb"] = _banded_conv_weights(params["conv2_w"], 12).astype(bf16)
    p["conv2_bias"] = jnp.tile(params["conv2_b"], 4).reshape(1, 80).astype(f32)
    p["se2"], p["so2"] = _hpool_selectors(block_b, 12, 8, bf16)
    p["re2"], p["ro2"] = _wpool_selectors(8, 20, bf16)

    # flatten + fc1: permute fc1 columns from torch's (c, h, w) flatten order
    # to the kernel's (h, w, c) order, then split by h -> (4, 80, 50).
    p["fsel"] = _flatten_selectors(block_b, 4, bf16)
    w1 = params["fc1_w"].reshape(50, 20, 4, 4)                 # (n, c, h, w)
    w1 = jnp.transpose(w1, (0, 2, 3, 1)).reshape(50, 320).T    # (320, 50)
    p["fc1_w"] = w1.reshape(4, 80, 50).astype(bf16)
    p["fc1_b"] = params["fc1_b"].reshape(1, 50).astype(f32)

    # fc2: pre-transpose and zero-pad the latent axis to 128 lanes.
    w2 = jnp.zeros((50, 128), f32).at[:, :latent].set(params["fc2_w"].T)
    p["fc2_w"] = w2.astype(bf16)
    p["fc2_b"] = jnp.zeros((1, 128), f32).at[0, :latent].set(params["fc2_b"])
    return p


# ---------------------------------------------------------------------------
# Encoder forward (single fused pallas_call, grid over batch tiles)
# ---------------------------------------------------------------------------

def encoder_forward(x_nchw, prep):
    bt = prep["block_b"]
    latent = prep["latent"]
    b = x_nchw.shape[0]
    b_pad = -(-b // bt) * bt

    # NCHW (Cin=1) -> stacked row slab (B*28, 28); pad batch to a tile multiple.
    x = x_nchw.astype(jnp.float32).reshape(b, 28, 28)
    if b_pad != b:
        x = jnp.pad(x, ((0, b_pad - b), (0, 0), (0, 0)))
    x2d = x.reshape(b_pad * 28, 28)

    def const2(shape):
        return pl.BlockSpec(shape, lambda i: (0, 0))

    def const3(shape):
        return pl.BlockSpec(shape, lambda i: (0, 0, 0))

    out = pl.pallas_call(
        _encoder_fused_kernel,
        out_shape=jax.ShapeDtypeStruct((b_pad, 128), jnp.float32),
        grid=(b_pad // bt,),
        in_specs=[
            pl.BlockSpec((bt * 28, 28), lambda i: (i, 0)),   # input batch tile
            const3(prep["conv1_wb"].shape),
            const2(prep["se1"].shape), const2(prep["so1"].shape),
            const2(prep["re1"].shape), const2(prep["ro1"].shape),
            const2(prep["conv1_bias"].shape),
            const3(prep["conv2_wb"].shape),
            const2(prep["se2"].shape), const2(prep["so2"].shape),
            const2(prep["re2"].shape), const2(prep["ro2"].shape),
            const2(prep["conv2_bias"].shape),
            const3(prep["fsel"].shape),
            const3(prep["fc1_w"].shape),
            const2(prep["fc1_b"].shape),
            const2(prep["fc2_w"].shape),
            const2(prep["fc2_b"].shape),
        ],
        out_specs=pl.BlockSpec((bt, 128), lambda i: (i, 0)),
        scratch_shapes=[pltpu.VMEM((bt * 12, 120), jnp.float32)],
        compiler_params=pltpu.CompilerParams(
            dimension_semantics=("parallel",)),
    )(x2d, prep["conv1_wb"], prep["se1"], prep["so1"], prep["re1"],
      prep["ro1"], prep["conv1_bias"], prep["conv2_wb"], prep["se2"],
      prep["so2"], prep["re2"], prep["ro2"], prep["conv2_bias"],
      prep["fsel"], prep["fc1_w"], prep["fc1_b"], prep["fc2_w"], prep["fc2_b"])

    return out[:b, :latent]


# ---------------------------------------------------------------------------
# Pure-XLA reference (mirrors the PyTorch module) for validation
# ---------------------------------------------------------------------------

def encoder_reference(x_nchw, params):
    prec = jax.lax.Precision.HIGHEST
    dn = ("NCHW", "OIHW", "NCHW")
    x = jax.lax.conv_general_dilated(x_nchw, params["conv1_w"], (1, 1), "VALID",
                                     dimension_numbers=dn, precision=prec)
    x = x + params["conv1_b"].reshape(1, -1, 1, 1)
    x = jax.lax.reduce_window(x, -jnp.inf, jax.lax.max,
                              (1, 1, 2, 2), (1, 1, 2, 2), "VALID")
    x = jnp.maximum(x, 0.0)
    x = jax.lax.conv_general_dilated(x, params["conv2_w"], (1, 1), "VALID",
                                     dimension_numbers=dn, precision=prec)
    x = x + params["conv2_b"].reshape(1, -1, 1, 1)
    x = jax.lax.reduce_window(x, -jnp.inf, jax.lax.max,
                              (1, 1, 2, 2), (1, 1, 2, 2), "VALID")
    x = jnp.maximum(x, 0.0)
    x = x.reshape(x.shape[0], -1)                       # NCHW flatten == torch view
    x = jnp.maximum(jnp.dot(x, params["fc1_w"].T, precision=prec)
                    + params["fc1_b"], 0.0)
    x = jnp.dot(x, params["fc2_w"].T, precision=prec) + params["fc2_b"]
    n = jnp.sqrt(jnp.sum(x * x, axis=1, keepdims=True))
    return x / (n + 1e-4)


if __name__ == "__main__":
    key = jax.random.PRNGKey(0)
    k_x, k_x2, k_p = jax.random.split(key, 3)

    latent_size = 8
    params = init_params(latent_size, k_p)
    prep = prepare_params(params, block_b=8)

    fwd = jax.jit(lambda xin: encoder_forward(xin, prep))

    # Tolerance: matmul operands are bf16 (f32 accumulation) per the perf
    # review, so allow a looser bound than a pure-f32 comparison would need.
    TOL = 4e-2

    # small batch (padded internally to one batch tile)
    x = jax.random.normal(k_x, (2, 1, 28, 28), jnp.float32)
    out = jax.block_until_ready(fwd(x))
    assert out.shape == (2, latent_size)
    assert bool(jnp.all(jnp.isfinite(out)))
    ref = jax.block_until_ready(encoder_reference(x, params))
    err = float(jnp.max(jnp.abs(out - ref)))
    assert err < TOL, f"max abs error vs reference too large (batch=2): {err}"

    # larger batch exercising a multi-step (pipelined) grid
    x_big = jax.random.normal(k_x2, (32, 1, 28, 28), jnp.float32)
    out_big = jax.block_until_ready(fwd(x_big))
    assert out_big.shape == (32, latent_size)
    assert bool(jnp.all(jnp.isfinite(out_big)))
    ref_big = jax.block_until_ready(encoder_reference(x_big, params))
    err_big = float(jnp.max(jnp.abs(out_big - ref_big)))
    assert err_big < TOL, f"max abs error vs reference too large (batch=32): {err_big}"

    print("KERNEL_OK")
</pallas_src>

<mosaic_0001>
module attributes {stable_mosaic.version = 11 : i64} {
  func.func @_encoder_fused_kernel(%arg0: i32, %arg1: memref<224x28xf32, #tpu.memory_space<vmem>>, %arg2: memref<5x28x240xbf16, #tpu.memory_space<vmem>>, %arg3: memref<96x220xbf16, #tpu.memory_space<vmem>>, %arg4: memref<96x220xbf16, #tpu.memory_space<vmem>>, %arg5: memref<240x120xbf16, #tpu.memory_space<vmem>>, %arg6: memref<240x120xbf16, #tpu.memory_space<vmem>>, %arg7: memref<1x120xf32, #tpu.memory_space<vmem>>, %arg8: memref<5x120x160xbf16, #tpu.memory_space<vmem>>, %arg9: memref<32x92xbf16, #tpu.memory_space<vmem>>, %arg10: memref<32x92xbf16, #tpu.memory_space<vmem>>, %arg11: memref<160x80xbf16, #tpu.memory_space<vmem>>, %arg12: memref<160x80xbf16, #tpu.memory_space<vmem>>, %arg13: memref<1x80xf32, #tpu.memory_space<vmem>>, %arg14: memref<4x8x32xbf16, #tpu.memory_space<vmem>>, %arg15: memref<4x80x50xbf16, #tpu.memory_space<vmem>>, %arg16: memref<1x50xf32, #tpu.memory_space<vmem>>, %arg17: memref<50x128xbf16, #tpu.memory_space<vmem>>, %arg18: memref<1x128xf32, #tpu.memory_space<vmem>>, %arg19: memref<8x128xf32, #tpu.memory_space<vmem>>, %arg20: memref<96x120xf32, #tpu.memory_space<vmem>>) attributes {dimension_semantics = [#tpu.dimension_semantics<parallel>], iteration_bounds = array<i64: 1>, scalar_prefetch = 0 : i64, scratch_operands = 1 : i64, tpu.core_type = #tpu.core_type<tc>, window_params = [{transform_indices = @transform_0, window_bounds = array<i64: 224, 28>}, {pipeline_mode = #tpu.pipeline_mode<synchronous>, transform_indices = @transform_1, window_bounds = array<i64: 5, 28, 240>}, {pipeline_mode = #tpu.pipeline_mode<synchronous>, transform_indices = @transform_2, window_bounds = array<i64: 96, 220>}, {pipeline_mode = #tpu.pipeline_mode<synchronous>, transform_indices = @transform_3, window_bounds = array<i64: 96, 220>}, {pipeline_mode = #tpu.pipeline_mode<synchronous>, transform_indices = @transform_4, window_bounds = array<i64: 240, 120>}, {pipeline_mode = #tpu.pipeline_mode<synchronous>, transform_indices = @transform_5, window_bounds = array<i64: 240, 120>}, {pipeline_mode = #tpu.pipeline_mode<synchronous>, transform_indices = @transform_6, window_bounds = array<i64: 1, 120>}, {pipeline_mode = #tpu.pipeline_mode<synchronous>, transform_indices = @transform_7, window_bounds = array<i64: 5, 120, 160>}, {pipeline_mode = #tpu.pipeline_mode<synchronous>, transform_indices = @transform_8, window_bounds = array<i64: 32, 92>}, {pipeline_mode = #tpu.pipeline_mode<synchronous>, transform_indices = @transform_9, window_bounds = array<i64: 32, 92>}, {pipeline_mode = #tpu.pipeline_mode<synchronous>, transform_indices = @transform_10, window_bounds = array<i64: 160, 80>}, {pipeline_mode = #tpu.pipeline_mode<synchronous>, transform_indices = @transform_11, window_bounds = array<i64: 160, 80>}, {pipeline_mode = #tpu.pipeline_mode<synchronous>, transform_indices = @transform_12, window_bounds = array<i64: 1, 80>}, {pipeline_mode = #tpu.pipeline_mode<synchronous>, transform_indices = @transform_13, window_bounds = array<i64: 4, 8, 32>}, {pipeline_mode = #tpu.pipeline_mode<synchronous>, transform_indices = @transform_14, window_bounds = array<i64: 4, 80, 50>}, {pipeline_mode = #tpu.pipeline_mode<synchronous>, transform_indices = @transform_15, window_bounds = array<i64: 1, 50>}, {pipeline_mode = #tpu.pipeline_mode<synchronous>, transform_indices = @transform_16, window_bounds = array<i64: 50, 128>}, {pipeline_mode = #tpu.pipeline_mode<synchronous>, transform_indices = @transform_17, window_bounds = array<i64: 1, 128>}, {transform_indices = @transform_18, window_bounds = array<i64: 8, 128>}]} {
    %c0 = arith.constant 0 : index
    %c0_0 = arith.constant 0 : index
    %0 = vector.load %arg1[%c0, %c0_0] : memref<224x28xf32, #tpu.memory_space<vmem>>, vector<220x28xf32>
    %1 = arith.truncf %0 : vector<220x28xf32> to vector<220x28xbf16>
    %c0_1 = arith.constant 0 : index
    %c0_2 = arith.constant 0 : index
    %c0_3 = arith.constant 0 : index
    %2 = vector.load %arg2[%c0_1, %c0_2, %c0_3] : memref<5x28x240xbf16, #tpu.memory_space<vmem>>, vector<1x28x240xbf16>
    %3 = vector.shape_cast %2 : vector<1x28x240xbf16> to vector<28x240xbf16>
    %cst = arith.constant dense<0.000000e+00> : vector<220x240xf32>
    %4 = tpu.matmul %1, %3, %cst {dimension_numbers = #tpu.dot_dimension_numbers<[1], [0], [0], [1], [0, 0, 1, 1], [], []>} : vector<220x28xbf16>, vector<28x240xbf16>, vector<220x240xf32> -> vector<220x240xf32>
    %c1 = arith.constant 1 : index
    %c0_4 = arith.constant 0 : index
    %5 = vector.load %arg1[%c1, %c0_4] : memref<224x28xf32, #tpu.memory_space<vmem>>, vector<220x28xf32>
    %6 = arith.truncf %5 : vector<220x28xf32> to vector<220x28xbf16>
    %c1_5 = arith.constant 1 : index
    %c0_6 = arith.constant 0 : index
    %c0_7 = arith.constant 0 : index
    %7 = vector.load %arg2[%c1_5, %c0_6, %c0_7] : memref<5x28x240xbf16, #tpu.memory_space<vmem>>, vector<1x28x240xbf16>
    %8 = vector.shape_cast %7 : vector<1x28x240xbf16> to vector<28x240xbf16>
    %cst_8 = arith.constant dense<0.000000e+00> : vector<220x240xf32>
    %9 = tpu.matmul %6, %8, %cst_8 {dimension_numbers = #tpu.dot_dimension_numbers<[1], [0], [0], [1], [0, 0, 1, 1], [], []>} : vector<220x28xbf16>, vector<28x240xbf16>, vector<220x240xf32> -> vector<220x240xf32>
    %10 = arith.addf %4, %9 : vector<220x240xf32>
    %c2 = arith.constant 2 : index
    %c0_9 = arith.constant 0 : index
    %11 = vector.load %arg1[%c2, %c0_9] : memref<224x28xf32, #tpu.memory_space<vmem>>, vector<220x28xf32>
    %12 = arith.truncf %11 : vector<220x28xf32> to vector<220x28xbf16>
    %c2_10 = arith.constant 2 : index
    %c0_11 = arith.constant 0 : index
    %c0_12 = arith.constant 0 : index
    %13 = vector.load %arg2[%c2_10, %c0_11, %c0_12] : memref<5x28x240xbf16, #tpu.memory_space<vmem>>, vector<1x28x240xbf16>
    %14 = vector.shape_cast %13 : vector<1x28x240xbf16> to vector<28x240xbf16>
    %cst_13 = arith.constant dense<0.000000e+00> : vector<220x240xf32>
    %15 = tpu.matmul %12, %14, %cst_13 {dimension_numbers = #tpu.dot_dimension_numbers<[1], [0], [0], [1], [0, 0, 1, 1], [], []>} : vector<220x28xbf16>, vector<28x240xbf16>, vector<220x240xf32> -> vector<220x240xf32>
    %16 = arith.addf %10, %15 : vector<220x240xf32>
    %c3 = arith.constant 3 : index
    %c0_14 = arith.constant 0 : index
    %17 = vector.load %arg1[%c3, %c0_14] : memref<224x28xf32, #tpu.memory_space<vmem>>, vector<220x28xf32>
    %18 = arith.truncf %17 : vector<220x28xf32> to vector<220x28xbf16>
    %c3_15 = arith.constant 3 : index
    %c0_16 = arith.constant 0 : index
    %c0_17 = arith.constant 0 : index
    %19 = vector.load %arg2[%c3_15, %c0_16, %c0_17] : memref<5x28x240xbf16, #tpu.memory_space<vmem>>, vector<1x28x240xbf16>
    %20 = vector.shape_cast %19 : vector<1x28x240xbf16> to vector<28x240xbf16>
    %cst_18 = arith.constant dense<0.000000e+00> : vector<220x240xf32>
    %21 = tpu.matmul %18, %20, %cst_18 {dimension_numbers = #tpu.dot_dimension_numbers<[1], [0], [0], [1], [0, 0, 1, 1], [], []>} : vector<220x28xbf16>, vector<28x240xbf16>, vector<220x240xf32> -> vector<220x240xf32>
    %22 = arith.addf %16, %21 : vector<220x240xf32>
    %c4 = arith.constant 4 : index
    %c0_19 = arith.constant 0 : index
    %23 = vector.load %arg1[%c4, %c0_19] : memref<224x28xf32, #tpu.memory_space<vmem>>, vector<220x28xf32>
    %24 = arith.truncf %23 : vector<220x28xf32> to vector<220x28xbf16>
    %c4_20 = arith.constant 4 : index
    %c0_21 = arith.constant 0 : index
    %c0_22 = arith.constant 0 : index
    %25 = vector.load %arg2[%c4_20, %c0_21, %c0_22] : memref<5x28x240xbf16, #tpu.memory_space<vmem>>, vector<1x28x240xbf16>
    %26 = vector.shape_cast %25 : vector<1x28x240xbf16> to vector<28x240xbf16>
    %cst_23 = arith.constant dense<0.000000e+00> : vector<220x240xf32>
    %27 = tpu.matmul %24, %26, %cst_23 {dimension_numbers = #tpu.dot_dimension_numbers<[1], [0], [0], [1], [0, 0, 1, 1], [], []>} : vector<220x28xbf16>, vector<28x240xbf16>, vector<220x240xf32> -> vector<220x240xf32>
    %28 = arith.addf %22, %27 : vector<220x240xf32>
    %29 = arith.truncf %28 : vector<220x240xf32> to vector<220x240xbf16>
    %c0_24 = arith.constant 0 : index
    %c0_25 = arith.constant 0 : index
    %30 = vector.load %arg3[%c0_24, %c0_25] : memref<96x220xbf16, #tpu.memory_space<vmem>>, vector<96x220xbf16>
    %cst_26 = arith.constant dense<0.000000e+00> : vector<96x240xf32>
    %31 = tpu.matmul %30, %29, %cst_26 {dimension_numbers = #tpu.dot_dimension_numbers<[1], [0], [0], [1], [0, 0, 1, 1], [], []>} : vector<96x220xbf16>, vector<220x240xbf16>, vector<96x240xf32> -> vector<96x240xf32>
    %c0_27 = arith.constant 0 : index
    %c0_28 = arith.constant 0 : index
    %32 = vector.load %arg4[%c0_27, %c0_28] : memref<96x220xbf16, #tpu.memory_space<vmem>>, vector<96x220xbf16>
    %cst_29 = arith.constant dense<0.000000e+00> : vector<96x240xf32>
    %33 = tpu.matmul %32, %29, %cst_29 {dimension_numbers = #tpu.dot_dimension_numbers<[1], [0], [0], [1], [0, 0, 1, 1], [], []>} : vector<96x220xbf16>, vector<220x240xbf16>, vector<96x240xf32> -> vector<96x240xf32>
    %34 = arith.maximumf %31, %33 : vector<96x240xf32>
    %35 = arith.truncf %34 : vector<96x240xf32> to vector<96x240xbf16>
    %c0_30 = arith.constant 0 : index
    %c0_31 = arith.constant 0 : index
    %36 = vector.load %arg5[%c0_30, %c0_31] : memref<240x120xbf16, #tpu.memory_space<vmem>>, vector<240x120xbf16>
    %cst_32 = arith.constant dense<0.000000e+00> : vector<96x120xf32>
    %37 = tpu.matmul %35, %36, %cst_32 {dimension_numbers = #tpu.dot_dimension_numbers<[1], [0], [0], [1], [0, 0, 1, 1], [], []>} : vector<96x240xbf16>, vector<240x120xbf16>, vector<96x120xf32> -> vector<96x120xf32>
    %c0_33 = arith.constant 0 : index
    %c0_34 = arith.constant 0 : index
    %38 = vector.load %arg6[%c0_33, %c0_34] : memref<240x120xbf16, #tpu.memory_space<vmem>>, vector<240x120xbf16>
    %cst_35 = arith.constant dense<0.000000e+00> : vector<96x120xf32>
    %39 = tpu.matmul %35, %38, %cst_35 {dimension_numbers = #tpu.dot_dimension_numbers<[1], [0], [0], [1], [0, 0, 1, 1], [], []>} : vector<96x240xbf16>, vector<240x120xbf16>, vector<96x120xf32> -> vector<96x120xf32>
    %40 = arith.maximumf %37, %39 : vector<96x120xf32>
    %c0_36 = arith.constant 0 : index
    %c0_37 = arith.constant 0 : index
    %41 = vector.load %arg7[%c0_36, %c0_37] : memref<1x120xf32, #tpu.memory_space<vmem>>, vector<1x120xf32>
    %42 = vector.broadcast %41 : vector<1x120xf32> to vector<96x120xf32>
    %43 = arith.addf %40, %42 : vector<96x120xf32>
    %cst_38 = arith.constant 0.000000e+00 : f32
    %44 = vector.broadcast %cst_38 : f32 to vector<96x120xf32>
    %45 = arith.maximumf %43, %44 : vector<96x120xf32>
    %c0_39 = arith.constant 0 : index
    %c0_40 = arith.constant 0 : index
    %46 = vector.load %arg20[%c0_39, %c0_40] : memref<96x120xf32, #tpu.memory_space<vmem>>, vector<96x120xf32>
    tpu.vector_store %arg20[%c0_39, %c0_40], %45 {strides = array<i32>} : memref<96x120xf32, #tpu.memory_space<vmem>>, vector<96x120xf32>,
    %c0_41 = arith.constant 0 : index
    %c0_42 = arith.constant 0 : index
    %47 = vector.load %arg20[%c0_41, %c0_42] : memref<96x120xf32, #tpu.memory_space<vmem>>, vector<92x120xf32>
    %48 = arith.truncf %47 : vector<92x120xf32> to vector<92x120xbf16>
    %c0_43 = arith.constant 0 : index
    %c0_44 = arith.constant 0 : index
    %c0_45 = arith.constant 0 : index
    %49 = vector.load %arg8[%c0_43, %c0_44, %c0_45] : memref<5x120x160xbf16, #tpu.memory_space<vmem>>, vector<1x120x160xbf16>
    %50 = vector.shape_cast %49 : vector<1x120x160xbf16> to vector<120x160xbf16>
    %cst_46 = arith.constant dense<0.000000e+00> : vector<92x160xf32>
    %51 = tpu.matmul %48, %50, %cst_46 {dimension_numbers = #tpu.dot_dimension_numbers<[1], [0], [0], [1], [0, 0, 1, 1], [], []>} : vector<92x120xbf16>, vector<120x160xbf16>, vector<92x160xf32> -> vector<92x160xf32>
    %c1_47 = arith.constant 1 : index
    %c0_48 = arith.constant 0 : index
    %52 = vector.load %arg20[%c1_47, %c0_48] : memref<96x120xf32, #tpu.memory_space<vmem>>, vector<92x120xf32>
    %53 = arith.truncf %52 : vector<92x120xf32> to vector<92x120xbf16>
    %c1_49 = arith.constant 1 : index
    %c0_50 = arith.constant 0 : index
    %c0_51 = arith.constant 0 : index
    %54 = vector.load %arg8[%c1_49, %c0_50, %c0_51] : memref<5x120x160xbf16, #tpu.memory_space<vmem>>, vector<1x120x160xbf16>
    %55 = vector.shape_cast %54 : vector<1x120x160xbf16> to vector<120x160xbf16>
    %cst_52 = arith.constant dense<0.000000e+00> : vector<92x160xf32>
    %56 = tpu.matmul %53, %55, %cst_52 {dimension_numbers = #tpu.dot_dimension_numbers<[1], [0], [0], [1], [0, 0, 1, 1], [], []>} : vector<92x120xbf16>, vector<120x160xbf16>, vector<92x160xf32> -> vector<92x160xf32>
    %57 = arith.addf %51, %56 : vector<92x160xf32>
    %c2_53 = arith.constant 2 : index
    %c0_54 = arith.constant 0 : index
    %58 = vector.load %arg20[%c2_53, %c0_54] : memref<96x120xf32, #tpu.memory_space<vmem>>, vector<92x120xf32>
    %59 = arith.truncf %58 : vector<92x120xf32> to vector<92x120xbf16>
    %c2_55 = arith.constant 2 : index
    %c0_56 = arith.constant 0 : index
    %c0_57 = arith.constant 0 : index
    %60 = vector.load %arg8[%c2_55, %c0_56, %c0_57] : memref<5x120x160xbf16, #tpu.memory_space<vmem>>, vector<1x120x160xbf16>
    %61 = vector.shape_cast %60 : vector<1x120x160xbf16> to vector<120x160xbf16>
    %cst_58 = arith.constant dense<0.000000e+00> : vector<92x160xf32>
    %62 = tpu.matmul %59, %61, %cst_58 {dimension_numbers = #tpu.dot_dimension_numbers<[1], [0], [0], [1], [0, 0, 1, 1], [], []>} : vector<92x120xbf16>, vector<120x160xbf16>, vector<92x160xf32> -> vector<92x160xf32>
    %63 = arith.addf %57, %62 : vector<92x160xf32>
    %c3_59 = arith.constant 3 : index
    %c0_60 = arith.constant 0 : index
    %64 = vector.load %arg20[%c3_59, %c0_60] : memref<96x120xf32, #tpu.memory_space<vmem>>, vector<92x120xf32>
    %65 = arith.truncf %64 : vector<92x120xf32> to vector<92x120xbf16>
    %c3_61 = arith.constant 3 : index
    %c0_62 = arith.constant 0 : index
    %c0_63 = arith.constant 0 : index
    %66 = vector.load %arg8[%c3_61, %c0_62, %c0_63] : memref<5x120x160xbf16, #tpu.memory_space<vmem>>, vector<1x120x160xbf16>
    %67 = vector.shape_cast %66 : vector<1x120x160xbf16> to vector<120x160xbf16>
    %cst_64 = arith.constant dense<0.000000e+00> : vector<92x160xf32>
    %68 = tpu.matmul %65, %67, %cst_64 {dimension_numbers = #tpu.dot_dimension_numbers<[1], [0], [0], [1], [0, 0, 1, 1], [], []>} : vector<92x120xbf16>, vector<120x160xbf16>, vector<92x160xf32> -> vector<92x160xf32>
    %69 = arith.addf %63, %68 : vector<92x160xf32>
    %c4_65 = arith.constant 4 : index
    %c0_66 = arith.constant 0 : index
    %70 = vector.load %arg20[%c4_65, %c0_66] : memref<96x120xf32, #tpu.memory_space<vmem>>, vector<92x120xf32>
    %71 = arith.truncf %70 : vector<92x120xf32> to vector<92x120xbf16>
    %c4_67 = arith.constant 4 : index
    %c0_68 = arith.constant 0 : index
    %c0_69 = arith.constant 0 : index
    %72 = vector.load %arg8[%c4_67, %c0_68, %c0_69] : memref<5x120x160xbf16, #tpu.memory_space<vmem>>, vector<1x120x160xbf16>
    %73 = vector.shape_cast %72 : vector<1x120x160xbf16> to vector<120x160xbf16>
    %cst_70 = arith.constant dense<0.000000e+00> : vector<92x160xf32>
    %74 = tpu.matmul %71, %73, %cst_70 {dimension_numbers = #tpu.dot_dimension_numbers<[1], [0], [0], [1], [0, 0, 1, 1], [], []>} : vector<92x120xbf16>, vector<120x160xbf16>, vector<92x160xf32> -> vector<92x160xf32>
    %75 = arith.addf %69, %74 : vector<92x160xf32>
    %76 = arith.truncf %75 : vector<92x160xf32> to vector<92x160xbf16>
    %c0_71 = arith.constant 0 : index
    %c0_72 = arith.constant 0 : index
    %77 = vector.load %arg9[%c0_71, %c0_72] : memref<32x92xbf16, #tpu.memory_space<vmem>>, vector<32x92xbf16>
    %cst_73 = arith.constant dense<0.000000e+00> : vector<32x160xf32>
    %78 = tpu.matmul %77, %76, %cst_73 {dimension_numbers = #tpu.dot_dimension_numbers<[1], [0], [0], [1], [0, 0, 1, 1], [], []>} : vector<32x92xbf16>, vector<92x160xbf16>, vector<32x160xf32> -> vector<32x160xf32>
    %c0_74 = arith.constant 0 : index
    %c0_75 = arith.constant 0 : index
    %79 = vector.load %arg10[%c0_74, %c0_75] : memref<32x92xbf16, #tpu.memory_space<vmem>>, vector<32x92xbf16>
    %cst_76 = arith.constant dense<0.000000e+00> : vector<32x160xf32>
    %80 = tpu.matmul %79, %76, %cst_76 {dimension_numbers = #tpu.dot_dimension_numbers<[1], [0], [0], [1], [0, 0, 1, 1], [], []>} : vector<32x92xbf16>, vector<92x160xbf16>, vector<32x160xf32> -> vector<32x160xf32>
    %81 = arith.maximumf %78, %80 : vector<32x160xf32>
    %82 = arith.truncf %81 : vector<32x160xf32> to vector<32x160xbf16>
    %c0_77 = arith.constant 0 : index
    %c0_78 = arith.constant 0 : index
    %83 = vector.load %arg11[%c0_77, %c0_78] : memref<160x80xbf16, #tpu.memory_space<vmem>>, vector<160x80xbf16>
    %cst_79 = arith.constant dense<0.000000e+00> : vector<32x80xf32>
    %84 = tpu.matmul %82, %83, %cst_79 {dimension_numbers = #tpu.dot_dimension_numbers<[1], [0], [0], [1], [0, 0, 1, 1], [], []>} : vector<32x160xbf16>, vector<160x80xbf16>, vector<32x80xf32> -> vector<32x80xf32>
    %c0_80 = arith.constant 0 : index
    %c0_81 = arith.constant 0 : index
    %85 = vector.load %arg12[%c0_80, %c0_81] : memref<160x80xbf16, #tpu.memory_space<vmem>>, vector<160x80xbf16>
    %cst_82 = arith.constant dense<0.000000e+00> : vector<32x80xf32>
    %86 = tpu.matmul %82, %85, %cst_82 {dimension_numbers = #tpu.dot_dimension_numbers<[1], [0], [0], [1], [0, 0, 1, 1], [], []>} : vector<32x160xbf16>, vector<160x80xbf16>, vector<32x80xf32> -> vector<32x80xf32>
    %87 = arith.maximumf %84, %86 : vector<32x80xf32>
    %c0_83 = arith.constant 0 : index
    %c0_84 = arith.constant 0 : index
    %88 = vector.load %arg13[%c0_83, %c0_84] : memref<1x80xf32, #tpu.memory_space<vmem>>, vector<1x80xf32>
    %89 = vector.broadcast %88 : vector<1x80xf32> to vector<32x80xf32>
    %90 = arith.addf %87, %89 : vector<32x80xf32>
    %cst_85 = arith.constant 0.000000e+00 : f32
    %91 = vector.broadcast %cst_85 : f32 to vector<32x80xf32>
    %92 = arith.maximumf %90, %91 : vector<32x80xf32>
    %93 = arith.truncf %92 : vector<32x80xf32> to vector<32x80xbf16>
    %cst_86 = arith.constant 0.000000e+00 : f32
    %94 = vector.broadcast %cst_86 : f32 to vector<8x50xf32>
    %c0_87 = arith.constant 0 : index
    %c0_88 = arith.constant 0 : index
    %c0_89 = arith.constant 0 : index
    %95 = vector.load %arg14[%c0_87, %c0_88, %c0_89] : memref<4x8x32xbf16, #tpu.memory_space<vmem>>, vector<1x8x32xbf16>
    %96 = vector.shape_cast %95 : vector<1x8x32xbf16> to vector<8x32xbf16>
    %cst_90 = arith.constant dense<0.000000e+00> : vector<8x80xf32>
    %97 = tpu.matmul %96, %93, %cst_90 {dimension_numbers = #tpu.dot_dimension_numbers<[1], [0], [0], [1], [0, 0, 1, 1], [], []>} : vector<8x32xbf16>, vector<32x80xbf16>, vector<8x80xf32> -> vector<8x80xf32>
    %98 = arith.truncf %97 : vector<8x80xf32> to vector<8x80xbf16>
    %c0_91 = arith.constant 0 : index
    %c0_92 = arith.constant 0 : index
    %c0_93 = arith.constant 0 : index
    %99 = vector.load %arg15[%c0_91, %c0_92, %c0_93] : memref<4x80x50xbf16, #tpu.memory_space<vmem>>, vector<1x80x50xbf16>
    %100 = vector.shape_cast %99 : vector<1x80x50xbf16> to vector<80x50xbf16>
    %cst_94 = arith.constant dense<0.000000e+00> : vector<8x50xf32>
    %101 = tpu.matmul %98, %100, %cst_94 {dimension_numbers = #tpu.dot_dimension_numbers<[1], [0], [0], [1], [0, 0, 1, 1], [], []>} : vector<8x80xbf16>, vector<80x50xbf16>, vector<8x50xf32> -> vector<8x50xf32>
    %102 = arith.addf %94, %101 : vector<8x50xf32>
    %c1_95 = arith.constant 1 : index
    %c0_96 = arith.constant 0 : index
    %c0_97 = arith.constant 0 : index
    %103 = vector.load %arg14[%c1_95, %c0_96, %c0_97] : memref<4x8x32xbf16, #tpu.memory_space<vmem>>, vector<1x8x32xbf16>
    %104 = vector.shape_cast %103 : vector<1x8x32xbf16> to vector<8x32xbf16>
    %cst_98 = arith.constant dense<0.000000e+00> : vector<8x80xf32>
    %105 = tpu.matmul %104, %93, %cst_98 {dimension_numbers = #tpu.dot_dimension_numbers<[1], [0], [0], [1], [0, 0, 1, 1], [], []>} : vector<8x32xbf16>, vector<32x80xbf16>, vector<8x80xf32> -> vector<8x80xf32>
    %106 = arith.truncf %105 : vector<8x80xf32> to vector<8x80xbf16>
    %c1_99 = arith.constant 1 : index
    %c0_100 = arith.constant 0 : index
    %c0_101 = arith.constant 0 : index
    %107 = vector.load %arg15[%c1_99, %c0_100, %c0_101] : memref<4x80x50xbf16, #tpu.memory_space<vmem>>, vector<1x80x50xbf16>
    %108 = vector.shape_cast %107 : vector<1x80x50xbf16> to vector<80x50xbf16>
    %cst_102 = arith.constant dense<0.000000e+00> : vector<8x50xf32>
    %109 = tpu.matmul %106, %108, %cst_102 {dimension_numbers = #tpu.dot_dimension_numbers<[1], [0], [0], [1], [0, 0, 1, 1], [], []>} : vector<8x80xbf16>, vector<80x50xbf16>, vector<8x50xf32> -> vector<8x50xf32>
    %110 = arith.addf %102, %109 : vector<8x50xf32>
    %c2_103 = arith.constant 2 : index
    %c0_104 = arith.constant 0 : index
    %c0_105 = arith.constant 0 : index
    %111 = vector.load %arg14[%c2_103, %c0_104, %c0_105] : memref<4x8x32xbf16, #tpu.memory_space<vmem>>, vector<1x8x32xbf16>
    %112 = vector.shape_cast %111 : vector<1x8x32xbf16> to vector<8x32xbf16>
    %cst_106 = arith.constant dense<0.000000e+00> : vector<8x80xf32>
    %113 = tpu.matmul %112, %93, %cst_106 {dimension_numbers = #tpu.dot_dimension_numbers<[1], [0], [0], [1], [0, 0, 1, 1], [], []>} : vector<8x32xbf16>, vector<32x80xbf16>, vector<8x80xf32> -> vector<8x80xf32>
    %114 = arith.truncf %113 : vector<8x80xf32> to vector<8x80xbf16>
    %c2_107 = arith.constant 2 : index
    %c0_108 = arith.constant 0 : index
    %c0_109 = arith.constant 0 : index
    %115 = vector.load %arg15[%c2_107, %c0_108, %c0_109] : memref<4x80x50xbf16, #tpu.memory_space<vmem>>, vector<1x80x50xbf16>
    %116 = vector.shape_cast %115 : vector<1x80x50xbf16> to vector<80x50xbf16>
    %cst_110 = arith.constant dense<0.000000e+00> : vector<8x50xf32>
    %117 = tpu.matmul %114, %116, %cst_110 {dimension_numbers = #tpu.dot_dimension_numbers<[1], [0], [0], [1], [0, 0, 1, 1], [], []>} : vector<8x80xbf16>, vector<80x50xbf16>, vector<8x50xf32> -> vector<8x50xf32>
    %118 = arith.addf %110, %117 : vector<8x50xf32>
    %c3_111 = arith.constant 3 : index
    %c0_112 = arith.constant 0 : index
    %c0_113 = arith.constant 0 : index
    %119 = vector.load %arg14[%c3_111, %c0_112, %c0_113] : memref<4x8x32xbf16, #tpu.memory_space<vmem>>, vector<1x8x32xbf16>
    %120 = vector.shape_cast %119 : vector<1x8x32xbf16> to vector<8x32xbf16>
    %cst_114 = arith.constant dense<0.000000e+00> : vector<8x80xf32>
    %121 = tpu.matmul %120, %93, %cst_114 {dimension_numbers = #tpu.dot_dimension_numbers<[1], [0], [0], [1], [0, 0, 1, 1], [], []>} : vector<8x32xbf16>, vector<32x80xbf16>, vector<8x80xf32> -> vector<8x80xf32>
    %122 = arith.truncf %121 : vector<8x80xf32> to vector<8x80xbf16>
    %c3_115 = arith.constant 3 : index
    %c0_116 = arith.constant 0 : index
    %c0_117 = arith.constant 0 : index
    %123 = vector.load %arg15[%c3_115, %c0_116, %c0_117] : memref<4x80x50xbf16, #tpu.memory_space<vmem>>, vector<1x80x50xbf16>
    %124 = vector.shape_cast %123 : vector<1x80x50xbf16> to vector<80x50xbf16>
    %cst_118 = arith.constant dense<0.000000e+00> : vector<8x50xf32>
    %125 = tpu.matmul %122, %124, %cst_118 {dimension_numbers = #tpu.dot_dimension_numbers<[1], [0], [0], [1], [0, 0, 1, 1], [], []>} : vector<8x80xbf16>, vector<80x50xbf16>, vector<8x50xf32> -> vector<8x50xf32>
    %126 = arith.addf %118, %125 : vector<8x50xf32>
    %c0_119 = arith.constant 0 : index
    %c0_120 = arith.constant 0 : index
    %127 = vector.load %arg16[%c0_119, %c0_120] : memref<1x50xf32, #tpu.memory_space<vmem>>, vector<1x50xf32>
    %128 = vector.broadcast %127 : vector<1x50xf32> to vector<8x50xf32>
    %129 = arith.addf %126, %128 : vector<8x50xf32>
    %cst_121 = arith.constant 0.000000e+00 : f32
    %130 = vector.broadcast %cst_121 : f32 to vector<8x50xf32>
    %131 = arith.maximumf %129, %130 : vector<8x50xf32>
    %132 = arith.truncf %131 : vector<8x50xf32> to vector<8x50xbf16>
    %c0_122 = arith.constant 0 : index
    %c0_123 = arith.constant 0 : index
    %133 = vector.load %arg17[%c0_122, %c0_123] : memref<50x128xbf16, #tpu.memory_space<vmem>>, vector<50x128xbf16>
    %cst_124 = arith.constant dense<0.000000e+00> : vector<8x128xf32>
    %134 = tpu.matmul %132, %133, %cst_124 {dimension_numbers = #tpu.dot_dimension_numbers<[1], [0], [0], [1], [0, 0, 1, 1], [], []>} : vector<8x50xbf16>, vector<50x128xbf16>, vector<8x128xf32> -> vector<8x128xf32>
    %c0_125 = arith.constant 0 : index
    %c0_126 = arith.constant 0 : index
    %135 = vector.load %arg18[%c0_125, %c0_126] : memref<1x128xf32, #tpu.memory_space<vmem>>, vector<1x128xf32>
    %136 = vector.broadcast %135 : vector<1x128xf32> to vector<8x128xf32>
    %137 = arith.addf %134, %136 : vector<8x128xf32>
    %138 = arith.mulf %137, %137 : vector<8x128xf32>
    %cst_127 = arith.constant dense<0.000000e+00> : vector<8xf32>
    %139 = vector.multi_reduction <add>, %138, %cst_127 [1] : vector<8x128xf32> to vector<8xf32>
    %140 = vector.shape_cast %139 : vector<8xf32> to vector<8x1xf32>
    %141 = math.sqrt %140 : vector<8x1xf32>
    %cst_128 = arith.constant 9.99999974E-5 : f32
    %142 = vector.broadcast %cst_128 : f32 to vector<8x1xf32>
    %143 = arith.addf %141, %142 : vector<8x1xf32>
    %144 = vector.broadcast %143 : vector<8x1xf32> to vector<8x128xf32>
    %145 = arith.divf %137, %144 : vector<8x128xf32>
    %c0_129 = arith.constant 0 : index
    %c0_130 = arith.constant 0 : index
    %146 = vector.load %arg19[%c0_129, %c0_130] : memref<8x128xf32, #tpu.memory_space<vmem>>, vector<8x128xf32>
    tpu.vector_store %arg19[%c0_129, %c0_130], %145 {strides = array<i32>} : memref<8x128xf32, #tpu.memory_space<vmem>>, vector<8x128xf32>,
    return
  }
  func.func @transform_0(%arg0: i32) -> (i32, i32) {
    %c0_i32 = arith.constant 0 : i32
    %c0_i32_0 = arith.constant 0 : i32
    return %arg0, %c0_i32 : i32, i32
  }
  func.func @transform_1(%arg0: i32) -> (i32, i32, i32) {
    %c0_i32 = arith.constant 0 : i32
    %c0_i32_0 = arith.constant 0 : i32
    %c0_i32_1 = arith.constant 0 : i32
    %c0_i32_2 = arith.constant 0 : i32
    return %c0_i32, %c0_i32_0, %c0_i32_1 : i32, i32, i32
  }
  func.func @transform_2(%arg0: i32) -> (i32, i32) {
    %c0_i32 = arith.constant 0 : i32
    %c0_i32_0 = arith.constant 0 : i32
    %c0_i32_1 = arith.constant 0 : i32
    return %c0_i32, %c0_i32_0 : i32, i32
  }
  func.func @transform_3(%arg0: i32) -> (i32, i32) {
    %c0_i32 = arith.constant 0 : i32
    %c0_i32_0 = arith.constant 0 : i32
    %c0_i32_1 = arith.constant 0 : i32
    return %c0_i32, %c0_i32_0 : i32, i32
  }
  func.func @transform_4(%arg0: i32) -> (i32, i32) {
    %c0_i32 = arith.constant 0 : i32
    %c0_i32_0 = arith.constant 0 : i32
    %c0_i32_1 = arith.constant 0 : i32
    return %c0_i32, %c0_i32_0 : i32, i32
  }
  func.func @transform_5(%arg0: i32) -> (i32, i32) {
    %c0_i32 = arith.constant 0 : i32
    %c0_i32_0 = arith.constant 0 : i32
    %c0_i32_1 = arith.constant 0 : i32
    return %c0_i32, %c0_i32_0 : i32, i32
  }
  func.func @transform_6(%arg0: i32) -> (i32, i32) {
    %c0_i32 = arith.constant 0 : i32
    %c0_i32_0 = arith.constant 0 : i32
    %c0_i32_1 = arith.constant 0 : i32
    return %c0_i32, %c0_i32_0 : i32, i32
  }
  func.func @transform_7(%arg0: i32) -> (i32, i32, i32) {
    %c0_i32 = arith.constant 0 : i32
    %c0_i32_0 = arith.constant 0 : i32
    %c0_i32_1 = arith.constant 0 : i32
    %c0_i32_2 = arith.constant 0 : i32
    return %c0_i32, %c0_i32_0, %c0_i32_1 : i32, i32, i32
  }
  func.func @transform_8(%arg0: i32) -> (i32, i32) {
    %c0_i32 = arith.constant 0 : i32
    %c0_i32_0 = arith.constant 0 : i32
    %c0_i32_1 = arith.constant 0 : i32
    return %c0_i32, %c0_i32_0 : i32, i32
  }
  func.func @transform_9(%arg0: i32) -> (i32, i32) {
    %c0_i32 = arith.constant 0 : i32
    %c0_i32_0 = arith.constant 0 : i32
    %c0_i32_1 = arith.constant 0 : i32
    return %c0_i32, %c0_i32_0 : i32, i32
  }
  func.func @transform_10(%arg0: i32) -> (i32, i32) {
    %c0_i32 = arith.constant 0 : i32
    %c0_i32_0 = arith.constant 0 : i32
    %c0_i32_1 = arith.constant 0 : i32
    return %c0_i32, %c0_i32_0 : i32, i32
  }
  func.func @transform_11(%arg0: i32) -> (i32, i32) {
    %c0_i32 = arith.constant 0 : i32
    %c0_i32_0 = arith.constant 0 : i32
    %c0_i32_1 = arith.constant 0 : i32
    return %c0_i32, %c0_i32_0 : i32, i32
  }
  func.func @transform_12(%arg0: i32) -> (i32, i32) {
    %c0_i32 = arith.constant 0 : i32
    %c0_i32_0 = arith.constant 0 : i32
    %c0_i32_1 = arith.constant 0 : i32
    return %c0_i32, %c0_i32_0 : i32, i32
  }
  func.func @transform_13(%arg0: i32) -> (i32, i32, i32) {
    %c0_i32 = arith.constant 0 : i32
    %c0_i32_0 = arith.constant 0 : i32
    %c0_i32_1 = arith.constant 0 : i32
    %c0_i32_2 = arith.constant 0 : i32
    return %c0_i32, %c0_i32_0, %c0_i32_1 : i32, i32, i32
  }
  func.func @transform_14(%arg0: i32) -> (i32, i32, i32) {
    %c0_i32 = arith.constant 0 : i32
    %c0_i32_0 = arith.constant 0 : i32
    %c0_i32_1 = arith.constant 0 : i32
    %c0_i32_2 = arith.constant 0 : i32
    return %c0_i32, %c0_i32_0, %c0_i32_1 : i32, i32, i32
  }
  func.func @transform_15(%arg0: i32) -> (i32, i32) {
    %c0_i32 = arith.constant 0 : i32
    %c0_i32_0 = arith.constant 0 : i32
    %c0_i32_1 = arith.constant 0 : i32
    return %c0_i32, %c0_i32_0 : i32, i32
  }
  func.func @transform_16(%arg0: i32) -> (i32, i32) {
    %c0_i32 = arith.constant 0 : i32
    %c0_i32_0 = arith.constant 0 : i32
    %c0_i32_1 = arith.constant 0 : i32
    return %c0_i32, %c0_i32_0 : i32, i32
  }
  func.func @transform_17(%arg0: i32) -> (i32, i32) {
    %c0_i32 = arith.constant 0 : i32
    %c0_i32_0 = arith.constant 0 : i32
    %c0_i32_1 = arith.constant 0 : i32
    return %c0_i32, %c0_i32_0 : i32, i32
  }
  func.func @transform_18(%arg0: i32) -> (i32, i32) {
    %c0_i32 = arith.constant 0 : i32
    %c0_i32_0 = arith.constant 0 : i32
    return %arg0, %c0_i32 : i32, i32
  }
}

</mosaic_0001>

<bundles_post_ra>
// kernel: _lambda_.1
= control target key start
LH: loop header
LB: loop body
LE: loop exit
PB: predicated region body
PF: predicated region fallthrough
CT: control target
= control target key end

     0   :  { %s7888_s0 = inlined_call_operand.vmem [shape: f32[224,28], index: 0, kind: input, shape index: {}]   ;;  %s7889_s1 = inlined_call_operand.vmem [shape: bf16[5,28,240], index: 1, kind: input, shape index: {}]   ;;  %s7890_s2 = inlined_call_operand.vmem [shape: bf16[96,220], index: 2, kind: input, shape index: {}]   ;;  %s7891_s3 = inlined_call_operand.vmem [shape: bf16[96,220], index: 3, kind: input, shape index: {}]   ;;  %s7892_s4 = inlined_call_operand.vmem [shape: bf16[240,120], index: 4, kind: input, shape index: {}]   ;;  %s7893_s5 = inlined_call_operand.vmem [shape: bf16[240,120], index: 5, kind: input, shape index: {}]   ;;  %s7894_s6 = inlined_call_operand.vmem [shape: f32[1,120], index: 6, kind: input, shape index: {}]   ;;  %s7895_s7 = inlined_call_operand.vmem [shape: bf16[5,120,160], index: 7, kind: input, shape index: {}]   ;;  %s7896_s8 = inlined_call_operand.vmem [shape: bf16[32,92], index: 8, kind: input, shape index: {}]   ;;  %s7897_s9 = inlined_call_operand.vmem [shape: bf16[32,92], index: 9, kind: input, shape index: {}]   ;;  %s7898_s10 = inlined_call_operand.vmem [shape: bf16[160,80], index: 10, kind: input, shape index: {}]   ;;  %s7899_s11 = inlined_call_operand.hbm [shape: bf16[160,80], index: 11, kind: input, shape index: {}]   ;;  %s7900_s12 = inlined_call_operand.vmem [shape: f32[1,80], index: 12, kind: input, shape index: {}]   ;;  %s7901_s13 = inlined_call_operand.hbm [shape: bf16[4,8,32], index: 13, kind: input, shape index: {}]   ;;  %s7902_s14 = inlined_call_operand.vmem [shape: bf16[4,80,50], index: 14, kind: input, shape index: {}]   ;;  %s7903_s15 = inlined_call_operand.vmem [shape: f32[1,50], index: 15, kind: input, shape index: {}]   ;;  %s7904_s16 = inlined_call_operand.hbm [shape: bf16[50,128], index: 16, kind: input, shape index: {}]   ;;  %s7905_s17 = inlined_call_operand.vmem [shape: f32[1,128], index: 17, kind: input, shape index: {}]   ;;  %s7906_s18 = inlined_call_operand.vmem [shape: f32[8,128], index: 18, kind: output, shape index: {}]  }
   0x1   :  { %7910 = sst [smem:[#allocation10_spill]] %s7888_s0 }
   0x2   :  { %7911 = sst [smem:[#allocation11_spill]] %s7889_s1 }
   0x3   :  { %7912 = sst [smem:[#allocation12_spill]] %s7890_s2 }
   0x4   :  { %23 = vsyncpa [#allocation4], 0 }
   0x5   :  { %24 = vsyncpa [#allocation6], 0  ;;  %s6169_s27 = smov [#allocation5]   ;;  %s6170_s29 = smov [#allocation3]  }
   0x6   :  { %s66_s28 = sshll.u32 %s6169_s27, 4  ;;  %s52_s30 = sshll.u32 %s6170_s29, 4  ;;  %s67_s28 = int_to_ptr.vmem [resolvable:$true] %s66_s28  ;;  %s6272_s30 = int_to_ptr.vmem [resolvable:$true] %s52_s30 }
   0x7   :  { %s6099_s1 = scalar_lea.hbm %s7901_s13, 256 }
   0x8   :  { %p6100_p0 = scmp.ne.s32.totalorder %s7901_s13, %s6099_s1  ;;  %p6103_p1 = scmp.lt.u32.totalorder %s6099_s1, %s7901_s13 }
   0xa   :  { %p6105_p2 = pnand %p6103_p1, %p6100_p0 }
   0xc   :  { %6108 = shalt.err (!%p6105_p2)
}
   0xd   :  { %s6109_s23 = scalar_lea.vmem %s67_s28, 256  ;;  %p6114_p4 = scmp.lt.s32.totalorder %s67_s28, %s67_s28 }
   0xe   :  { %p6110_p3 = scmp.ne.s32.totalorder %s67_s28, %s6109_s23  ;;  %p6115_p5 = scmp.lt.s32.totalorder %s6109_s23, %s6109_s23 }
  0x10   :  { %p6116_p6 = por %p6115_p5, %p6114_p4 }
  0x12   :  { %p6117_p7 = pnand %p6116_p6, %p6110_p3 }
  0x14   :  { %6120 = shalt.err (!%p6117_p7)
}
  0x15   :  { %s6171_s24 = smov 64   ;;  %s6172_s25 = smov 4  }
  0x16   :  { %72 = dma.hbm_to_vmem [thread:$0]  %s7901_s13, 256, %s67_s28, [#allocation6], %s6171_s24, %s6171_s24, %s6172_s25  }
  0x17   :  { %s6121_s19 = scalar_lea.hbm %s7899_s11, 1280 }
  0x18   :  { %p6122_p8 = scmp.ne.s32.totalorder %s7899_s11, %s6121_s19  ;;  %p6125_p9 = scmp.lt.u32.totalorder %s6121_s19, %s7899_s11 }
  0x1a   :  { %p6127_p10 = pnand %p6125_p9, %p6122_p8 }
  0x1c   :  { %6130 = shalt.err (!%p6127_p10)
}
  0x1d   :  { %s6131_s2 = scalar_lea.vmem %s6272_s30, 1280  ;;  %p6136_p12 = scmp.lt.s32.totalorder %s6272_s30, %s6272_s30 }
  0x1e   :  { %p6132_p11 = scmp.ne.s32.totalorder %s6272_s30, %s6131_s2  ;;  %p6137_p13 = scmp.lt.s32.totalorder %s6131_s2, %s6131_s2 }
  0x20   :  { %p6138_p0 = por %p6137_p13, %p6136_p12 }
  0x22   :  { %p6139_p1 = pnand %p6138_p0, %p6132_p11 }
  0x24   :  { %6142 = shalt.err (!%p6139_p1)
}
  0x25   :  { %58 = dma.hbm_to_vmem [thread:$0]  %s7899_s11, 1280, %s6272_s30, [#allocation4], %s6171_s24, %s6171_s24, %s6172_s25  }
  0x26   :  { %s6173_s23 = smov [#allocation7]   ;;  %s6143_s0 = scalar_lea.hbm %s7904_s16, 448 }
  0x27   :  { %s82_s26 = sshll.u32 %s6173_s23, 4  ;;  %p6144_p2 = scmp.ne.s32.totalorder %s7904_s16, %s6143_s0  ;;  %s83_s26 = int_to_ptr.vmem [resolvable:$true] %s82_s26 }
  0x28   :  { %p6147_p3 = scmp.lt.u32.totalorder %s6143_s0, %s7904_s16 }
  0x2a   :  { %p6149_p4 = pnand %p6147_p3, %p6144_p2 }
  0x2c   :  { %6152 = shalt.err (!%p6149_p4)
}
  0x2d   :  { %s6153_s22 = scalar_lea.vmem %s83_s26, 448  ;;  %p6158_p6 = scmp.lt.s32.totalorder %s83_s26, %s83_s26 }
  0x2e   :  { %p6154_p5 = scmp.ne.s32.totalorder %s83_s26, %s6153_s22  ;;  %p6159_p7 = scmp.lt.s32.totalorder %s6153_s22, %s6153_s22 }
  0x30   :  { %p6160_p8 = por %p6159_p7, %p6158_p6 }
  0x32   :  { %p6161_p9 = pnand %p6160_p8, %p6154_p5 }
  0x34   :  { %6164 = shalt.err (!%p6161_p9)
}
  0x35   :  { %88 = dma.hbm_to_vmem [thread:$0]  %s7904_s16, 448, %s83_s26, [#allocation6], %s6171_s24, %s6171_s24, %s6172_s25  }
  0x36   :  { %6165 = dma.done.wait [#allocation4], 1280  }
  0x37   :  { %6166 = vsyncadd [#allocation4], 4294966016 }
  0x38   :  { %6167 = dma.done.wait [#allocation6], 704  }
  0x39   :  { %6168 = vsyncadd [#allocation6], 4294966592  ;;  %v6174_v0 = vmov 0   ;;  %s7913_s28 = sld [smem:[#allocation11_spill]]  ;;  %vm255_vm0 = vcmask 1045504   ;;  %s7914_s19 = sld [smem:[#allocation10_spill]] }
  0x3a   :  { %294 = vmatprep.mubr.bf16.mxu0 %v6174_v0  ;;  %vm212_vm1 = vcmask 228352   ;;  %s7915_s20 = sld [smem:[#allocation12_spill]]  ;;  %vm1794_vm2 = vcmask 752640   ;;  %vm2245_vm3 = vcmask 916480   ;;  %vm2762_vm4 = vcmask 1043456  }
  0x3b   :  { %vm2589_vm5 = vcmask 982016   ;;  %vm4060_vm6 = vcmask 261120   ;;  %vm6176_vm7 = vmmov 0   ;;  %vm4408_vm8 = vcmask 654336  }
  0x3c   :  { %vm4836_vm9 = vcmask 1040384   ;;  %vm4832_vm10 = vcmask 408576  }
  0x3f   :  { %v5836_v1 = vld [vmem:[%s7913_s28 + $0x24] ss:$8 sps:$4 sm:$0xff]   ;;  %v5838_v2 = vld [vmem:[%s7913_s28 + $0x20] ss:$8 sps:$4 sm:$0xff]   ;;  %v149_v12 = vld [vmem:[%s7914_s19 + $0x11] sm:$0xff] }
  0x40   :  { %262 = vmatprep.subr.bf16.mxu0 %v5836_v1  ;;  %v5839_v3 = vld [vmem:[%s7913_s28 + $0x34] ss:$8 sps:$4 sm:$0x3f]   ;;  %v5841_v4 = vld [vmem:[%s7913_s28 + $0x30] ss:$8 sps:$4 sm:$0x3f]  }
  0x41   :  { %263 = vmatpush1.bf16.msra.mxu0 %v5838_v2  ;;  %v147_v5 = vld [vmem:[%s7914_s19 + $0x1] sm:$0xff]  ;;  %v148_v6 = vld [vmem:[%s7914_s19 + $0x9] sm:$0xff]  ;;  %v257_v7 = vsel %vm255_vm0, %v5841_v4, 0  ;;  %v5845_v11 = vld [vmem:[%s7913_s28 + $0x14] ss:$8 sps:$4 sm:$0x3f]  }
  0x42   :  { %4908 = vmatprep.subr.msk.bf16.mxu0 %vm255_vm0, %v5839_v3  ;;  %v5844_v8 = vld [vmem:[%s7913_s28 + $0x4] ss:$8 sps:$4 sm:$0xff]   ;;  %v175_v9 = vpack.c.bf16 %v148_v6, %v147_v5  ;;  %v5842_v10 = vld [vmem:[%s7913_s28] ss:$8 sps:$4 sm:$0xff]   ;;  %v153_v21 = vld [vmem:[%s7914_s19 + $0x31] sm:$0xff] }
  0x43   :  { %v150_v13 = vld [vmem:[%s7914_s19 + $0x19] sm:$0xff]  ;;  %v5850_v17 = vld [vmem:[%s7913_s28 + $0x44] ss:$8 sps:$4 sm:$0xff]   ;;  %v157_v27 = vld [vmem:[%s7914_s19 + $0x51] sm:$0xff] }
  0x44   :  { %v5847_v14 = vld [vmem:[%s7913_s28 + $0x10] ss:$8 sps:$4 sm:$0x3f]   ;;  %v176_v16 = vpack.c.bf16 %v150_v13, %v149_v12  ;;  %v151_v18 = vld [vmem:[%s7914_s19 + $0x21] sm:$0xff] }
  0x45   :  { %265 = vmatpush1.bf16.msra.mxu0 %v257_v7  ;;  %v496_v15 = vsel %vm255_vm0, %v5847_v14, 0  ;;  %v152_v19 = vld [vmem:[%s7914_s19 + $0x29] sm:$0xff]  ;;  %v154_v22 = vld [vmem:[%s7914_s19 + $0x39] sm:$0xff]  ;;  %v155_v24 = vld [vmem:[%s7914_s19 + $0x41] sm:$0xff] }
  0x46   :  { %501 = vmatprep.subr.bf16.mxu0 %v5844_v8  ;;  %v177_v20 = vpack.c.bf16 %v152_v19, %v151_v18  ;;  %v178_v23 = vpack.c.bf16 %v154_v22, %v153_v21  ;;  %v156_v25 = vld [vmem:[%s7914_s19 + $0x49] sm:$0xff]  ;;  %v158_v28 = vld [vmem:[%s7914_s19 + $0x59] sm:$0xff]  ;;  %v159_v30 = vld [vmem:[%s7914_s19 + $0x61] sm:$0xff] }
  0x47   :  { %v179_v26 = vpack.c.bf16 %v156_v25, %v155_v24  ;;  %v180_v29 = vpack.c.bf16 %v158_v28, %v157_v27  ;;  %v160_v31 = vld [vmem:[%s7914_s19 + $0x69] sm:$0xff]  ;;  %v161_v33 = vld [vmem:[%s7914_s19 + $0x71] sm:$0xff]  ;;  %v162_v34 = vld [vmem:[%s7914_s19 + $0x79] sm:$0xff] }
  0x48   :  { %4909 = vmatmul.mubr.msk.bf16.vlgmr.msra.gmra.mrb[0].mxu0 %vm212_vm1, %v175_v9  ;;  %v181_v32 = vpack.c.bf16 %v160_v31, %v159_v30  ;;  %v182_v35 = vpack.c.bf16 %v162_v34, %v161_v33  ;;  %v163_v36 = vld [vmem:[%s7914_s19 + $0x81] sm:$0xff]  ;;  %v164_v37 = vld [vmem:[%s7914_s19 + $0x89] sm:$0xff]  ;;  %v165_v39 = vld [vmem:[%s7914_s19 + $0x91] sm:$0xff] }
  0x49   :  { %502 = vmatpush1.bf16.msra.mxu0 %v5842_v10  ;;  %304 = vmatprep.mubr.bf16.mxu0 %v6174_v0  ;;  %v183_v38 = vpack.c.bf16 %v164_v37, %v163_v36  ;;  %v166_v40 = vld [vmem:[%s7914_s19 + $0x99] sm:$0xff]  ;;  %v167_v42 = vld [vmem:[%s7914_s19 + $0xa1] sm:$0xff]  ;;  %v168_v43 = vld [vmem:[%s7914_s19 + $0xa9] sm:$0xff] }
  0x4a   :  { %4927 = vmatprep.subr.msk.bf16.mxu0 %vm255_vm0, %v5845_v11  ;;  %v184_v41 = vpack.c.bf16 %v166_v40, %v165_v39  ;;  %v185_v44 = vpack.c.bf16 %v168_v43, %v167_v42  ;;  %v169_v45 = vld [vmem:[%s7914_s19 + $0xb1] sm:$0xff]  ;;  %v170_v46 = vld [vmem:[%s7914_s19 + $0xb9] sm:$0xff]  ;;  %v171_v48 = vld [vmem:[%s7914_s19 + $0xc1] sm:$0xff] }
  0x4b   :  { %v186_v47 = vpack.c.bf16 %v170_v46, %v169_v45  ;;  %v172_v49 = vld [vmem:[%s7914_s19 + $0xc9] sm:$0xff]  ;;  %v173_v51 = vld [vmem:[%s7914_s19 + $0xd1] sm:$0xff]  ;;  %v174_v52 = vld [vmem:[%s7914_s19 + $0xd9] sm:$0xf] }
  0x4c   :  { %v187_v50 = vpack.c.bf16 %v172_v49, %v171_v48  ;;  %v188_v53 = vpack.c.bf16 %v174_v52, %v173_v51  ;;  %v101_v54 = vld [vmem:[%s7914_s19] sm:$0xff]  ;;  %v102_v55 = vld [vmem:[%s7914_s19 + $0x8] sm:$0xff]  ;;  %v5851_v58 = vld [vmem:[%s7913_s28 + $0x54] ss:$8 sps:$4 sm:$0x3f]  }
  0x4d   :  { %504 = vmatpush1.bf16.msra.mxu0 %v496_v15  ;;  %v129_v56 = vpack.c.bf16 %v102_v55, %v101_v54  ;;  %v5848_v57 = vld [vmem:[%s7913_s28 + $0x40] ss:$8 sps:$4 sm:$0xff]   ;;  %v5853_v59 = vld [vmem:[%s7913_s28 + $0x50] ss:$8 sps:$4 sm:$0x3f]  }
  0x4e   :  { %787 = vmatprep.subr.bf16.mxu0 %v5850_v17  ;;  %v103_v60 = vld [vmem:[%s7914_s19 + $0x10] sm:$0xff]  ;;  %v104_v61 = vld [vmem:[%s7914_s19 + $0x18] sm:$0xff]  ;;  %v782_v62 = vsel %vm255_vm0, %v5853_v59, 0  ;;  %v5856_v63 = vld [vmem:[%s7913_s28 + $0x64] ss:$8 sps:$4 sm:$0xff]  }
  0x4f   :  { %v130_v1 = vpack.c.bf16 %v104_v61, %v103_v60  ;;  %v105_v2 = vld [vmem:[%s7914_s19 + $0x20] sm:$0xff]  ;;  %v106_v3 = vld [vmem:[%s7914_s19 + $0x28] sm:$0xff]  ;;  %v107_v5 = vld [vmem:[%s7914_s19 + $0x30] sm:$0xff] }
  0x50   :  { %4910 = vmatmul.mubr.msk.bf16.gmra.mrb[4].mxu0 %vm212_vm1, %v176_v16  ;;  %v131_v4 = vpack.c.bf16 %v106_v3, %v105_v2  ;;  %v108_v6 = vld [vmem:[%s7914_s19 + $0x38] sm:$0xff]  ;;  %v109_v8 = vld [vmem:[%s7914_s19 + $0x40] sm:$0xff]  ;;  %v110_v9 = vld [vmem:[%s7914_s19 + $0x48] sm:$0xff] }
  0x51   :  { %314 = vmatprep.mubr.bf16.mxu0 %v6174_v0  ;;  %v132_v7 = vpack.c.bf16 %v108_v6, %v107_v5  ;;  %v133_v10 = vpack.c.bf16 %v110_v9, %v109_v8  ;;  %v111_v11 = vld [vmem:[%s7914_s19 + $0x50] sm:$0xff]  ;;  %v112_v12 = vld [vmem:[%s7914_s19 + $0x58] sm:$0xff]  ;;  %v113_v14 = vld [vmem:[%s7914_s19 + $0x60] sm:$0xff] }
  0x52   :  { %v134_v13 = vpack.c.bf16 %v112_v12, %v111_v11  ;;  %v114_v15 = vld [vmem:[%s7914_s19 + $0x68] sm:$0xff]  ;;  %v115_v17 = vld [vmem:[%s7914_s19 + $0x70] sm:$0xff]  ;;  %v116_v18 = vld [vmem:[%s7914_s19 + $0x78] sm:$0xff] }
  0x53   :  { %v135_v16 = vpack.c.bf16 %v114_v15, %v113_v14  ;;  %v136_v19 = vpack.c.bf16 %v116_v18, %v115_v17  ;;  %v118_v21 = vld [vmem:[%s7914_s19 + $0x88] sm:$0xff]  ;;  %v120_v24 = vld [vmem:[%s7914_s19 + $0x98] sm:$0xff] }
  0x54   :  { %v122_v27 = vld [vmem:[%s7914_s19 + $0xa8] sm:$0xff]  ;;  %v124_v30 = vld [vmem:[%s7914_s19 + $0xb8] sm:$0xff] }
  0x55   :  { %v126_v33 = vld [vmem:[%s7914_s19 + $0xc8] sm:$0xff]  ;;  %v128_v36 = vld [vmem:[%s7914_s19 + $0xd8] sm:$0xf]  ;;  %v5857_v42 = vld [vmem:[%s7913_s28 + $0x74] ss:$8 sps:$4 sm:$0x3f]  }
  0x56   :  { %v675_v39 = vld [vmem:[%s7914_s19 + $0xa] sm:$0xff]  ;;  %v677_v45 = vld [vmem:[%s7914_s19 + $0x1a] sm:$0xff]  ;;  %v678_v49 = vld [vmem:[%s7914_s19 + $0x22] sm:$0xff] }
  0x57   :  { %v5859_v43 = vld [vmem:[%s7913_s28 + $0x70] ss:$8 sps:$4 sm:$0x3f]   ;;  %v682_v55 = vld [vmem:[%s7914_s19 + $0x42] sm:$0xff]  ;;  %v685_v59 = vld [vmem:[%s7914_s19 + $0x5a] sm:$0xff] }
  0x58   :  { %4911 = vmatmul.mubr.msk.bf16.gmra.mrb[8].mxu0 %vm212_vm1, %v177_v20  ;;  %v117_v20 = vld [vmem:[%s7914_s19 + $0x80] sm:$0xff]  ;;  %v1124_v46 = vsel %vm255_vm0, %v5859_v43, 0  ;;  %v680_v52 = vld [vmem:[%s7914_s19 + $0x32] sm:$0xff]  ;;  %v691_v5 = vld [vmem:[%s7914_s19 + $0x8a] sm:$0xff] }
  0x59   :  { %324 = vmatprep.mubr.bf16.mxu0 %v6174_v0  ;;  %v137_v22 = vpack.c.bf16 %v118_v21, %v117_v20  ;;  %v686_v61 = vld [vmem:[%s7914_s19 + $0x62] sm:$0xff]  ;;  %v689_v2 = vld [vmem:[%s7914_s19 + $0x7a] sm:$0xff]  ;;  %v695_v11 = vld [vmem:[%s7914_s19 + $0xaa] sm:$0xff] }
  0x5a   :  { %v693_v8 = vld [vmem:[%s7914_s19 + $0x9a] sm:$0xff]  ;;  %v699_v17 = vld [vmem:[%s7914_s19 + $0xca] sm:$0xff] }
  0x5b   :  { %v697_v14 = vld [vmem:[%s7914_s19 + $0xba] sm:$0xff] }
  0x5c   :  { %v701_v20 = vld [vmem:[%s7914_s19 + $0xda] sm:$0xf] }
  0x60   :  { %4912 = vmatmul.mubr.msk.bf16.gmra.mrb[12].mxu0 %vm212_vm1, %v178_v23  ;;  %v119_v23 = vld [vmem:[%s7914_s19 + $0x90] sm:$0xff] }
  0x61   :  { %334 = vmatprep.mubr.bf16.mxu0 %v6174_v0  ;;  %v138_v25 = vpack.c.bf16 %v120_v24, %v119_v23  ;;  %v1017_v23 = vld [vmem:[%s7914_s19 + $0xb] sm:$0xff] }
  0x68   :  { %4913 = vmatmul.mubr.msk.bf16.gmra.mrb[16].mxu0 %vm212_vm1, %v179_v26  ;;  %v121_v26 = vld [vmem:[%s7914_s19 + $0xa0] sm:$0xff] }
  0x69   :  { %344 = vmatprep.mubr.bf16.mxu0 %v6174_v0  ;;  %v139_v28 = vpack.c.bf16 %v122_v27, %v121_v26  ;;  %v5863_v26 = vld [vmem:[%s7913_s28 + $0x94] ss:$8 sps:$4 sm:$0x3f]   ;;  %v5865_v27 = vld [vmem:[%s7913_s28 + $0x90] ss:$8 sps:$4 sm:$0x3f]  }
  0x70   :  { %4914 = vmatmul.mubr.msk.bf16.gmra.mrb[20].mxu0 %vm212_vm1, %v180_v29  ;;  %v123_v29 = vld [vmem:[%s7914_s19 + $0xb0] sm:$0xff] }
  0x71   :  { %354 = vmatprep.mubr.bf16.mxu0 %v6174_v0  ;;  %v140_v31 = vpack.c.bf16 %v124_v30, %v123_v29  ;;  %v1019_v29 = vld [vmem:[%s7914_s19 + $0x1b] sm:$0xff]  ;;  %v1466_v30 = vsel %vm255_vm0, %v5865_v27, 0 }
  0x72   :  { %v1373_v27 = vld [vmem:[%s7914_s19 + $0x7c] sm:$0xff] }
  0x78   :  { %4915 = vmatmul.mubr.msk.bf16.gmra.mrb[24].mxu0 %vm212_vm1, %v181_v32  ;;  %v125_v32 = vld [vmem:[%s7914_s19 + $0xc0] sm:$0xff] }
  0x79   :  { %364 = vmatprep.mubr.bf16.mxu0 %v6174_v0  ;;  %v141_v34 = vpack.c.bf16 %v126_v33, %v125_v32  ;;  %v1020_v32 = vld [vmem:[%s7914_s19 + $0x23] sm:$0xff]  ;;  %v1021_v33 = vld [vmem:[%s7914_s19 + $0x2b] sm:$0xff] }
  0x80   :  { %4916 = vmatmul.mubr.msk.bf16.gmra.mrb[28].mxu0 %vm212_vm1, %v182_v35  ;;  %v127_v35 = vld [vmem:[%s7914_s19 + $0xd0] sm:$0xff] }
  0x81   :  { %374 = vmatprep.mubr.bf16.mxu0 %v6174_v0  ;;  %v142_v37 = vpack.c.bf16 %v128_v36, %v127_v35  ;;  %v1022_v35 = vld [vmem:[%s7914_s19 + $0x33] sm:$0xff]  ;;  %v1023_v36 = vld [vmem:[%s7914_s19 + $0x3b] sm:$0xff] }
  0x88   :  { %4917 = vmatmul.mubr.msk.bf16.gmra.mrb[32].mxu0 %vm212_vm1, %v183_v38  ;;  %v674_v38 = vld [vmem:[%s7914_s19 + $0x2] sm:$0xff] }
  0x89   :  { %384 = vmatprep.mubr.bf16.mxu0 %v6174_v0  ;;  %v702_v40 = vpack.c.bf16 %v675_v39, %v674_v38  ;;  %v1024_v38 = vld [vmem:[%s7914_s19 + $0x43] sm:$0xff]  ;;  %v1025_v39 = vld [vmem:[%s7914_s19 + $0x4b] sm:$0xff] }
  0x90   :  { %4918 = vmatmul.mubr.msk.bf16.gmra.mrb[36].mxu0 %vm212_vm1, %v184_v41  ;;  %v5854_v41 = vld [vmem:[%s7913_s28 + $0x60] ss:$8 sps:$4 sm:$0xff]  }
  0x91   :  { %394 = vmatprep.mubr.bf16.mxu0 %v6174_v0 }
  0x98   :  { %4919 = vmatmul.mubr.msk.bf16.gmra.mrb[40].mxu0 %vm212_vm1, %v185_v44  ;;  %v676_v44 = vld [vmem:[%s7914_s19 + $0x12] sm:$0xff] }
  0x99   :  { %404 = vmatprep.mubr.bf16.mxu0 %v6174_v0  ;;  %v703_v48 = vpack.c.bf16 %v677_v45, %v676_v44  ;;  %v1028_v44 = vld [vmem:[%s7914_s19 + $0x63] sm:$0xff]  ;;  %v1029_v45 = vld [vmem:[%s7914_s19 + $0x6b] sm:$0xff] }
  0xa0   :  { %4920 = vmatmul.mubr.msk.bf16.gmra.mrb[44].mxu0 %vm212_vm1, %v186_v47  ;;  %v5862_v47 = vld [vmem:[%s7913_s28 + $0x84] ss:$8 sps:$4 sm:$0xff]  }
  0xa1   :  { %414 = vmatprep.mubr.bf16.mxu0 %v6174_v0 }
  0xa8   :  { %4921 = vmatmul.mubr.msk.bf16.gmra.mrb[48].mxu0 %vm212_vm1, %v187_v50  ;;  %v679_v50 = vld [vmem:[%s7914_s19 + $0x2a] sm:$0xff] }
  0xa9   :  { %424 = vmatprep.mubr.bf16.mxu0 %v6174_v0  ;;  %v704_v51 = vpack.c.bf16 %v679_v50, %v678_v49  ;;  %v1032_v50 = vld [vmem:[%s7914_s19 + $0x83] sm:$0xff] }
  0xb0   :  { %4922 = vmatmul.mubr.msk.bf16.gmra.mrb[52].mxu0 %vm212_vm1, %v188_v53  ;;  %v681_v53 = vld [vmem:[%s7914_s19 + $0x3a] sm:$0xff] }
  0xb1   :  { %533 = vmatprep.mubr.bf16.mxu0 %v6174_v0  ;;  %v705_v54 = vpack.c.bf16 %v681_v53, %v680_v52  ;;  %v1034_v53 = vld [vmem:[%s7914_s19 + $0x93] sm:$0xff] }
  0xb8   :  { %4928 = vmatmul.mubr.msk.bf16.vlgmr.msra.gmra.mrb[0].mxu0 %vm212_vm1, %v129_v56  ;;  %v683_v56 = vld [vmem:[%s7914_s19 + $0x4a] sm:$0xff] }
  0xb9   :  { %788 = vmatpush1.bf16.msra.mxu0 %v5848_v57  ;;  %543 = vmatprep.mubr.bf16.mxu0 %v6174_v0  ;;  %v706_v57 = vpack.c.bf16 %v683_v56, %v682_v55  ;;  %v1036_v56 = vld [vmem:[%s7914_s19 + $0xa3] sm:$0xff] }
  0xba   :  { %4950 = vmatprep.subr.msk.bf16.mxu0 %vm255_vm0, %v5851_v58  ;;  %v684_v58 = vld [vmem:[%s7914_s19 + $0x52] sm:$0xff] }
  0xbb   :  { %v707_v60 = vpack.c.bf16 %v685_v59, %v684_v58  ;;  %v1038_v59 = vld [vmem:[%s7914_s19 + $0xb3] sm:$0xff] }
  0xbd   :  { %790 = vmatpush1.bf16.msra.mxu0 %v782_v62  ;;  %v687_v62 = vld [vmem:[%s7914_s19 + $0x6a] sm:$0xff] }
  0xbe   :  { %1129 = vmatprep.subr.bf16.mxu0 %v5856_v63  ;;  %v708_v63 = vpack.c.bf16 %v687_v62, %v686_v61  ;;  %v1040_v62 = vld [vmem:[%s7914_s19 + $0xc3] sm:$0xff] }
  0xc0   :  { %4929 = vmatmul.mubr.msk.bf16.gmra.mrb[4].mxu0 %vm212_vm1, %v130_v1  ;;  %v688_v1 = vld [vmem:[%s7914_s19 + $0x72] sm:$0xff] }
  0xc1   :  { %553 = vmatprep.mubr.bf16.mxu0 %v6174_v0  ;;  %v709_v3 = vpack.c.bf16 %v689_v2, %v688_v1  ;;  %v1042_v2 = vld [vmem:[%s7914_s19 + $0xd3] sm:$0xff] }
  0xc8   :  { %4930 = vmatmul.mubr.msk.bf16.gmra.mrb[8].mxu0 %vm212_vm1, %v131_v4  ;;  %v690_v4 = vld [vmem:[%s7914_s19 + $0x82] sm:$0xff] }
  0xc9   :  { %563 = vmatprep.mubr.bf16.mxu0 %v6174_v0  ;;  %v710_v6 = vpack.c.bf16 %v691_v5, %v690_v4  ;;  %v1358_v5 = vld [vmem:[%s7914_s19 + $0x4] sm:$0xff] }
  0xd0   :  { %4931 = vmatmul.mubr.msk.bf16.gmra.mrb[12].mxu0 %vm212_vm1, %v132_v7  ;;  %v692_v7 = vld [vmem:[%s7914_s19 + $0x92] sm:$0xff] }
  0xd1   :  { %573 = vmatprep.mubr.bf16.mxu0 %v6174_v0  ;;  %v711_v9 = vpack.c.bf16 %v693_v8, %v692_v7  ;;  %v1360_v8 = vld [vmem:[%s7914_s19 + $0x14] sm:$0xff] }
  0xd8   :  { %4932 = vmatmul.mubr.msk.bf16.gmra.mrb[16].mxu0 %vm212_vm1, %v133_v10  ;;  %v694_v10 = vld [vmem:[%s7914_s19 + $0xa2] sm:$0xff] }
  0xd9   :  { %583 = vmatprep.mubr.bf16.mxu0 %v6174_v0  ;;  %v712_v12 = vpack.c.bf16 %v695_v11, %v694_v10  ;;  %v1362_v11 = vld [vmem:[%s7914_s19 + $0x24] sm:$0xff] }
  0xe0   :  { %4933 = vmatmul.mubr.msk.bf16.gmra.mrb[20].mxu0 %vm212_vm1, %v134_v13  ;;  %v696_v13 = vld [vmem:[%s7914_s19 + $0xb2] sm:$0xff] }
  0xe1   :  { %593 = vmatprep.mubr.bf16.mxu0 %v6174_v0  ;;  %v713_v15 = vpack.c.bf16 %v697_v14, %v696_v13  ;;  %v1364_v14 = vld [vmem:[%s7914_s19 + $0x34] sm:$0xff] }
  0xe8   :  { %4934 = vmatmul.mubr.msk.bf16.gmra.mrb[24].mxu0 %vm212_vm1, %v135_v16  ;;  %v698_v16 = vld [vmem:[%s7914_s19 + $0xc2] sm:$0xff] }
  0xe9   :  { %603 = vmatprep.mubr.bf16.mxu0 %v6174_v0  ;;  %v714_v18 = vpack.c.bf16 %v699_v17, %v698_v16  ;;  %v1366_v17 = vld [vmem:[%s7914_s19 + $0x44] sm:$0xff] }
  0xf0   :  { %4935 = vmatmul.mubr.msk.bf16.gmra.mrb[28].mxu0 %vm212_vm1, %v136_v19  ;;  %v700_v19 = vld [vmem:[%s7914_s19 + $0xd2] sm:$0xff] }
  0xf1   :  { %613 = vmatprep.mubr.bf16.mxu0 %v6174_v0  ;;  %v715_v21 = vpack.c.bf16 %v701_v20, %v700_v19  ;;  %v1368_v20 = vld [vmem:[%s7914_s19 + $0x54] sm:$0xff] }
  0xf8   :  { %4936 = vmatmul.mubr.msk.bf16.gmra.mrb[32].mxu0 %vm212_vm1, %v137_v22  ;;  %v1016_v22 = vld [vmem:[%s7914_s19 + $0x3] sm:$0xff] }
  0xf9   :  { %623 = vmatprep.mubr.bf16.mxu0 %v6174_v0  ;;  %v1044_v24 = vpack.c.bf16 %v1017_v23, %v1016_v22  ;;  %v1370_v23 = vld [vmem:[%s7914_s19 + $0x64] sm:$0xff] }
 0x100   :  { %4937 = vmatmul.mubr.msk.bf16.gmra.mrb[36].mxu0 %vm212_vm1, %v138_v25  ;;  %v5860_v25 = vld [vmem:[%s7913_s28 + $0x80] ss:$8 sps:$4 sm:$0xff]  }
 0x101   :  { %633 = vmatprep.mubr.bf16.mxu0 %v6174_v0 }
 0x108   :  { %4938 = vmatmul.mubr.msk.bf16.gmra.mrb[40].mxu0 %vm212_vm1, %v139_v28  ;;  %v1018_v28 = vld [vmem:[%s7914_s19 + $0x13] sm:$0xff] }
 0x109   :  { %643 = vmatprep.mubr.bf16.mxu0 %v6174_v0 }
 0x110   :  { %4939 = vmatmul.mubr.msk.bf16.gmra.mrb[44].mxu0 %vm212_vm1, %v140_v31  ;;  %v1045_v31 = vpack.c.bf16 %v1019_v29, %v1018_v28  ;;  %v1374_v29 = vld [vmem:[%s7914_s19 + $0x84] sm:$0xff] }
 0x111   :  { %653 = vmatprep.mubr.bf16.mxu0 %v6174_v0 }
 0x118   :  { %4940 = vmatmul.mubr.msk.bf16.gmra.mrb[48].mxu0 %vm212_vm1, %v141_v34  ;;  %v1046_v34 = vpack.c.bf16 %v1021_v33, %v1020_v32  ;;  %v1376_v32 = vld [vmem:[%s7914_s19 + $0x94] sm:$0xff]  ;;  %v1377_v33 = vld [vmem:[%s7914_s19 + $0x9c] sm:$0xff] }
 0x119   :  { %663 = vmatprep.mubr.bf16.mxu0 %v6174_v0 }
 0x120   :  { %4941 = vmatmul.mubr.msk.bf16.gmra.mrb[52].mxu0 %vm212_vm1, %v142_v37  ;;  %v1047_v37 = vpack.c.bf16 %v1023_v36, %v1022_v35  ;;  %v1378_v35 = vld [vmem:[%s7914_s19 + $0xa4] sm:$0xff]  ;;  %v1379_v36 = vld [vmem:[%s7914_s19 + $0xac] sm:$0xff] }
 0x121   :  { %819 = vmatprep.mubr.bf16.mxu0 %v6174_v0 }
 0x128   :  { %4951 = vmatmul.mubr.msk.bf16.vlgmr.msra.gmra.mrb[0].mxu0 %vm212_vm1, %v702_v40  ;;  %v1048_v40 = vpack.c.bf16 %v1025_v39, %v1024_v38  ;;  %v1380_v38 = vld [vmem:[%s7914_s19 + $0xb4] sm:$0xff]  ;;  %v1381_v39 = vld [vmem:[%s7914_s19 + $0xbc] sm:$0xff] }
 0x129   :  { %1130 = vmatpush1.bf16.msra.mxu0 %v5854_v41  ;;  %829 = vmatprep.mubr.bf16.mxu0 %v6174_v0  ;;  %v1026_v41 = vld [vmem:[%s7914_s19 + $0x53] sm:$0xff] }
 0x12a   :  { %4973 = vmatprep.subr.msk.bf16.mxu0 %vm255_vm0, %v5857_v42  ;;  %v1027_v42 = vld [vmem:[%s7914_s19 + $0x5b] sm:$0xff] }
 0x12b   :  { %v1049_v43 = vpack.c.bf16 %v1027_v42, %v1026_v41  ;;  %v1382_v41 = vld [vmem:[%s7914_s19 + $0xc4] sm:$0xff]  ;;  %v1383_v42 = vld [vmem:[%s7914_s19 + $0xcc] sm:$0xff] }
 0x12d   :  { %1132 = vmatpush1.bf16.msra.mxu0 %v1124_v46  ;;  %v1050_v46 = vpack.c.bf16 %v1029_v45, %v1028_v44  ;;  %v1384_v44 = vld [vmem:[%s7914_s19 + $0xd4] sm:$0xff]  ;;  %v1385_v45 = vld [vmem:[%s7914_s19 + $0xdc] sm:$0xf] }
 0x12e   :  { %1471 = vmatprep.subr.bf16.mxu0 %v5862_v47  ;;  %v1030_v47 = vld [vmem:[%s7914_s19 + $0x73] sm:$0xff] }
 0x130   :  { %4952 = vmatmul.mubr.msk.bf16.gmra.mrb[4].mxu0 %vm212_vm1, %v703_v48  ;;  %v1031_v48 = vld [vmem:[%s7914_s19 + $0x7b] sm:$0xff] }
 0x131   :  { %839 = vmatprep.mubr.bf16.mxu0 %v6174_v0  ;;  %v1051_v49 = vpack.c.bf16 %v1031_v48, %v1030_v47  ;;  %v5868_v47 = vld [vmem:[%s7915_s20 + $0x4] ss:$8 sps:$4 sm:$0xff]  }
 0x132   :  { %5024 = vmatprep.mubr.msk.bf16.mxu1 %vm1794_vm2, %v5868_v47 }
 0x138   :  { %4953 = vmatmul.mubr.msk.bf16.gmra.mrb[8].mxu0 %vm212_vm1, %v704_v51  ;;  %v1033_v51 = vld [vmem:[%s7914_s19 + $0x8b] sm:$0xff] }
 0x139   :  { %849 = vmatprep.mubr.bf16.mxu0 %v6174_v0  ;;  %v1052_v52 = vpack.c.bf16 %v1033_v51, %v1032_v50 }
 0x140   :  { %4954 = vmatmul.mubr.msk.bf16.gmra.mrb[12].mxu0 %vm212_vm1, %v705_v54  ;;  %v1035_v54 = vld [vmem:[%s7914_s19 + $0x9b] sm:$0xff] }
 0x141   :  { %859 = vmatprep.mubr.bf16.mxu0 %v6174_v0  ;;  %v1053_v55 = vpack.c.bf16 %v1035_v54, %v1034_v53 }
 0x148   :  { %4955 = vmatmul.mubr.msk.bf16.gmra.mrb[16].mxu0 %vm212_vm1, %v706_v57  ;;  %v1037_v57 = vld [vmem:[%s7914_s19 + $0xab] sm:$0xff] }
 0x149   :  { %869 = vmatprep.mubr.bf16.mxu0 %v6174_v0  ;;  %v1054_v58 = vpack.c.bf16 %v1037_v57, %v1036_v56 }
 0x150   :  { %4956 = vmatmul.mubr.msk.bf16.gmra.mrb[20].mxu0 %vm212_vm1, %v707_v60  ;;  %v1039_v60 = vld [vmem:[%s7914_s19 + $0xbb] sm:$0xff] }
 0x151   :  { %879 = vmatprep.mubr.bf16.mxu0 %v6174_v0  ;;  %v1055_v61 = vpack.c.bf16 %v1039_v60, %v1038_v59 }
 0x158   :  { %4957 = vmatmul.mubr.msk.bf16.gmra.mrb[24].mxu0 %vm212_vm1, %v708_v63  ;;  %v1041_v63 = vld [vmem:[%s7914_s19 + $0xcb] sm:$0xff] }
 0x159   :  { %889 = vmatprep.mubr.bf16.mxu0 %v6174_v0  ;;  %v1056_v1 = vpack.c.bf16 %v1041_v63, %v1040_v62 }
 0x160   :  { %4958 = vmatmul.mubr.msk.bf16.gmra.mrb[28].mxu0 %vm212_vm1, %v709_v3  ;;  %v1043_v3 = vld [vmem:[%s7914_s19 + $0xdb] sm:$0xf] }
 0x161   :  { %899 = vmatprep.mubr.bf16.mxu0 %v6174_v0  ;;  %v1057_v4 = vpack.c.bf16 %v1043_v3, %v1042_v2 }
 0x168   :  { %4959 = vmatmul.mubr.msk.bf16.gmra.mrb[32].mxu0 %vm212_vm1, %v710_v6  ;;  %v1359_v6 = vld [vmem:[%s7914_s19 + $0xc] sm:$0xff] }
 0x169   :  { %909 = vmatprep.mubr.bf16.mxu0 %v6174_v0  ;;  %v1386_v7 = vpack.c.bf16 %v1359_v6, %v1358_v5 }
 0x170   :  { %4960 = vmatmul.mubr.msk.bf16.gmra.mrb[36].mxu0 %vm212_vm1, %v711_v9  ;;  %v1361_v9 = vld [vmem:[%s7914_s19 + $0x1c] sm:$0xff] }
 0x171   :  { %919 = vmatprep.mubr.bf16.mxu0 %v6174_v0  ;;  %v1387_v10 = vpack.c.bf16 %v1361_v9, %v1360_v8 }
 0x178   :  { %4961 = vmatmul.mubr.msk.bf16.gmra.mrb[40].mxu0 %vm212_vm1, %v712_v12  ;;  %v1363_v12 = vld [vmem:[%s7914_s19 + $0x2c] sm:$0xff] }
 0x179   :  { %929 = vmatprep.mubr.bf16.mxu0 %v6174_v0  ;;  %v1388_v13 = vpack.c.bf16 %v1363_v12, %v1362_v11 }
 0x180   :  { %4962 = vmatmul.mubr.msk.bf16.gmra.mrb[44].mxu0 %vm212_vm1, %v713_v15  ;;  %v1365_v15 = vld [vmem:[%s7914_s19 + $0x3c] sm:$0xff] }
 0x181   :  { %939 = vmatprep.mubr.bf16.mxu0 %v6174_v0  ;;  %v1389_v16 = vpack.c.bf16 %v1365_v15, %v1364_v14 }
 0x188   :  { %4963 = vmatmul.mubr.msk.bf16.gmra.mrb[48].mxu0 %vm212_vm1, %v714_v18  ;;  %v1367_v18 = vld [vmem:[%s7914_s19 + $0x4c] sm:$0xff] }
 0x189   :  { %949 = vmatprep.mubr.bf16.mxu0 %v6174_v0  ;;  %v1390_v19 = vpack.c.bf16 %v1367_v18, %v1366_v17 }
 0x190   :  { %4964 = vmatmul.mubr.msk.bf16.gmra.mrb[52].mxu0 %vm212_vm1, %v715_v21  ;;  %v1369_v21 = vld [vmem:[%s7914_s19 + $0x5c] sm:$0xff] }
 0x191   :  { %1161 = vmatprep.mubr.bf16.mxu0 %v6174_v0  ;;  %v1391_v22 = vpack.c.bf16 %v1369_v21, %v1368_v20 }
 0x198   :  { %4974 = vmatmul.mubr.msk.bf16.vlgmr.msra.gmra.mrb[0].mxu0 %vm212_vm1, %v1044_v24  ;;  %v1371_v24 = vld [vmem:[%s7914_s19 + $0x6c] sm:$0xff] }
 0x199   :  { %1472 = vmatpush1.bf16.msra.mxu0 %v5860_v25  ;;  %1171 = vmatprep.mubr.bf16.mxu0 %v6174_v0  ;;  %v1392_v25 = vpack.c.bf16 %v1371_v24, %v1370_v23 }
 0x19a   :  { %4996 = vmatprep.subr.msk.bf16.mxu0 %vm255_vm0, %v5863_v26  ;;  %v1372_v26 = vld [vmem:[%s7914_s19 + $0x74] sm:$0xff] }
 0x19b   :  { %v1393_v28 = vpack.c.bf16 %v1373_v27, %v1372_v26 }
 0x19d   :  { %1474 = vmatpush1.bf16.msra.mxu0 %v1466_v30  ;;  %v1375_v30 = vld [vmem:[%s7914_s19 + $0x8c] sm:$0xff] }
 0x19e   :  { %4067 = vmatprep.subr.bf16.mxu0 %v6174_v0 }
 0x1a0   :  { %4975 = vmatmul.mubr.msk.bf16.gmra.mrb[4].mxu0 %vm212_vm1, %v1045_v31  ;;  %v1394_v31 = vpack.c.bf16 %v1375_v30, %v1374_v29 }
 0x1a1   :  { %1181 = vmatprep.mubr.bf16.mxu0 %v6174_v0 }
 0x1a8   :  { %4976 = vmatmul.mubr.msk.bf16.gmra.mrb[8].mxu0 %vm212_vm1, %v1046_v34  ;;  %v1395_v34 = vpack.c.bf16 %v1377_v33, %v1376_v32 }
 0x1a9   :  { %1191 = vmatprep.mubr.bf16.mxu0 %v6174_v0 }
 0x1b0   :  { %4977 = vmatmul.mubr.msk.bf16.gmra.mrb[12].mxu0 %vm212_vm1, %v1047_v37  ;;  %v1396_v37 = vpack.c.bf16 %v1379_v36, %v1378_v35 }
 0x1b1   :  { %1201 = vmatprep.mubr.bf16.mxu0 %v6174_v0 }
 0x1b8   :  { %4978 = vmatmul.mubr.msk.bf16.gmra.mrb[16].mxu0 %vm212_vm1, %v1048_v40  ;;  %v1397_v40 = vpack.c.bf16 %v1381_v39, %v1380_v38 }
 0x1b9   :  { %1211 = vmatprep.mubr.bf16.mxu0 %v6174_v0 }
 0x1c0   :  { %4979 = vmatmul.mubr.msk.bf16.gmra.mrb[20].mxu0 %vm212_vm1, %v1049_v43  ;;  %v1398_v43 = vpack.c.bf16 %v1383_v42, %v1382_v41 }
 0x1c1   :  { %1221 = vmatprep.mubr.bf16.mxu0 %v6174_v0 }
 0x1c8   :  { %4980 = vmatmul.mubr.msk.bf16.gmra.mrb[24].mxu0 %vm212_vm1, %v1050_v46  ;;  %v1399_v46 = vpack.c.bf16 %v1385_v45, %v1384_v44 }
 0x1c9   :  { %1231 = vmatprep.mubr.bf16.mxu0 %v6174_v0 }
 0x1d0   :  { %4981 = vmatmul.mubr.msk.bf16.gmra.mrb[28].mxu0 %vm212_vm1, %v1051_v49 }
 0x1d1   :  { %1241 = vmatprep.mubr.bf16.mxu0 %v6174_v0 }
 0x1d8   :  { %4982 = vmatmul.mubr.msk.bf16.gmra.mrb[32].mxu0 %vm212_vm1, %v1052_v52 }
 0x1d9   :  { %1251 = vmatprep.mubr.bf16.mxu0 %v6174_v0 }
 0x1e0   :  { %4983 = vmatmul.mubr.msk.bf16.gmra.mrb[36].mxu0 %vm212_vm1, %v1053_v55 }
 0x1e1   :  { %1261 = vmatprep.mubr.bf16.mxu0 %v6174_v0 }
 0x1e8   :  { %4984 = vmatmul.mubr.msk.bf16.gmra.mrb[40].mxu0 %vm212_vm1, %v1054_v58 }
 0x1e9   :  { %1271 = vmatprep.mubr.bf16.mxu0 %v6174_v0 }
 0x1f0   :  { %4985 = vmatmul.mubr.msk.bf16.gmra.mrb[44].mxu0 %vm212_vm1, %v1055_v61 }
 0x1f1   :  { %1281 = vmatprep.mubr.bf16.mxu0 %v6174_v0 }
 0x1f8   :  { %4986 = vmatmul.mubr.msk.bf16.gmra.mrb[48].mxu0 %vm212_vm1, %v1056_v1 }
 0x1f9   :  { %1291 = vmatprep.mubr.bf16.mxu0 %v6174_v0 }
 0x200   :  { %4987 = vmatmul.mubr.msk.bf16.gmra.mrb[52].mxu0 %vm212_vm1, %v1057_v4 }
 0x201   :  { %1503 = vmatprep.mubr.bf16.mxu0 %v6174_v0 }
 0x208   :  { %4997 = vmatmul.mubr.msk.bf16.vlgmr.msra.gmra.mrb[0].mxu0 %vm212_vm1, %v1386_v7 }
 0x209   :  { %1513 = vmatprep.mubr.bf16.mxu0 %v6174_v0 }
 0x210   :  { %4998 = vmatmul.mubr.msk.bf16.gmra.mrb[4].mxu0 %vm212_vm1, %v1387_v10 }
 0x211   :  { %1523 = vmatprep.mubr.bf16.mxu0 %v6174_v0 }
 0x218   :  { %4999 = vmatmul.mubr.msk.bf16.gmra.mrb[8].mxu0 %vm212_vm1, %v1388_v13 }
 0x219   :  { %1533 = vmatprep.mubr.bf16.mxu0 %v6174_v0 }
 0x220   :  { %5000 = vmatmul.mubr.msk.bf16.gmra.mrb[12].mxu0 %vm212_vm1, %v1389_v16 }
 0x221   :  { %1543 = vmatprep.mubr.bf16.mxu0 %v6174_v0 }
 0x228   :  { %5001 = vmatmul.mubr.msk.bf16.gmra.mrb[16].mxu0 %vm212_vm1, %v1390_v19 }
 0x229   :  { %1553 = vmatprep.mubr.bf16.mxu0 %v6174_v0 }
 0x230   :  { %5002 = vmatmul.mubr.msk.bf16.gmra.mrb[20].mxu0 %vm212_vm1, %v1391_v22 }
 0x231   :  { %1563 = vmatprep.mubr.bf16.mxu0 %v6174_v0 }
 0x238   :  { %5003 = vmatmul.mubr.msk.bf16.gmra.mrb[24].mxu0 %vm212_vm1, %v1392_v25 }
 0x239   :  { %1573 = vmatprep.mubr.bf16.mxu0 %v6174_v0 }
 0x240   :  { %5004 = vmatmul.mubr.msk.bf16.gmra.mrb[28].mxu0 %vm212_vm1, %v1393_v28 }
 0x241   :  { %1583 = vmatprep.mubr.bf16.mxu0 %v6174_v0 }
 0x248   :  { %5005 = vmatmul.mubr.msk.bf16.gmra.mrb[32].mxu0 %vm212_vm1, %v1394_v31 }
 0x249   :  { %1593 = vmatprep.mubr.bf16.mxu0 %v6174_v0 }
 0x250   :  { %5006 = vmatmul.mubr.msk.bf16.gmra.mrb[36].mxu0 %vm212_vm1, %v1395_v34 }
 0x251   :  { %1603 = vmatprep.mubr.bf16.mxu0 %v6174_v0 }
 0x258   :  { %5007 = vmatmul.mubr.msk.bf16.gmra.mrb[40].mxu0 %vm212_vm1, %v1396_v37 }
 0x259   :  { %1613 = vmatprep.mubr.bf16.mxu0 %v6174_v0 }
 0x260   :  { %5008 = vmatmul.mubr.msk.bf16.gmra.mrb[44].mxu0 %vm212_vm1, %v1397_v40 }
 0x261   :  { %1623 = vmatprep.mubr.bf16.mxu0 %v6174_v0 }
 0x268   :  { %5009 = vmatmul.mubr.msk.bf16.gmra.mrb[48].mxu0 %vm212_vm1, %v1398_v43 }
 0x269   :  { %1633 = vmatprep.mubr.bf16.mxu0 %v6174_v0 }
 0x270   :  { %5010 = vmatmul.mubr.msk.bf16.gmra.mrb[52].mxu0 %vm212_vm1, %v1399_v46 }
 0x2db   :  { %v1505_v48 = vpop.f32.mrb[0].mxu0 }
 0x2dc   :  { %v1507_v49 = vpop.f32.mrb[1].mxu0 }
 0x2dd   :  { %v1509_v50 = vpop.f32.mrb[2].mxu0 }
 0x2de   :  { %v6959_v51 = vpack.c.bf16 %v1509_v50, %v1505_v48  ;;  %v1511_v52 = vpop.f32.mrb[3].mxu0 }
 0x2df   :  { %v6961_v53 = vpack.c.bf16 %v1511_v52, %v1507_v49 }
 0x2e1   :  { %1819 = vmatprep.subr.bf16.mxu1 %v6961_v53 }
 0x2e2   :  { %1820 = vmatpush1.bf16.msra.mxu1 %v6959_v51 }
 0x2e3   :  { %v1515_v54 = vpop.f32.mrb[4].mxu0 }
 0x2e4   :  { %v1517_v55 = vpop.f32.mrb[5].mxu0 }
 0x2e5   :  { %v1519_v56 = vpop.f32.mrb[6].mxu0 }
 0x2e6   :  { %v6965_v57 = vpack.c.bf16 %v1519_v56, %v1515_v54  ;;  %v1521_v58 = vpop.f32.mrb[7].mxu0 }
 0x2e7   :  { %v6967_v59 = vpack.c.bf16 %v1521_v58, %v1517_v55 }
 0x2e9   :  { %1821 = vmatprep.subr.bf16.mxu1 %v6967_v59 }
 0x2ea   :  { %1822 = vmatpush1.bf16.msra.mxu1 %v6965_v57 }
 0x2eb   :  { %v1525_v60 = vpop.f32.mrb[8].mxu0 }
 0x2ec   :  { %v1527_v61 = vpop.f32.mrb[9].mxu0 }
 0x2ed   :  { %v1529_v62 = vpop.f32.mrb[10].mxu0 }
 0x2ee   :  { %v6971_v63 = vpack.c.bf16 %v1529_v62, %v1525_v60  ;;  %v1531_v1 = vpop.f32.mrb[11].mxu0 }
 0x2ef   :  { %v6973_v2 = vpack.c.bf16 %v1531_v1, %v1527_v61 }
 0x2f1   :  { %1823 = vmatprep.subr.bf16.mxu1 %v6973_v2 }
 0x2f2   :  { %1824 = vmatpush1.bf16.msra.mxu1 %v6971_v63 }
 0x2f3   :  { %v1535_v3 = vpop.f32.mrb[12].mxu0 }
 0x2f4   :  { %v1537_v4 = vpop.f32.mrb[13].mxu0 }
 0x2f5   :  { %v1539_v5 = vpop.f32.mrb[14].mxu0 }
 0x2f6   :  { %v6977_v6 = vpack.c.bf16 %v1539_v5, %v1535_v3  ;;  %v1541_v7 = vpop.f32.mrb[15].mxu0 }
 0x2f7   :  { %v6979_v8 = vpack.c.bf16 %v1541_v7, %v1537_v4 }
 0x2f9   :  { %1825 = vmatprep.subr.bf16.mxu1 %v6979_v8 }
 0x2fa   :  { %1826 = vmatpush1.bf16.msra.mxu1 %v6977_v6 }
 0x2fb   :  { %v1545_v9 = vpop.f32.mrb[16].mxu0 }
 0x2fc   :  { %v1547_v10 = vpop.f32.mrb[17].mxu0 }
 0x2fd   :  { %v1549_v11 = vpop.f32.mrb[18].mxu0 }
 0x2fe   :  { %v6983_v12 = vpack.c.bf16 %v1549_v11, %v1545_v9  ;;  %v1551_v13 = vpop.f32.mrb[19].mxu0 }
 0x2ff   :  { %v6985_v14 = vpack.c.bf16 %v1551_v13, %v1547_v10 }
 0x301   :  { %1827 = vmatprep.subr.bf16.mxu1 %v6985_v14 }
 0x302   :  { %1828 = vmatpush1.bf16.msra.mxu1 %v6983_v12 }
 0x303   :  { %v1555_v15 = vpop.f32.mrb[20].mxu0 }
 0x304   :  { %v1557_v16 = vpop.f32.mrb[21].mxu0 }
 0x305   :  { %v1559_v17 = vpop.f32.mrb[22].mxu0 }
 0x306   :  { %v6989_v18 = vpack.c.bf16 %v1559_v17, %v1555_v15  ;;  %v1561_v19 = vpop.f32.mrb[23].mxu0  ;;  %v5866_v17 = vld [vmem:[%s7915_s20] ss:$8 sps:$4 sm:$0xff]  }
 0x307   :  { %v6991_v20 = vpack.c.bf16 %v1561_v19, %v1557_v16  ;;  %v5869_v19 = vld [vmem:[%s7915_s20 + $0x14] ss:$8 sps:$4 sm:$0xff]  }
 0x309   :  { %1829 = vmatprep.subr.bf16.mxu1 %v6991_v20 }
 0x30a   :  { %1830 = vmatpush1.bf16.msra.mxu1 %v6989_v18 }
 0x30b   :  { %v1565_v21 = vpop.f32.mrb[24].mxu0 }
 0x30c   :  { %v1567_v22 = vpop.f32.mrb[25].mxu0 }
 0x30d   :  { %v1569_v23 = vpop.f32.mrb[26].mxu0 }
 0x30e   :  { %v6995_v24 = vpack.c.bf16 %v1569_v23, %v1565_v21  ;;  %v1571_v25 = vpop.f32.mrb[27].mxu0  ;;  %v5871_v21 = vld [vmem:[%s7915_s20 + $0x10] ss:$8 sps:$4 sm:$0xff]   ;;  %v5892_v23 = vld [vmem:[%s7891_s3 + $0x20] ss:$8 sps:$4 sm:$0xff]  }
 0x30f   :  { %v6997_v26 = vpack.c.bf16 %v1571_v25, %v1567_v22  ;;  %v5872_v22 = vld [vmem:[%s7915_s20 + $0x24] ss:$8 sps:$4 sm:$0xff]   ;;  %v5895_v25 = vld [vmem:[%s7891_s3 + $0x30] ss:$8 sps:$4 sm:$0xff]  }
 0x311   :  { %1831 = vmatprep.subr.bf16.mxu1 %v6997_v26 }
 0x312   :  { %1832 = vmatpush1.bf16.msra.mxu1 %v6995_v24 }
 0x313   :  { %v1575_v27 = vpop.f32.mrb[28].mxu0 }
 0x314   :  { %v1577_v28 = vpop.f32.mrb[29].mxu0 }
 0x315   :  { %v1579_v29 = vpop.f32.mrb[30].mxu0 }
 0x316   :  { %v7001_v30 = vpack.c.bf16 %v1579_v29, %v1575_v27  ;;  %v1581_v31 = vpop.f32.mrb[31].mxu0  ;;  %v5898_v27 = vld [vmem:[%s7891_s3 + $0x40] ss:$8 sps:$4 sm:$0xff]  }
 0x317   :  { %v7003_v32 = vpack.c.bf16 %v1581_v31, %v1577_v28  ;;  %v5899_v28 = vld [vmem:[%s7891_s3 + $0x54] ss:$8 sps:$4 sm:$0xff]   ;;  %v5902_v29 = vld [vmem:[%s7892_s4] sm:$0xff]   ;;  %v5901_v31 = vld [vmem:[%s7891_s3 + $0x50] ss:$8 sps:$4 sm:$0xff]  }
 0x319   :  { %1833 = vmatprep.subr.bf16.mxu1 %v7003_v32 }
 0x31a   :  { %1834 = vmatpush1.bf16.msra.mxu1 %v7001_v30 }
 0x31b   :  { %v1585_v33 = vpop.f32.mrb[32].mxu0 }
 0x31c   :  { %v1587_v34 = vpop.f32.mrb[33].mxu0 }
 0x31d   :  { %v1589_v35 = vpop.f32.mrb[34].mxu0 }
 0x31e   :  { %v7007_v36 = vpack.c.bf16 %v1589_v35, %v1585_v33  ;;  %v1591_v37 = vpop.f32.mrb[35].mxu0  ;;  %v5905_v33 = vld [vmem:[%s7892_s4 + $0x18] sm:$0xff]   ;;  %v5907_v35 = vld [vmem:[%s7892_s4 + $0x28] sm:$0xff]  }
 0x31f   :  { %v7009_v38 = vpack.c.bf16 %v1591_v37, %v1587_v34  ;;  %v5906_v34 = vld [vmem:[%s7892_s4 + $0x20] sm:$0xff]   ;;  %v5909_v37 = vld [vmem:[%s7892_s4 + $0x38] sm:$0xff]  }
 0x321   :  { %1835 = vmatprep.subr.bf16.mxu1 %v7009_v38 }
 0x322   :  { %1836 = vmatpush1.bf16.msra.mxu1 %v7007_v36 }
 0x323   :  { %v1595_v39 = vpop.f32.mrb[36].mxu0 }
 0x324   :  { %v1597_v40 = vpop.f32.mrb[37].mxu0 }
 0x325   :  { %v1599_v41 = vpop.f32.mrb[38].mxu0 }
 0x326   :  { %v7013_v42 = vpack.c.bf16 %v1599_v41, %v1595_v39  ;;  %v1601_v43 = vpop.f32.mrb[39].mxu0  ;;  %v5911_v39 = vld [vmem:[%s7892_s4 + $0x48] sm:$0xff]   ;;  %v5913_v41 = vld [vmem:[%s7892_s4 + $0x58] sm:$0xff]  }
 0x327   :  { %v7015_v44 = vpack.c.bf16 %v1601_v43, %v1597_v40  ;;  %v5912_v40 = vld [vmem:[%s7892_s4 + $0x50] sm:$0xff]   ;;  %v5915_v43 = vld [vmem:[%s7892_s4 + $0x68] sm:$0xff]  }
 0x329   :  { %1837 = vmatprep.subr.bf16.mxu1 %v7015_v44 }
 0x32a   :  { %1838 = vmatpush1.bf16.msra.mxu1 %v7013_v42 }
 0x32b   :  { %v1605_v45 = vpop.f32.mrb[40].mxu0 }
 0x32c   :  { %v1607_v46 = vpop.f32.mrb[41].mxu0 }
 0x32d   :  { %v1609_v47 = vpop.f32.mrb[42].mxu0 }
 0x32e   :  { %v7019_v48 = vpack.c.bf16 %v1609_v47, %v1605_v45  ;;  %v1611_v49 = vpop.f32.mrb[43].mxu0 }
 0x32f   :  { %v7021_v50 = vpack.c.bf16 %v1611_v49, %v1607_v46 }
 0x331   :  { %1839 = vmatprep.subr.bf16.mxu1 %v7021_v50 }
 0x332   :  { %1840 = vmatpush1.bf16.msra.mxu1 %v7019_v48 }
 0x333   :  { %v1615_v52 = vpop.f32.mrb[44].mxu0 }
 0x334   :  { %v1617_v54 = vpop.f32.mrb[45].mxu0 }
 0x335   :  { %v1619_v55 = vpop.f32.mrb[46].mxu0 }
 0x336   :  { %v7025_v56 = vpack.c.bf16 %v1619_v55, %v1615_v52  ;;  %v1621_v58 = vpop.f32.mrb[47].mxu0 }
 0x337   :  { %v7027_v60 = vpack.c.bf16 %v1621_v58, %v1617_v54 }
 0x339   :  { %1841 = vmatprep.subr.bf16.mxu1 %v7027_v60 }
 0x33a   :  { %1842 = vmatpush1.bf16.msra.mxu1 %v7025_v56 }
 0x33b   :  { %v1625_v61 = vpop.f32.mrb[48].mxu0 }
 0x33c   :  { %v1627_v62 = vpop.f32.mrb[49].mxu0 }
 0x33d   :  { %v1629_v1 = vpop.f32.mrb[50].mxu0 }
 0x33e   :  { %v1724_v3 = vpack.c.bf16 %v1629_v1, %v1625_v61  ;;  %v1631_v4 = vpop.f32.mrb[51].mxu0 }
 0x33f   :  { %v1725_v5 = vpack.c.bf16 %v1631_v4, %v1627_v62 }
 0x341   :  { %1843 = vmatprep.subr.bf16.mxu1 %v1725_v5 }
 0x342   :  { %1844 = vmatpush1.bf16.msra.mxu1 %v1724_v3 }
 0x343   :  { %v1635_v7 = vpop.f32.mrb[52].mxu0 }
 0x344   :  { %v1637_v9 = vpop.f32.mrb[53].mxu0 }
 0x345   :  { %v1639_v10 = vpop.f32.mrb[54].mxu0 }
 0x346   :  { %v1726_v11 = vpack.c.bf16 %v1639_v10, %v1635_v7  ;;  %v1641_v13 = vpop.f32.mrb[55].mxu0 }
 0x347   :  { %v1727_v15 = vpack.c.bf16 %v1641_v13, %v1637_v9 }
 0x348   :  { %v1814_v16 = vsel %vm255_vm0, %v1726_v11, 0 }
 0x349   :  { %5023 = vmatprep.subr.msk.bf16.mxu1 %vm255_vm0, %v1727_v15 }
 0x34a   :  { %1846 = vmatpush1.bf16.msra.mxu1 %v1814_v16 }
 0x34b   :  { %1996 = vmatprep.subr.bf16.mxu1 %v6961_v53  ;;  %v5875_v53 = vld [vmem:[%s7915_s20 + $0x34] ss:$8 sps:$4 sm:$0xff]  }
 0x34d   :  { %1852 = vmatmul.mubr.bf16.vlgmr.msra.gmra.mrb[0].mxu1 %v5866_v17 }
 0x34e   :  { %1997 = vmatpush1.bf16.msra.mxu1 %v6959_v51  ;;  %5025 = vmatprep.mubr.msk.bf16.mxu1 %vm1794_vm2, %v5869_v19  ;;  %v5874_v51 = vld [vmem:[%s7915_s20 + $0x20] ss:$8 sps:$4 sm:$0xff]  }
 0x34f   :  { %1998 = vmatprep.subr.bf16.mxu1 %v6967_v59  ;;  %v5878_v59 = vld [vmem:[%s7915_s20 + $0x44] ss:$8 sps:$4 sm:$0xff]  }
 0x352   :  { %1999 = vmatpush1.bf16.msra.mxu1 %v6965_v57  ;;  %v5877_v57 = vld [vmem:[%s7915_s20 + $0x30] ss:$8 sps:$4 sm:$0xff]  }
 0x353   :  { %2000 = vmatprep.subr.bf16.mxu1 %v6973_v2  ;;  %v5881_v2 = vld [vmem:[%s7915_s20 + $0x54] ss:$8 sps:$4 sm:$0xff]  }
 0x355   :  { %1862 = vmatmul.mubr.bf16.gmra.mrb[4].mxu1 %v5871_v21 }
 0x356   :  { %2001 = vmatpush1.bf16.msra.mxu1 %v6971_v63  ;;  %5026 = vmatprep.mubr.msk.bf16.mxu1 %vm1794_vm2, %v5872_v22  ;;  %v5880_v63 = vld [vmem:[%s7915_s20 + $0x40] ss:$8 sps:$4 sm:$0xff]  }
 0x357   :  { %2002 = vmatprep.subr.bf16.mxu1 %v6979_v8  ;;  %v5886_v8 = vld [vmem:[%s7891_s3 + $0x4] ss:$8 sps:$4 sm:$0xff]  }
 0x35a   :  { %2003 = vmatpush1.bf16.msra.mxu1 %v6977_v6  ;;  %v5883_v6 = vld [vmem:[%s7915_s20 + $0x50] ss:$8 sps:$4 sm:$0xff]  }
 0x35b   :  { %2004 = vmatprep.subr.bf16.mxu1 %v6985_v14  ;;  %v5887_v14 = vld [vmem:[%s7891_s3 + $0x14] ss:$8 sps:$4 sm:$0xff]  }
 0x35d   :  { %1872 = vmatmul.mubr.bf16.gmra.mrb[8].mxu1 %v5874_v51 }
 0x35e   :  { %2005 = vmatpush1.bf16.msra.mxu1 %v6983_v12  ;;  %5027 = vmatprep.mubr.msk.bf16.mxu1 %vm1794_vm2, %v5875_v53  ;;  %v5884_v12 = vld [vmem:[%s7891_s3] ss:$8 sps:$4 sm:$0xff]  }
 0x35f   :  { %2006 = vmatprep.subr.bf16.mxu1 %v6991_v20  ;;  %v5890_v20 = vld [vmem:[%s7891_s3 + $0x24] ss:$8 sps:$4 sm:$0xff]  }
 0x362   :  { %2007 = vmatpush1.bf16.msra.mxu1 %v6989_v18  ;;  %v5889_v18 = vld [vmem:[%s7891_s3 + $0x10] ss:$8 sps:$4 sm:$0xff]  }
 0x363   :  { %2008 = vmatprep.subr.bf16.mxu1 %v6997_v26  ;;  %v5896_v26 = vld [vmem:[%s7891_s3 + $0x44] ss:$8 sps:$4 sm:$0xff]  }
 0x365   :  { %1882 = vmatmul.mubr.bf16.gmra.mrb[12].mxu1 %v5877_v57 }
 0x366   :  { %2009 = vmatpush1.bf16.msra.mxu1 %v6995_v24  ;;  %5028 = vmatprep.mubr.msk.bf16.mxu1 %vm1794_vm2, %v5878_v59  ;;  %v5893_v24 = vld [vmem:[%s7891_s3 + $0x34] ss:$8 sps:$4 sm:$0xff]  }
 0x367   :  { %2010 = vmatprep.subr.bf16.mxu1 %v7003_v32  ;;  %v5904_v32 = vld [vmem:[%s7892_s4 + $0x10] sm:$0xff]  }
 0x36a   :  { %2011 = vmatpush1.bf16.msra.mxu1 %v7001_v30  ;;  %v5903_v30 = vld [vmem:[%s7892_s4 + $0x8] sm:$0xff]  }
 0x36b   :  { %2012 = vmatprep.subr.bf16.mxu1 %v7009_v38  ;;  %v5910_v38 = vld [vmem:[%s7892_s4 + $0x40] sm:$0xff]  }
 0x36d   :  { %1892 = vmatmul.mubr.bf16.gmra.mrb[16].mxu1 %v5880_v63 }
 0x36e   :  { %2013 = vmatpush1.bf16.msra.mxu1 %v7007_v36  ;;  %5029 = vmatprep.mubr.msk.bf16.mxu1 %vm1794_vm2, %v5881_v2  ;;  %v5908_v36 = vld [vmem:[%s7892_s4 + $0x30] sm:$0xff]   ;;  %v5917_v2 = vld [vmem:[%s7893_s5] sm:$0xff]  }
 0x36f   :  { %2014 = vmatprep.subr.bf16.mxu1 %v7015_v44  ;;  %v5916_v44 = vld [vmem:[%s7892_s4 + $0x70] sm:$0xff]  }
 0x372   :  { %2015 = vmatpush1.bf16.msra.mxu1 %v7013_v42  ;;  %v5914_v42 = vld [vmem:[%s7892_s4 + $0x60] sm:$0xff]  }
 0x373   :  { %2016 = vmatprep.subr.bf16.mxu1 %v7021_v50 }
 0x375   :  { %1902 = vmatmul.mubr.bf16.gmra.mrb[20].mxu1 %v5883_v6 }
 0x376   :  { %2017 = vmatpush1.bf16.msra.mxu1 %v7019_v48  ;;  %5043 = vmatprep.mubr.msk.bf16.mxu1 %vm1794_vm2, %v5886_v8 }
 0x377   :  { %2018 = vmatprep.subr.bf16.mxu1 %v7027_v60 }
 0x37a   :  { %2019 = vmatpush1.bf16.msra.mxu1 %v7025_v56 }
 0x37b   :  { %2020 = vmatprep.subr.bf16.mxu1 %v1725_v5 }
 0x37e   :  { %2021 = vmatpush1.bf16.msra.mxu1 %v1724_v3 }
 0x37f   :  { %5042 = vmatprep.subr.msk.bf16.mxu1 %vm255_vm0, %v1727_v15 }
 0x382   :  { %2023 = vmatpush1.bf16.msra.mxu1 %v1814_v16 }
 0x383   :  { %2264 = vmatprep.subr.bf16.mxu1 %v6174_v0 }
 0x385   :  { %2029 = vmatmul.mubr.bf16.vlgmr.msra.gmra.mrb[24].mxu1 %v5884_v12 }
 0x386   :  { %5044 = vmatprep.mubr.msk.bf16.mxu1 %vm1794_vm2, %v5887_v14  ;;  %2265 = vmatpush1.bf16.msra.mxu1 %v5902_v29 }
 0x387   :  { %2266 = vmatprep.subr.bf16.mxu1 %v6174_v0 }
 0x38a   :  { %2267 = vmatpush1.bf16.msra.mxu1 %v5903_v30 }
 0x38b   :  { %2268 = vmatprep.subr.bf16.mxu1 %v6174_v0 }
 0x38d   :  { %2039 = vmatmul.mubr.bf16.gmra.mrb[28].mxu1 %v5889_v18 }
 0x38e   :  { %5045 = vmatprep.mubr.msk.bf16.mxu1 %vm1794_vm2, %v5890_v20  ;;  %2269 = vmatpush1.bf16.msra.mxu1 %v5904_v32  ;;  %v5918_v20 = vld [vmem:[%s7893_s5 + $0x8] sm:$0xff]  }
 0x38f   :  { %2270 = vmatprep.subr.bf16.mxu1 %v6174_v0 }
 0x392   :  { %2271 = vmatpush1.bf16.msra.mxu1 %v5905_v33 }
 0x393   :  { %2272 = vmatprep.subr.bf16.mxu1 %v6174_v0 }
 0x395   :  { %2049 = vmatmul.mubr.bf16.gmra.mrb[32].mxu1 %v5892_v23 }
 0x396   :  { %5046 = vmatprep.mubr.msk.bf16.mxu1 %vm1794_vm2, %v5893_v24  ;;  %2273 = vmatpush1.bf16.msra.mxu1 %v5906_v34  ;;  %v5920_v34 = vld [vmem:[%s7893_s5 + $0x18] sm:$0xff]  }
 0x397   :  { %2274 = vmatprep.subr.bf16.mxu1 %v6174_v0 }
 0x39a   :  { %2275 = vmatpush1.bf16.msra.mxu1 %v5907_v35 }
 0x39b   :  { %2276 = vmatprep.subr.bf16.mxu1 %v6174_v0 }
 0x39d   :  { %2059 = vmatmul.mubr.bf16.gmra.mrb[36].mxu1 %v5895_v25 }
 0x39e   :  { %5047 = vmatprep.mubr.msk.bf16.mxu1 %vm1794_vm2, %v5896_v26  ;;  %2277 = vmatpush1.bf16.msra.mxu1 %v5908_v36 }
 0x39f   :  { %2278 = vmatprep.subr.bf16.mxu1 %v6174_v0 }
 0x3a2   :  { %2279 = vmatpush1.bf16.msra.mxu1 %v5909_v37 }
 0x3a3   :  { %2280 = vmatprep.subr.bf16.mxu1 %v6174_v0 }
 0x3a5   :  { %2069 = vmatmul.mubr.bf16.gmra.mrb[40].mxu1 %v5898_v27 }
 0x3a6   :  { %5048 = vmatprep.mubr.msk.bf16.mxu1 %vm1794_vm2, %v5899_v28  ;;  %2281 = vmatpush1.bf16.msra.mxu1 %v5910_v38  ;;  %v5919_v28 = vld [vmem:[%s7893_s5 + $0x10] sm:$0xff]  }
 0x3a7   :  { %2282 = vmatprep.subr.bf16.mxu1 %v6174_v0 }
 0x3aa   :  { %2283 = vmatpush1.bf16.msra.mxu1 %v5911_v39 }
 0x3ab   :  { %2284 = vmatprep.subr.bf16.mxu1 %v6174_v0 }
 0x3ad   :  { %2079 = vmatmul.mubr.bf16.gmra.mrb[44].mxu1 %v5901_v31 }
 0x3ae   :  { %2285 = vmatpush1.bf16.msra.mxu1 %v5912_v40  ;;  %v5921_v40 = vld [vmem:[%s7893_s5 + $0x20] sm:$0xff]  }
 0x3af   :  { %2286 = vmatprep.subr.bf16.mxu1 %v6174_v0 }
 0x3b2   :  { %2287 = vmatpush1.bf16.msra.mxu1 %v5913_v41 }
 0x3b3   :  { %2288 = vmatprep.subr.bf16.mxu1 %v6174_v0 }
 0x3b6   :  { %2289 = vmatpush1.bf16.msra.mxu1 %v5914_v42 }
 0x3b7   :  { %2290 = vmatprep.subr.bf16.mxu1 %v6174_v0 }
 0x3ba   :  { %2291 = vmatpush1.bf16.msra.mxu1 %v5915_v43 }
 0x3bb   :  { %2292 = vmatprep.subr.bf16.mxu1 %v6174_v0 }
 0x3be   :  { %2293 = vmatpush1.bf16.msra.mxu1 %v5916_v44 }
 0x3bf   :  { %2465 = vmatprep.subr.bf16.mxu1 %v6174_v0 }
 0x420   :  { %v1853_v45 = vpop.f32.mrb[0].mxu1 }
 0x421   :  { %v1855_v46 = vpop.f32.mrb[1].mxu1 }
 0x422   :  { %v1857_v47 = vpop.f32.mrb[2].mxu1 }
 0x423   :  { %v1859_v48 = vpop.f32.mrb[3].mxu1 }
 0x428   :  { %v1863_v49 = vpop.f32.mrb[4].mxu1 }
 0x429   :  { %v1865_v50 = vpop.f32.mrb[5].mxu1 }
 0x42a   :  { %v1867_v52 = vpop.f32.mrb[6].mxu1 }
 0x42b   :  { %v1869_v54 = vpop.f32.mrb[7].mxu1 }
 0x430   :  { %v1873_v55 = vpop.f32.mrb[8].mxu1 }
 0x431   :  { %v1875_v56 = vpop.f32.mrb[9].mxu1 }
 0x432   :  { %v1877_v58 = vpop.f32.mrb[10].mxu1 }
 0x433   :  { %v1879_v60 = vpop.f32.mrb[11].mxu1 }
 0x438   :  { %v7199_v61 = vpop.f32.mrb[12].mxu1 }
 0x439   :  { %v7201_v62 = vpop.f32.mrb[13].mxu1 }
 0x43a   :  { %v7203_v1 = vpop.f32.mrb[14].mxu1 }
 0x43b   :  { %v7205_v3 = vpop.f32.mrb[15].mxu1 }
 0x440   :  { %v7207_v4 = vpop.f32.mrb[16].mxu1 }
 0x441   :  { %v7209_v5 = vpop.f32.mrb[17].mxu1 }
 0x442   :  { %v7211_v7 = vpop.f32.mrb[18].mxu1 }
 0x443   :  { %v7213_v9 = vpop.f32.mrb[19].mxu1 }
 0x448   :  { %v7215_v10 = vpop.f32.mrb[20].mxu1 }
 0x449   :  { %v7217_v11 = vpop.f32.mrb[21].mxu1 }
 0x44a   :  { %v7219_v13 = vpop.f32.mrb[22].mxu1 }
 0x44b   :  { %v7221_v15 = vpop.f32.mrb[23].mxu1 }
 0x458   :  { %v2030_v16 = vpop.f32.mrb[24].mxu1 }
 0x459   :  { %v2089_v17 = vmax.f32 %v1853_v45, %v2030_v16  ;;  %v2032_v19 = vpop.f32.mrb[25].mxu1 }
 0x45a   :  { %v2090_v21 = vmax.f32 %v1855_v46, %v2032_v19  ;;  %v2034_v22 = vpop.f32.mrb[26].mxu1  ;;  %v5922_v46 = vld [vmem:[%s7893_s5 + $0x28] sm:$0xff]  }
 0x45b   :  { %v2091_v51 = vmax.f32 %v1857_v47, %v2034_v22  ;;  %v2036_v53 = vpop.f32.mrb[27].mxu1 }
 0x45c   :  { %v2092_v57 = vmax.f32 %v1859_v48, %v2036_v53 }
 0x45d   :  { %v7223_v59 = vpack.c.bf16 %v2091_v51, %v2089_v17  ;;  %v5926_v51 = vld [vmem:[%s7893_s5 + $0x48] sm:$0xff]  }
 0x45e   :  { %v7225_v63 = vpack.c.bf16 %v2092_v57, %v2090_v21 }
 0x460   :  { %v2040_v6 = vpop.f32.mrb[28].mxu1  ;;  %5064 = vmatprep.mubr.msk.bf16.mxu1 %vm2245_vm3, %v7225_v63 }
 0x461   :  { %v2093_v8 = vmax.f32 %v1863_v49, %v2040_v6  ;;  %v2042_v12 = vpop.f32.mrb[29].mxu1  ;;  %2297 = vmatmul.mubr.bf16.vlgmr.msra.gmra.mrb[48].mxu1 %v7223_v59 }
 0x462   :  { %v2094_v14 = vmax.f32 %v1865_v50, %v2042_v12  ;;  %2466 = vmatpush1.bf16.msra.mxu1 %v5917_v2  ;;  %v2044_v18 = vpop.f32.mrb[30].mxu1  ;;  %v5934_v12 = vld [vmem:[%s7895_s7 + $0x7c] ss:$8 sps:$4 sm:$0xff]  }
 0x463   :  { %v2095_v23 = vmax.f32 %v1867_v52, %v2044_v18  ;;  %v2046_v24 = vpop.f32.mrb[31].mxu1  ;;  %2467 = vmatprep.subr.bf16.mxu1 %v6174_v0  ;;  %v5937_v18 = vld [vmem:[%s7895_s7 + $0x8c] ss:$8 sps:$4 sm:$0xff]  }
 0x464   :  { %v2096_v25 = vmax.f32 %v1869_v54, %v2046_v24  ;;  %v5923_v54 = vld [vmem:[%s7893_s5 + $0x30] sm:$0xff]  }
 0x465   :  { %v7237_v26 = vpack.c.bf16 %v2095_v23, %v2093_v8  ;;  %v5938_v23 = vld [vmem:[%s7895_s7 + $0x98] ss:$8 sps:$4 sm:$0xff]   ;;  %v5943_v24 = vld [vmem:[%s7895_s7 + $0xac] ss:$8 sps:$4 sm:$0xff]  }
 0x466   :  { %v7239_v27 = vpack.c.bf16 %v2096_v25, %v2094_v14  ;;  %2468 = vmatpush1.bf16.msra.mxu1 %v5918_v20  ;;  %v5935_v14 = vld [vmem:[%s7895_s7 + $0x88] ss:$8 sps:$4 sm:$0xff]   ;;  %v5940_v20 = vld [vmem:[%s7895_s7 + $0x9c] ss:$8 sps:$4 sm:$0xff]  }
 0x467   :  { %2469 = vmatprep.subr.bf16.mxu1 %v6174_v0  ;;  %v5941_v25 = vld [vmem:[%s7895_s7 + $0xa8] ss:$8 sps:$4 sm:$0xff]  }
 0x468   :  { %v2050_v29 = vpop.f32.mrb[32].mxu1  ;;  %5065 = vmatprep.mubr.msk.bf16.mxu1 %vm2245_vm3, %v7239_v27 }
 0x469   :  { %v2097_v30 = vmax.f32 %v1873_v55, %v2050_v29  ;;  %v2052_v31 = vpop.f32.mrb[33].mxu1  ;;  %2305 = vmatmul.mubr.bf16.gmra.mrb[52].mxu1 %v7237_v26  ;;  %v5947_v29 = vld [vmem:[%s7895_s7 + $0xc8] ss:$8 sps:$4 sm:$0xff]  }
 0x46a   :  { %v2098_v32 = vmax.f32 %v1875_v56, %v2052_v31  ;;  %2470 = vmatpush1.bf16.msra.mxu1 %v5919_v28  ;;  %v2054_v33 = vpop.f32.mrb[34].mxu1  ;;  %v5949_v28 = vld [vmem:[%s7895_s7 + $0xcc] ss:$8 sps:$4 sm:$0xff]   ;;  %v5950_v31 = vld [vmem:[%s7895_s7 + $0xd8] ss:$8 sps:$4 sm:$0xff]  }
 0x46b   :  { %v2099_v35 = vmax.f32 %v1877_v58, %v2054_v33  ;;  %v2056_v36 = vpop.f32.mrb[35].mxu1  ;;  %2471 = vmatprep.subr.bf16.mxu1 %v6174_v0 }
 0x46c   :  { %v2100_v37 = vmax.f32 %v1879_v60, %v2056_v36  ;;  %v5957_v36 = vld [vmem:[%s7895_s7 + $0x4] ss:$8 sps:$4 sm:$0xff]  }
 0x46d   :  { %v7252_v38 = vpack.c.bf16 %v2099_v35, %v2097_v30  ;;  %v5952_v30 = vld [vmem:[%s7895_s7 + $0xdc] ss:$8 sps:$4 sm:$0xff]  }
 0x46e   :  { %v7254_v39 = vpack.c.bf16 %v2100_v37, %v2098_v32  ;;  %2472 = vmatpush1.bf16.msra.mxu1 %v5920_v34  ;;  %v5106_v32 = vld [vmem:[%s7895_s7 + $0xe8] sm:$0xff] }
 0x46f   :  { %2473 = vmatprep.subr.bf16.mxu1 %v6174_v0  ;;  %v5122_v33 = vcombine.high %v5106_v32, %v5106_v32  ;;  %v5121_v34 = vcombine.low %v5106_v32, %v5106_v32 }
 0x470   :  { %v2060_v41 = vpop.f32.mrb[36].mxu1  ;;  %5066 = vmatprep.mubr.msk.bf16.mxu1 %vm2245_vm3, %v7254_v39 }
 0x471   :  { %v2101_v42 = vmax.f32 %v7199_v61, %v2060_v41  ;;  %v2062_v43 = vpop.f32.mrb[37].mxu1  ;;  %2313 = vmatmul.mubr.bf16.gmra.mrb[56].mxu1 %v7252_v38  ;;  %v2764_v35 = vsel %vm2762_vm4, %v5121_v34, 0 }
 0x472   :  { %v2102_v44 = vmax.f32 %v7201_v62, %v2062_v43  ;;  %2474 = vmatpush1.bf16.msra.mxu1 %v5921_v40  ;;  %v2064_v45 = vpop.f32.mrb[38].mxu1  ;;  %v5924_v62 = vld [vmem:[%s7893_s5 + $0x38] sm:$0xff]  }
 0x473   :  { %v2103_v47 = vmax.f32 %v7203_v1, %v2064_v45  ;;  %v2066_v48 = vpop.f32.mrb[39].mxu1  ;;  %2475 = vmatprep.subr.bf16.mxu1 %v6174_v0 }
 0x474   :  { %v2104_v49 = vmax.f32 %v7205_v3, %v2066_v48 }
 0x475   :  { %v7271_v50 = vpack.c.bf16 %v2103_v47, %v2101_v42 }
 0x476   :  { %v2120_v52 = vpack.c.bf16 %v2104_v49, %v2102_v44  ;;  %2476 = vmatpush1.bf16.msra.mxu1 %v5922_v46 }
 0x477   :  { %2477 = vmatprep.subr.bf16.mxu1 %v6174_v0 }
 0x478   :  { %v2070_v55 = vpop.f32.mrb[40].mxu1  ;;  %5067 = vmatprep.mubr.msk.bf16.mxu1 %vm2245_vm3, %v2120_v52 }
 0x479   :  { %v2105_v56 = vmax.f32 %v7207_v4, %v2070_v55  ;;  %v2072_v58 = vpop.f32.mrb[41].mxu1  ;;  %2321 = vmatmul.mubr.bf16.gmra.mrb[60].mxu1 %v7271_v50 }
 0x47a   :  { %v2106_v60 = vmax.f32 %v7209_v5, %v2072_v58  ;;  %2478 = vmatpush1.bf16.msra.mxu1 %v5923_v54  ;;  %v2074_v61 = vpop.f32.mrb[42].mxu1  ;;  %v5925_v5 = vld [vmem:[%s7893_s5 + $0x40] sm:$0xff]  }
 0x47b   :  { %v2107_v1 = vmax.f32 %v7211_v7, %v2074_v61  ;;  %v2076_v3 = vpop.f32.mrb[43].mxu1  ;;  %2479 = vmatprep.subr.bf16.mxu1 %v6174_v0 }
 0x47c   :  { %v2108_v16 = vmax.f32 %v7213_v9, %v2076_v3 }
 0x47d   :  { %v2121_v17 = vpack.c.bf16 %v2107_v1, %v2105_v56 }
 0x47e   :  { %v2122_v4 = vpack.c.bf16 %v2108_v16, %v2106_v60  ;;  %2480 = vmatpush1.bf16.msra.mxu1 %v5924_v62 }
 0x47f   :  { %2481 = vmatprep.subr.bf16.mxu1 %v6174_v0 }
 0x480   :  { %v2080_v19 = vpop.f32.mrb[44].mxu1  ;;  %5068 = vmatprep.mubr.msk.bf16.mxu1 %vm2245_vm3, %v2122_v4 }
 0x481   :  { %v2109_v21 = vmax.f32 %v7215_v10, %v2080_v19  ;;  %v2082_v7 = vpop.f32.mrb[45].mxu1  ;;  %2329 = vmatmul.mubr.bf16.gmra.mrb[64].mxu1 %v2121_v17  ;;  %v5927_v10 = vld [vmem:[%s7893_s5 + $0x50] sm:$0xff]  }
 0x482   :  { %v2110_v22 = vmax.f32 %v7217_v11, %v2082_v7  ;;  %2482 = vmatpush1.bf16.msra.mxu1 %v5925_v5  ;;  %v2084_v9 = vpop.f32.mrb[46].mxu1  ;;  %v5928_v11 = vld [vmem:[%s7893_s5 + $0x58] sm:$0xff]  }
 0x483   :  { %v2111_v53 = vmax.f32 %v7219_v13, %v2084_v9  ;;  %v2086_v57 = vpop.f32.mrb[47].mxu1  ;;  %2483 = vmatprep.subr.bf16.mxu1 %v6174_v0  ;;  %v5929_v13 = vld [vmem:[%s7893_s5 + $0x60] sm:$0xff]  }
 0x484   :  { %v2112_v2 = vmax.f32 %v7221_v15, %v2086_v57  ;;  %v5930_v15 = vld [vmem:[%s7893_s5 + $0x68] sm:$0xff]  }
 0x485   :  { %v2123_v6 = vpack.c.bf16 %v2111_v53, %v2109_v21 }
 0x486   :  { %v2124_v8 = vpack.c.bf16 %v2112_v2, %v2110_v22  ;;  %2484 = vmatpush1.bf16.msra.mxu1 %v5926_v51 }
 0x487   :  { %2485 = vmatprep.subr.bf16.mxu1 %v6174_v0 }
 0x488   :  { %5069 = vmatprep.mubr.msk.bf16.mxu1 %vm2245_vm3, %v2124_v8 }
 0x489   :  { %2337 = vmatmul.mubr.bf16.gmra.mrb[68].mxu1 %v2123_v6 }
 0x48a   :  { %2486 = vmatpush1.bf16.msra.mxu1 %v5927_v10  ;;  %5085 = vmatprep.mubr.msk.bf16.mxu1 %vm2245_vm3, %v7225_v63  ;;  %v5931_v63 = vld [vmem:[%s7893_s5 + $0x70] sm:$0xff]  }
 0x48b   :  { %2487 = vmatprep.subr.bf16.mxu1 %v6174_v0 }
 0x48e   :  { %2488 = vmatpush1.bf16.msra.mxu1 %v5928_v11 }
 0x48f   :  { %2489 = vmatprep.subr.bf16.mxu1 %v6174_v0 }
 0x492   :  { %2490 = vmatpush1.bf16.msra.mxu1 %v5929_v13 }
 0x493   :  { %2491 = vmatprep.subr.bf16.mxu1 %v6174_v0 }
 0x496   :  { %2492 = vmatpush1.bf16.msra.mxu1 %v5930_v15 }
 0x497   :  { %2493 = vmatprep.subr.bf16.mxu1 %v6174_v0 }
 0x49a   :  { %2494 = vmatpush1.bf16.msra.mxu1 %v5931_v63 }
 0x49b   :  { %2769 = vmatprep.subr.bf16.mxu1 %v5934_v12 }
 0x49d   :  { %2498 = vmatmul.mubr.bf16.vlgmr.msra.gmra.mrb[72].mxu1 %v7223_v59  ;;  %v5932_v59 = vld [vmem:[%s7895_s7 + $0x78] ss:$8 sps:$4 sm:$0xff]  }
 0x49e   :  { %5086 = vmatprep.mubr.msk.bf16.mxu1 %vm2245_vm3, %v7239_v27  ;;  %2770 = vmatpush1.bf16.msra.mxu1 %v5932_v59  ;;  %v5944_v27 = vld [vmem:[%s7895_s7 + $0xb8] ss:$8 sps:$4 sm:$0xff]  }
 0x49f   :  { %2771 = vmatprep.subr.bf16.mxu1 %v5937_v18 }
 0x4a2   :  { %2772 = vmatpush1.bf16.msra.mxu1 %v5935_v14 }
 0x4a3   :  { %2773 = vmatprep.subr.bf16.mxu1 %v5940_v20 }
 0x4a5   :  { %2506 = vmatmul.mubr.bf16.gmra.mrb[76].mxu1 %v7237_v26  ;;  %v5946_v26 = vld [vmem:[%s7895_s7 + $0xbc] ss:$8 sps:$4 sm:$0xff]  }
 0x4a6   :  { %5087 = vmatprep.mubr.msk.bf16.mxu1 %vm2245_vm3, %v7254_v39  ;;  %2774 = vmatpush1.bf16.msra.mxu1 %v5938_v23 }
 0x4a7   :  { %2775 = vmatprep.subr.bf16.mxu1 %v5943_v24 }
 0x4aa   :  { %2776 = vmatpush1.bf16.msra.mxu1 %v5941_v25 }
 0x4ab   :  { %2777 = vmatprep.subr.bf16.mxu1 %v5946_v26 }
 0x4ad   :  { %2514 = vmatmul.mubr.bf16.gmra.mrb[80].mxu1 %v7252_v38 }
 0x4ae   :  { %5088 = vmatprep.mubr.msk.bf16.mxu1 %vm2245_vm3, %v2120_v52  ;;  %2778 = vmatpush1.bf16.msra.mxu1 %v5944_v27 }
 0x4af   :  { %2779 = vmatprep.subr.bf16.mxu1 %v5949_v28 }
 0x4b2   :  { %2780 = vmatpush1.bf16.msra.mxu1 %v5947_v29 }
 0x4b3   :  { %2781 = vmatprep.subr.bf16.mxu1 %v5952_v30  ;;  %v5955_v30 = vld [vmem:[%s7895_s7] ss:$8 sps:$4 sm:$0xff]  }
 0x4b5   :  { %2522 = vmatmul.mubr.bf16.gmra.mrb[84].mxu1 %v7271_v50 }
 0x4b6   :  { %5089 = vmatprep.mubr.msk.bf16.mxu1 %vm2245_vm3, %v2122_v4  ;;  %2782 = vmatpush1.bf16.msra.mxu1 %v5950_v31 }
 0x4b7   :  { %5123 = vmatprep.subr.msk.bf16.mxu1 %vm2762_vm4, %v5122_v33  ;;  %v5960_v33 = vld [vmem:[%s7895_s7 + $0x14] ss:$8 sps:$4 sm:$0xff]  }
 0x4ba   :  { %2784 = vmatpush1.bf16.msra.mxu1 %v2764_v35 }
 0x4bb   :  { %2961 = vmatprep.subr.bf16.mxu1 %v5957_v36 }
 0x4bd   :  { %2530 = vmatmul.mubr.bf16.gmra.mrb[88].mxu1 %v2121_v17  ;;  %v7400_v17 = vld [vmem:[%s7894_s6] ss:$0 sm:$0xff] }
 0x4be   :  { %5090 = vmatprep.mubr.msk.bf16.mxu1 %vm2245_vm3, %v2124_v8 }
 0x4c5   :  { %2538 = vmatmul.mubr.bf16.gmra.mrb[92].mxu1 %v2123_v6 }
 0x4c6   :  { %2801 = vmatprep.mubr.bf16.mxu1 %v6174_v0 }
 0x534   :  { %v2298_v37 = vpop.f32.mrb[48].mxu1 }
 0x535   :  { %v2300_v38 = vpop.f32.mrb[49].mxu1 }
 0x536   :  { %v2301_v39 = vpop.f32.mrb[50].mxu1  ;;  %v5958_v38 = vld [vmem:[%s7895_s7 + $0x10] ss:$8 sps:$4 sm:$0xff]  }
 0x537   :  { %v2303_v40 = vpop.f32.mrb[51].mxu1 }
 0x53c   :  { %v2306_v41 = vpop.f32.mrb[52].mxu1 }
 0x53d   :  { %v2308_v42 = vpop.f32.mrb[53].mxu1 }
 0x53e   :  { %v2309_v43 = vpop.f32.mrb[54].mxu1  ;;  %v5963_v42 = vld [vmem:[%s7895_s7 + $0x24] ss:$8 sps:$4 sm:$0xff]  }
 0x53f   :  { %v2311_v44 = vpop.f32.mrb[55].mxu1 }
 0x544   :  { %v2314_v45 = vpop.f32.mrb[56].mxu1 }
 0x545   :  { %v2316_v46 = vpop.f32.mrb[57].mxu1 }
 0x546   :  { %v2317_v47 = vpop.f32.mrb[58].mxu1 }
 0x547   :  { %v2319_v48 = vpop.f32.mrb[59].mxu1 }
 0x54c   :  { %v7385_v49 = vpop.f32.mrb[60].mxu1 }
 0x54d   :  { %v2324_v50 = vpop.f32.mrb[61].mxu1 }
 0x54e   :  { %v7387_v52 = vpop.f32.mrb[62].mxu1  ;;  %v5966_v50 = vld [vmem:[%s7895_s7 + $0x34] ss:$8 sps:$4 sm:$0xff]  }
 0x54f   :  { %v2327_v54 = vpop.f32.mrb[63].mxu1 }
 0x554   :  { %v7389_v55 = vpop.f32.mrb[64].mxu1 }
 0x555   :  { %v2332_v56 = vpop.f32.mrb[65].mxu1 }
 0x556   :  { %v7391_v58 = vpop.f32.mrb[66].mxu1 }
 0x557   :  { %v2335_v60 = vpop.f32.mrb[67].mxu1 }
 0x55c   :  { %v7393_v61 = vpop.f32.mrb[68].mxu1 }
 0x55d   :  { %v2340_v62 = vpop.f32.mrb[69].mxu1 }
 0x55e   :  { %v7395_v1 = vpop.f32.mrb[70].mxu1  ;;  %v5964_v62 = vld [vmem:[%s7895_s7 + $0x30] ss:$8 sps:$4 sm:$0xff]  }
 0x55f   :  { %v2343_v3 = vpop.f32.mrb[71].mxu1 }
 0x570   :  { %v2499_v16 = vpop.f32.mrb[72].mxu1 }
 0x571   :  { %v2546_v4 = vmax.f32 %v2298_v37, %v2499_v16  ;;  %v2501_v5 = vpop.f32.mrb[73].mxu1 }
 0x572   :  { %v2502_v19 = vpop.f32.mrb[74].mxu1 }
 0x573   :  { %v2565_v21 = vadd.f32 %v7400_v17, %v2546_v4  ;;  %v2547_v7 = vmax.f32 %v2301_v39, %v2502_v19  ;;  %v2504_v22 = vpop.f32.mrb[75].mxu1 }
 0x574   :  { %v5967_v22 = vld [vmem:[%s7895_s7 + $0x40] ss:$8 sps:$4 sm:$0xff]  }
 0x575   :  { %v2577_v9 = vmax.f32 %v2565_v21, 0.0  ;;  %v2566_v51 = vadd.f32 %v7400_v17, %v2547_v7 }
 0x577   :  { %2590 = vst.msk [vmem:[#allocation2] sm:$0xff] %vm2589_vm5, %v2577_v9  ;;  %v2578_v53 = vmax.f32 %v2566_v51, 0.0  ;;  %v5972_v51 = vld [vmem:[%s7895_s7 + $0x54] ss:$8 sps:$4 sm:$0xff]  }
 0x578   :  { %v2507_v57 = vpop.f32.mrb[76].mxu1 }
 0x579   :  { %2591 = vst.msk [vmem:[#allocation2 + $0x8] sm:$0xff] %vm2589_vm5, %v2578_v53  ;;  %v2548_v2 = vmax.f32 %v2306_v41, %v2507_v57  ;;  %v2509_v6 = vpop.f32.mrb[77].mxu1 }
 0x57a   :  { %v2510_v8 = vpop.f32.mrb[78].mxu1 }
 0x57b   :  { %v2567_v10 = vadd.f32 %v7400_v17, %v2548_v2  ;;  %v2549_v11 = vmax.f32 %v2309_v43, %v2510_v8  ;;  %v2512_v13 = vpop.f32.mrb[79].mxu1  ;;  %v5970_v8 = vld [vmem:[%s7895_s7 + $0x50] ss:$8 sps:$4 sm:$0xff]  }
 0x57d   :  { %v2579_v15 = vmax.f32 %v2567_v10, 0.0  ;;  %v2568_v63 = vadd.f32 %v7400_v17, %v2549_v11 }
 0x57f   :  { %2592 = vst.msk [vmem:[#allocation2 + $0x10] sm:$0xff] %vm2589_vm5, %v2579_v15  ;;  %v2580_v59 = vmax.f32 %v2568_v63, 0.0  ;;  %v2634_v15 = vld [vmem:[%s7895_s7 + $0x70] sm:$0xff] }
 0x580   :  { %v2515_v12 = vpop.f32.mrb[80].mxu1  ;;  %v2635_v28 = vld [vmem:[#allocation2 + $0x1] sm:$0xff] }
 0x581   :  { %2593 = vst.msk [vmem:[#allocation2 + $0x18] sm:$0xff] %vm2589_vm5, %v2580_v59  ;;  %v2550_v14 = vmax.f32 %v2314_v45, %v2515_v12  ;;  %v2517_v18 = vpop.f32.mrb[81].mxu1 }
 0x582   :  { %v2518_v20 = vpop.f32.mrb[82].mxu1 }
 0x583   :  { %v2569_v23 = vadd.f32 %v7400_v17, %v2550_v14  ;;  %v2551_v24 = vmax.f32 %v2317_v47, %v2518_v20  ;;  %v2520_v25 = vpop.f32.mrb[83].mxu1  ;;  %v5961_v47 = vld [vmem:[%s7895_s7 + $0x20] ss:$8 sps:$4 sm:$0xff]  }
 0x584   :  { %v5980_v25 = vld [vmem:[%s7895_s7 + $0xf4] ss:$8 sps:$4 sm:$0xff]  }
 0x585   :  { %v2581_v26 = vmax.f32 %v2569_v23, 0.0  ;;  %v2570_v27 = vadd.f32 %v7400_v17, %v2551_v24  ;;  %v5145_v23 = vcombine.high %v2634_v15, %v2634_v15  ;;  %v5144_v24 = vcombine.low %v2634_v15, %v2634_v15  ;;  %v6007_v15 = vld [vmem:[%s7895_s7 + $0x188] ss:$8 sps:$4 sm:$0xff]  }
 0x586   :  { %v2636_v29 = vld [vmem:[#allocation2 + $0x9] sm:$0xff] }
 0x587   :  { %2594 = vst.msk [vmem:[#allocation2 + $0x20] sm:$0xff] %vm2589_vm5, %v2581_v26  ;;  %v2582_v31 = vmax.f32 %v2570_v27, 0.0  ;;  %v2647_v32 = vpack.c.bf16 %v2636_v29, %v2635_v28 }
 0x588   :  { %v2523_v34 = vpop.f32.mrb[84].mxu1  ;;  %v2637_v45 = vld [vmem:[#allocation2 + $0x11] sm:$0xff] }
 0x589   :  { %2595 = vst.msk [vmem:[#allocation2 + $0x28] sm:$0xff] %vm2589_vm5, %v2582_v31  ;;  %v2552_v35 = vmax.f32 %v7385_v49, %v2523_v34  ;;  %v2525_v36 = vpop.f32.mrb[85].mxu1  ;;  %5124 = vmatmul.mubr.msk.bf16.vlgmr.msra.gmra.mrb[96].mxu1 %vm2589_vm5, %v2647_v32  ;;  %v2603_v32 = vld [vmem:[#allocation2 + $0x8] sm:$0xff] }
 0x58a   :  { %v2526_v37 = vpop.f32.mrb[86].mxu1  ;;  %2962 = vmatpush1.bf16.msra.mxu1 %v5955_v30  ;;  %2811 = vmatprep.mubr.bf16.mxu1 %v6174_v0  ;;  %v5978_v34 = vld [vmem:[%s7895_s7 + $0xf0] ss:$8 sps:$4 sm:$0xff]   ;;  %v5983_v36 = vld [vmem:[%s7895_s7 + $0x104] ss:$8 sps:$4 sm:$0xff]  }
 0x58b   :  { %v2571_v39 = vadd.f32 %v7400_v17, %v2552_v35  ;;  %v2553_v40 = vmax.f32 %v7387_v52, %v2526_v37  ;;  %v2528_v41 = vpop.f32.mrb[87].mxu1  ;;  %2963 = vmatprep.subr.bf16.mxu1 %v5960_v33  ;;  %v2602_v33 = vld [vmem:[#allocation2] sm:$0xff]  ;;  %v5981_v37 = vld [vmem:[%s7895_s7 + $0x100] ss:$8 sps:$4 sm:$0xff]  }
 0x58c   :  { %v2614_v35 = vpack.c.bf16 %v2603_v32, %v2602_v33  ;;  %v5984_v41 = vld [vmem:[%s7895_s7 + $0x110] ss:$8 sps:$4 sm:$0xff]  }
 0x58d   :  { %v2583_v43 = vmax.f32 %v2571_v39, 0.0  ;;  %v2572_v44 = vadd.f32 %v7400_v17, %v2553_v40  ;;  %v2605_v39 = vld [vmem:[#allocation2 + $0x18] sm:$0xff]  ;;  %v2604_v40 = vld [vmem:[#allocation2 + $0x10] sm:$0xff] }
 0x58e   :  { %v2638_v46 = vld [vmem:[#allocation2 + $0x19] sm:$0xff]  ;;  %2964 = vmatpush1.bf16.msra.mxu1 %v5958_v38  ;;  %v5986_v38 = vld [vmem:[%s7895_s7 + $0x114] ss:$8 sps:$4 sm:$0xff]  }
 0x58f   :  { %2596 = vst.msk [vmem:[#allocation2 + $0x30] sm:$0xff] %vm2589_vm5, %v2583_v43  ;;  %v2584_v48 = vmax.f32 %v2572_v44, 0.0  ;;  %v2648_v49 = vpack.c.bf16 %v2638_v46, %v2637_v45  ;;  %2965 = vmatprep.subr.bf16.mxu1 %v5963_v42  ;;  %v2615_v42 = vpack.c.bf16 %v2605_v39, %v2604_v40  ;;  %v5989_v43 = vld [vmem:[%s7895_s7 + $0x124] ss:$8 sps:$4 sm:$0xff]   ;;  %v5987_v44 = vld [vmem:[%s7895_s7 + $0x120] ss:$8 sps:$4 sm:$0xff]  }
 0x590   :  { %v2531_v52 = vpop.f32.mrb[88].mxu1  ;;  %v2639_v21 = vld [vmem:[#allocation2 + $0x21] sm:$0xff] }
 0x591   :  { %2597 = vst.msk [vmem:[#allocation2 + $0x38] sm:$0xff] %vm2589_vm5, %v2584_v48  ;;  %v2554_v54 = vmax.f32 %v7389_v55, %v2531_v52  ;;  %v2533_v56 = vpop.f32.mrb[89].mxu1  ;;  %5125 = vmatmul.mubr.msk.bf16.gmra.mrb[100].mxu1 %vm2589_vm5, %v2648_v49  ;;  %v5969_v55 = vld [vmem:[%s7895_s7 + $0x44] ss:$8 sps:$4 sm:$0xff]   ;;  %v5992_v45 = vld [vmem:[%s7895_s7 + $0x134] ss:$8 sps:$4 sm:$0xff]  }
 0x592   :  { %v2534_v60 = vpop.f32.mrb[90].mxu1  ;;  %2821 = vmatprep.mubr.bf16.mxu1 %v6174_v0  ;;  %2966 = vmatpush1.bf16.msra.mxu1 %v5961_v47  ;;  %v2607_v46 = vld [vmem:[#allocation2 + $0x28] sm:$0xff]  ;;  %v2606_v47 = vld [vmem:[#allocation2 + $0x20] sm:$0xff]  ;;  %v5993_v52 = vld [vmem:[%s7895_s7 + $0x140] ss:$8 sps:$4 sm:$0xff]  }
 0x593   :  { %v2573_v3 = vadd.f32 %v7400_v17, %v2554_v54  ;;  %v2555_v16 = vmax.f32 %v7391_v58, %v2534_v60  ;;  %v2536_v4 = vpop.f32.mrb[91].mxu1  ;;  %2967 = vmatprep.subr.bf16.mxu1 %v5966_v50  ;;  %v5990_v48 = vld [vmem:[%s7895_s7 + $0x130] ss:$8 sps:$4 sm:$0xff]   ;;  %v2616_v49 = vpack.c.bf16 %v2607_v46, %v2606_v47  ;;  %v5995_v50 = vld [vmem:[%s7895_s7 + $0x144] ss:$8 sps:$4 sm:$0xff]  }
 0x594   :  { %v5998_v54 = vld [vmem:[%s7895_s7 + $0x154] ss:$8 sps:$4 sm:$0xff]   ;;  %v5167_v60 = vld [vmem:[%s7895_s7 + $0x160] sm:$0xff]  ;;  %v6027_v46 = vld [vmem:[%s7895_s7 + $0x1f0] ss:$8 sps:$4 sm:$0xff]  }
 0x595   :  { %v2585_v5 = vmax.f32 %v2573_v3, 0.0  ;;  %v2574_v19 = vadd.f32 %v7400_v17, %v2555_v16  ;;  %v5996_v3 = vld [vmem:[%s7895_s7 + $0x150] ss:$8 sps:$4 sm:$0xff]   ;;  %v5183_v4 = vcombine.high %v5167_v60, %v5167_v60  ;;  %v6032_v47 = vld [vmem:[%s7895_s7 + $0x204] ss:$8 sps:$4 sm:$0xff]  }
 0x596   :  { %v2640_v7 = vld [vmem:[#allocation2 + $0x29] sm:$0xff]  ;;  %2968 = vmatpush1.bf16.msra.mxu1 %v5964_v62 }
 0x597   :  { %2598 = vst.msk [vmem:[#allocation2 + $0x40] sm:$0xff] %vm2589_vm5, %v2585_v5  ;;  %v2586_v9 = vmax.f32 %v2574_v19, 0.0  ;;  %v2649_v58 = vpack.c.bf16 %v2640_v7, %v2639_v21  ;;  %2969 = vmatprep.subr.bf16.mxu1 %v5969_v55  ;;  %v2608_v62 = vld [vmem:[#allocation2 + $0x30] sm:$0xff]  ;;  %v5182_v55 = vcombine.low %v5167_v60, %v5167_v60  ;;  %v6003_v19 = vld [vmem:[%s7895_s7 + $0x16c] ss:$8 sps:$4 sm:$0xff]  }
 0x598   :  { %v2539_v53 = vpop.f32.mrb[92].mxu1  ;;  %v2641_v12 = vld [vmem:[#allocation2 + $0x31] sm:$0xff] }
 0x599   :  { %2599 = vst.msk [vmem:[#allocation2 + $0x48] sm:$0xff] %vm2589_vm5, %v2586_v9  ;;  %v2556_v57 = vmax.f32 %v7393_v61, %v2539_v53  ;;  %v2541_v2 = vpop.f32.mrb[93].mxu1  ;;  %5126 = vmatmul.mubr.msk.bf16.gmra.mrb[104].mxu1 %vm2589_vm5, %v2649_v58  ;;  %v5975_v61 = vld [vmem:[%s7895_s7 + $0x64] ss:$8 sps:$4 sm:$0xff]   ;;  %v3182_v5 = vsel %vm2762_vm4, %v5182_v55, 0  ;;  %v3055_v53 = vld [vmem:[#allocation2 + $0xa] sm:$0xff] }
 0x59a   :  { %v2542_v6 = vpop.f32.mrb[94].mxu1  ;;  %2831 = vmatprep.mubr.bf16.mxu1 %v6174_v0  ;;  %2970 = vmatpush1.bf16.msra.mxu1 %v5967_v22  ;;  %v2609_v56 = vld [vmem:[#allocation2 + $0x38] sm:$0xff]  ;;  %v6041_v55 = vld [vmem:[%s7895_s7 + $0x234] ss:$8 sps:$4 sm:$0xff]  }
 0x59b   :  { %v2575_v10 = vadd.f32 %v7400_v17, %v2556_v57  ;;  %v2557_v11 = vmax.f32 %v7395_v1, %v2542_v6  ;;  %v2544_v13 = vpop.f32.mrb[95].mxu1  ;;  %2971 = vmatprep.subr.bf16.mxu1 %v5972_v51  ;;  %v5973_v1 = vld [vmem:[%s7895_s7 + $0x60] ss:$8 sps:$4 sm:$0xff]   ;;  %v2617_v16 = vpack.c.bf16 %v2609_v56, %v2608_v62  ;;  %v3054_v57 = vld [vmem:[#allocation2 + $0x2] sm:$0xff]  ;;  %v6038_v60 = vld [vmem:[%s7895_s7 + $0x224] ss:$8 sps:$4 sm:$0xff]  }
 0x59c   :  { %v6001_v2 = vld [vmem:[%s7895_s7 + $0x168] ss:$8 sps:$4 sm:$0xff]   ;;  %v3066_v6 = vpack.c.bf16 %v3055_v53, %v3054_v57  ;;  %v3309_v62 = vld [vmem:[#allocation2 + $0x2b] sm:$0xff] }
 0x59d   :  { %v2587_v63 = vmax.f32 %v2575_v10, 0.0  ;;  %v2576_v59 = vadd.f32 %v7400_v17, %v2557_v11  ;;  %v2956_v17 = vsel %vm2762_vm4, %v5144_v24, 0  ;;  %v6004_v10 = vld [vmem:[%s7895_s7 + $0x178] ss:$8 sps:$4 sm:$0xff]   ;;  %v6009_v11 = vld [vmem:[%s7895_s7 + $0x18c] ss:$8 sps:$4 sm:$0xff]  }
 0x59e   :  { %v2642_v14 = vld [vmem:[#allocation2 + $0x39] sm:$0xff]  ;;  %2972 = vmatpush1.bf16.msra.mxu1 %v5970_v8  ;;  %v6006_v8 = vld [vmem:[%s7895_s7 + $0x17c] ss:$8 sps:$4 sm:$0xff]  }
 0x59f   :  { %2600 = vst.msk [vmem:[#allocation2 + $0x50] sm:$0xff] %vm2589_vm5, %v2587_v63  ;;  %v2588_v18 = vmax.f32 %v2576_v59, 0.0  ;;  %v2650_v20 = vpack.c.bf16 %v2642_v14, %v2641_v12  ;;  %2973 = vmatprep.subr.bf16.mxu1 %v5975_v61  ;;  %v2610_v7 = vld [vmem:[#allocation2 + $0x40] sm:$0xff]  ;;  %v3056_v61 = vld [vmem:[#allocation2 + $0x12] sm:$0xff] }
 0x5a0   :  { %v2643_v26 = vld [vmem:[#allocation2 + $0x41] sm:$0xff]  ;;  %v6012_v59 = vld [vmem:[%s7895_s7 + $0x19c] ss:$8 sps:$4 sm:$0xff]  }
 0x5a1   :  { %2601 = vst.msk [vmem:[#allocation2 + $0x58] sm:$0xff] %vm2589_vm5, %v2588_v18  ;;  %5127 = vmatmul.mubr.msk.bf16.gmra.mrb[108].mxu1 %vm2589_vm5, %v2650_v20  ;;  %v2611_v21 = vld [vmem:[#allocation2 + $0x48] sm:$0xff]  ;;  %v3057_v13 = vld [vmem:[#allocation2 + $0x1a] sm:$0xff] }
 0x5a2   :  { %2841 = vmatprep.mubr.bf16.mxu1 %v6174_v0  ;;  %2974 = vmatpush1.bf16.msra.mxu1 %v5973_v1  ;;  %v2618_v22 = vpack.c.bf16 %v2611_v21, %v2610_v7  ;;  %v3067_v63 = vpack.c.bf16 %v3057_v13, %v3056_v61  ;;  %v6010_v12 = vld [vmem:[%s7895_s7 + $0x198] ss:$8 sps:$4 sm:$0xff]   ;;  %v6015_v14 = vld [vmem:[%s7895_s7 + $0x1ac] ss:$8 sps:$4 sm:$0xff]   ;;  %v6013_v20 = vld [vmem:[%s7895_s7 + $0x1a8] ss:$8 sps:$4 sm:$0xff]  }
 0x5a3   :  { %5146 = vmatprep.subr.msk.bf16.mxu1 %vm2762_vm4, %v5145_v23  ;;  %v3059_v1 = vld [vmem:[#allocation2 + $0x2a] sm:$0xff]  ;;  %v3058_v18 = vld [vmem:[#allocation2 + $0x22] sm:$0xff] }
 0x5a4   :  { %v3068_v23 = vpack.c.bf16 %v3059_v1, %v3058_v18  ;;  %v6018_v24 = vld [vmem:[%s7895_s7 + $0x1bc] ss:$8 sps:$4 sm:$0xff]   ;;  %v6033_v56 = vld [vmem:[%s7895_s7 + $0x210] ss:$8 sps:$4 sm:$0xff]  }
 0x5a5   :  { %v3311_v21 = vld [vmem:[#allocation2 + $0x3b] sm:$0xff]  ;;  %v3555_v61 = vld [vmem:[#allocation2 + $0xc] sm:$0xff]  ;;  %v3558_v18 = vld [vmem:[#allocation2 + $0x24] sm:$0xff] }
 0x5a6   :  { %v2644_v27 = vld [vmem:[#allocation2 + $0x49] sm:$0xff]  ;;  %2976 = vmatpush1.bf16.msra.mxu1 %v2956_v17  ;;  %v5243_v7 = vld [vmem:[%s7895_s7 + $0x250] sm:$0xff] }
 0x5a7   :  { %v2651_v28 = vpack.c.bf16 %v2644_v27, %v2643_v26  ;;  %3187 = vmatprep.subr.bf16.mxu1 %v5980_v25  ;;  %v2612_v58 = vld [vmem:[#allocation2 + $0x50] sm:$0xff]  ;;  %v6021_v25 = vld [vmem:[%s7895_s7 + $0x1cc] ss:$8 sps:$4 sm:$0xff]   ;;  %v5205_v27 = vld [vmem:[%s7895_s7 + $0x1d8] sm:$0xff]  ;;  %v5258_v53 = vcombine.low %v5243_v7, %v5243_v7 }
 0x5a8   :  { %v2645_v29 = vld [vmem:[#allocation2 + $0x51] sm:$0xff]  ;;  %v2646_v30 = vld [vmem:[#allocation2 + $0x59] sm:$0xf]  ;;  %v5220_v32 = vcombine.low %v5205_v27, %v5205_v27 }
 0x5a9   :  { %5128 = vmatmul.mubr.msk.bf16.gmra.mrb[112].mxu1 %vm2589_vm5, %v2651_v28  ;;  %v2652_v31 = vpack.c.bf16 %v2646_v30, %v2645_v29  ;;  %v2613_v9 = vld [vmem:[#allocation2 + $0x58] sm:$0xf]  ;;  %v6016_v17 = vld [vmem:[%s7895_s7 + $0x1b8] ss:$8 sps:$4 sm:$0xff]   ;;  %v3682_v57 = vsel %vm2762_vm4, %v5258_v53, 0 }
 0x5aa   :  { %2851 = vmatprep.mubr.bf16.mxu1 %v6174_v0  ;;  %v2619_v51 = vpack.c.bf16 %v2613_v9, %v2612_v58  ;;  %v3061_v26 = vld [vmem:[#allocation2 + $0x3a] sm:$0xff]  ;;  %v3060_v28 = vld [vmem:[#allocation2 + $0x32] sm:$0xff]  ;;  %v3432_v33 = vsel %vm2762_vm4, %v5220_v32, 0 }
 0x5ab   :  { %v6019_v29 = vld [vmem:[%s7895_s7 + $0x1c8] ss:$8 sps:$4 sm:$0xff]   ;;  %v3069_v30 = vpack.c.bf16 %v3061_v26, %v3060_v28  ;;  %v3559_v1 = vld [vmem:[#allocation2 + $0x2c] sm:$0xff]  ;;  %v3562_v26 = vld [vmem:[#allocation2 + $0x44] sm:$0xff] }
 0x5ac   :  { %v3065_v39 = vld [vmem:[#allocation2 + $0x5a] sm:$0xf] }
 0x5ad   :  { %v6042_v9 = vld [vmem:[%s7895_s7 + $0x240] ss:$8 sps:$4 sm:$0xff]  }
 0x5ae   :  { %v3564_v28 = vld [vmem:[#allocation2 + $0x54] sm:$0xff] }
 0x5af   :  { %v6052_v32 = vld [vmem:[%s7898_s10 + $0x8] sm:$0xff]  }
 0x5b1   :  { %5129 = vmatmul.mubr.msk.bf16.gmra.mrb[116].mxu1 %vm2589_vm5, %v2652_v31  ;;  %v5221_v31 = vcombine.high %v5205_v27, %v5205_v27 }
 0x5b2   :  { %2993 = vmatprep.mubr.bf16.mxu1 %v6174_v0 }
 0x5b9   :  { %5147 = vmatmul.mubr.msk.bf16.vlgmr.msra.gmra.mrb[96].mxu1 %vm2589_vm5, %v2614_v35  ;;  %v3063_v35 = vld [vmem:[#allocation2 + $0x4a] sm:$0xff] }
 0x5ba   :  { %3188 = vmatpush1.bf16.msra.mxu1 %v5978_v34  ;;  %3003 = vmatprep.mubr.bf16.mxu1 %v6174_v0  ;;  %v6026_v34 = vld [vmem:[%s7895_s7 + $0x1e4] ss:$8 sps:$4 sm:$0xff]  }
 0x5bb   :  { %3189 = vmatprep.subr.bf16.mxu1 %v5983_v36  ;;  %v3062_v36 = vld [vmem:[#allocation2 + $0x42] sm:$0xff] }
 0x5be   :  { %3190 = vmatpush1.bf16.msra.mxu1 %v5981_v37  ;;  %v3070_v37 = vpack.c.bf16 %v3063_v35, %v3062_v36  ;;  %v6055_v35 = vld [vmem:[%s7898_s10 + $0x20] sm:$0xff]   ;;  %v6056_v36 = vld [vmem:[%s7898_s10 + $0x28] sm:$0xff]  }
 0x5bf   :  { %3191 = vmatprep.subr.bf16.mxu1 %v5986_v38  ;;  %v3064_v38 = vld [vmem:[#allocation2 + $0x52] sm:$0xff] }
 0x5c0   :  { %v3071_v40 = vpack.c.bf16 %v3065_v39, %v3064_v38 }
 0x5c1   :  { %5148 = vmatmul.mubr.msk.bf16.gmra.mrb[100].mxu1 %vm2589_vm5, %v2615_v42  ;;  %v3304_v42 = vld [vmem:[#allocation2 + $0x3] sm:$0xff] }
 0x5c2   :  { %3013 = vmatprep.mubr.bf16.mxu1 %v6174_v0  ;;  %3192 = vmatpush1.bf16.msra.mxu1 %v5984_v41  ;;  %v3305_v41 = vld [vmem:[#allocation2 + $0xb] sm:$0xff] }
 0x5c3   :  { %3193 = vmatprep.subr.bf16.mxu1 %v5989_v43  ;;  %v6024_v43 = vld [vmem:[%s7895_s7 + $0x1e0] ss:$8 sps:$4 sm:$0xff]  }
 0x5c6   :  { %3194 = vmatpush1.bf16.msra.mxu1 %v5987_v44  ;;  %v3316_v44 = vpack.c.bf16 %v3305_v41, %v3304_v42 }
 0x5c7   :  { %3195 = vmatprep.subr.bf16.mxu1 %v5992_v45  ;;  %v6029_v45 = vld [vmem:[%s7895_s7 + $0x1f4] ss:$8 sps:$4 sm:$0xff]  }
 0x5c9   :  { %5149 = vmatmul.mubr.msk.bf16.gmra.mrb[104].mxu1 %vm2589_vm5, %v2616_v49  ;;  %v3306_v49 = vld [vmem:[#allocation2 + $0x13] sm:$0xff] }
 0x5ca   :  { %3023 = vmatprep.mubr.bf16.mxu1 %v6174_v0  ;;  %3196 = vmatpush1.bf16.msra.mxu1 %v5990_v48  ;;  %v3307_v48 = vld [vmem:[#allocation2 + $0x1b] sm:$0xff] }
 0x5cb   :  { %3197 = vmatprep.subr.bf16.mxu1 %v5995_v50  ;;  %v6030_v50 = vld [vmem:[%s7895_s7 + $0x200] ss:$8 sps:$4 sm:$0xff]  }
 0x5ce   :  { %3198 = vmatpush1.bf16.msra.mxu1 %v5993_v52  ;;  %v3317_v52 = vpack.c.bf16 %v3307_v48, %v3306_v49 }
 0x5cf   :  { %3199 = vmatprep.subr.bf16.mxu1 %v5998_v54  ;;  %v6035_v54 = vld [vmem:[%s7895_s7 + $0x214] ss:$8 sps:$4 sm:$0xff]  }
 0x5d1   :  { %5150 = vmatmul.mubr.msk.bf16.gmra.mrb[108].mxu1 %vm2589_vm5, %v2617_v16  ;;  %v6036_v16 = vld [vmem:[%s7895_s7 + $0x220] ss:$8 sps:$4 sm:$0xff]  }
 0x5d2   :  { %3033 = vmatprep.mubr.bf16.mxu1 %v6174_v0  ;;  %3200 = vmatpush1.bf16.msra.mxu1 %v5996_v3  ;;  %v3308_v3 = vld [vmem:[#allocation2 + $0x23] sm:$0xff] }
 0x5d3   :  { %5184 = vmatprep.subr.msk.bf16.mxu1 %vm2762_vm4, %v5183_v4  ;;  %v3318_v4 = vpack.c.bf16 %v3309_v62, %v3308_v3 }
 0x5d6   :  { %3202 = vmatpush1.bf16.msra.mxu1 %v3182_v5  ;;  %v6039_v5 = vld [vmem:[%s7895_s7 + $0x230] ss:$8 sps:$4 sm:$0xff]  }
 0x5d7   :  { %3437 = vmatprep.subr.bf16.mxu1 %v6003_v19  ;;  %v6044_v19 = vld [vmem:[%s7895_s7 + $0x244] ss:$8 sps:$4 sm:$0xff]  }
 0x5d9   :  { %5151 = vmatmul.mubr.msk.bf16.gmra.mrb[112].mxu1 %vm2589_vm5, %v2618_v22  ;;  %v3310_v22 = vld [vmem:[#allocation2 + $0x33] sm:$0xff] }
 0x5da   :  { %3043 = vmatprep.mubr.bf16.mxu1 %v6174_v0  ;;  %v3319_v58 = vpack.c.bf16 %v3311_v21, %v3310_v22 }
 0x5e1   :  { %5152 = vmatmul.mubr.msk.bf16.gmra.mrb[116].mxu1 %vm2589_vm5, %v2619_v51  ;;  %v5259_v51 = vcombine.high %v5243_v7, %v5243_v7 }
 0x5e2   :  { %3219 = vmatprep.mubr.bf16.mxu1 %v6174_v0 }
 0x5e9   :  { %5185 = vmatmul.mubr.msk.bf16.vlgmr.msra.gmra.mrb[96].mxu1 %vm2589_vm5, %v3066_v6  ;;  %v3312_v6 = vld [vmem:[#allocation2 + $0x43] sm:$0xff] }
 0x5ea   :  { %3438 = vmatpush1.bf16.msra.mxu1 %v6001_v2  ;;  %3229 = vmatprep.mubr.bf16.mxu1 %v6174_v0  ;;  %v3313_v2 = vld [vmem:[#allocation2 + $0x4b] sm:$0xff] }
 0x5eb   :  { %3439 = vmatprep.subr.bf16.mxu1 %v6006_v8  ;;  %v3320_v8 = vpack.c.bf16 %v3313_v2, %v3312_v6 }
 0x5ee   :  { %3440 = vmatpush1.bf16.msra.mxu1 %v6004_v10  ;;  %v3314_v10 = vld [vmem:[#allocation2 + $0x53] sm:$0xff] }
 0x5ef   :  { %3441 = vmatprep.subr.bf16.mxu1 %v6009_v11  ;;  %v3315_v11 = vld [vmem:[#allocation2 + $0x5b] sm:$0xf] }
 0x5f0   :  { %v3321_v13 = vpack.c.bf16 %v3315_v11, %v3314_v10 }
 0x5f1   :  { %5186 = vmatmul.mubr.msk.bf16.gmra.mrb[100].mxu1 %vm2589_vm5, %v3067_v63 }
 0x5f2   :  { %3239 = vmatprep.mubr.bf16.mxu1 %v6174_v0  ;;  %3442 = vmatpush1.bf16.msra.mxu1 %v6007_v15  ;;  %v3554_v15 = vld [vmem:[#allocation2 + $0x4] sm:$0xff] }
 0x5f3   :  { %3443 = vmatprep.subr.bf16.mxu1 %v6012_v59  ;;  %v3566_v63 = vpack.c.bf16 %v3555_v61, %v3554_v15  ;;  %v3557_v59 = vld [vmem:[#allocation2 + $0x1c] sm:$0xff]  ;;  %v6049_v15 = vld [vmem:[%s7897_s9] sm:$0xff]  }
 0x5f4   :  { %v6048_v61 = vld [vmem:[%s7896_s8 + $0x8] sm:$0xff]  }
 0x5f6   :  { %3444 = vmatpush1.bf16.msra.mxu1 %v6010_v12  ;;  %v3556_v12 = vld [vmem:[#allocation2 + $0x14] sm:$0xff] }
 0x5f7   :  { %3445 = vmatprep.subr.bf16.mxu1 %v6015_v14  ;;  %v3567_v14 = vpack.c.bf16 %v3557_v59, %v3556_v12  ;;  %v6059_v59 = vld [vmem:[#allocation3 + $0x8] sm:$0xff]   ;;  %v6050_v12 = vld [vmem:[%s7897_s9 + $0x8] sm:$0xff]  }
 0x5f9   :  { %5187 = vmatmul.mubr.msk.bf16.gmra.mrb[104].mxu1 %vm2589_vm5, %v3068_v23  ;;  %v3561_v23 = vld [vmem:[#allocation2 + $0x3c] sm:$0xff] }
 0x5fa   :  { %3249 = vmatprep.mubr.bf16.mxu1 %v6174_v0  ;;  %3446 = vmatpush1.bf16.msra.mxu1 %v6013_v20  ;;  %v3568_v20 = vpack.c.bf16 %v3559_v1, %v3558_v18  ;;  %v6061_v1 = vld [vmem:[%s7898_s10 + $0x38] sm:$0xff]   ;;  %v6062_v18 = vld [vmem:[#allocation3 + $0x18] sm:$0xff]  }
 0x5fb   :  { %3447 = vmatprep.subr.bf16.mxu1 %v6018_v24  ;;  %v3560_v24 = vld [vmem:[#allocation2 + $0x34] sm:$0xff] }
 0x5fe   :  { %3448 = vmatpush1.bf16.msra.mxu1 %v6016_v17  ;;  %v3569_v17 = vpack.c.bf16 %v3561_v23, %v3560_v24  ;;  %v6065_v23 = vld [vmem:[%s7898_s10 + $0x40] sm:$0xff]   ;;  %v6064_v24 = vld [vmem:[#allocation3 + $0x28] sm:$0xff]  }
 0x5ff   :  { %3449 = vmatprep.subr.bf16.mxu1 %v6021_v25  ;;  %v3563_v25 = vld [vmem:[#allocation2 + $0x4c] sm:$0xff] }
 0x600   :  { %v3570_v27 = vpack.c.bf16 %v3563_v25, %v3562_v26  ;;  %v6067_v25 = vld [vmem:[#allocation3 + $0x38] sm:$0xff]   ;;  %v6068_v26 = vld [vmem:[#allocation3 + $0x40] sm:$0xff]  }
 0x601   :  { %5188 = vmatmul.mubr.msk.bf16.gmra.mrb[108].mxu1 %vm2589_vm5, %v3069_v30 }
 0x602   :  { %3259 = vmatprep.mubr.bf16.mxu1 %v6174_v0  ;;  %3450 = vmatpush1.bf16.msra.mxu1 %v6019_v29  ;;  %v3565_v29 = vld [vmem:[#allocation2 + $0x5c] sm:$0xf] }
 0x603   :  { %5222 = vmatprep.subr.msk.bf16.mxu1 %vm2762_vm4, %v5221_v31  ;;  %v3571_v30 = vpack.c.bf16 %v3565_v29, %v3564_v28  ;;  %v6051_v31 = vld [vmem:[%s7898_s10] sm:$0xff]   ;;  %v6070_v28 = vld [vmem:[#allocation3 + $0x48] sm:$0xff]  }
 0x604   :  { %4068 = vmatpush1.bf16.msra.mxu0 %v6051_v31 }
 0x605   :  { %4069 = vmatprep.subr.bf16.mxu0 %v6174_v0 }
 0x606   :  { %3452 = vmatpush1.bf16.msra.mxu1 %v3432_v33  ;;  %v6053_v33 = vld [vmem:[%s7898_s10 + $0x10] sm:$0xff]  }
 0x607   :  { %3687 = vmatprep.subr.bf16.mxu1 %v6026_v34  ;;  %v6054_v34 = vld [vmem:[%s7898_s10 + $0x18] sm:$0xff]  }
 0x608   :  { %4070 = vmatpush1.bf16.msra.mxu0 %v6052_v32 }
 0x609   :  { %5189 = vmatmul.mubr.msk.bf16.gmra.mrb[112].mxu1 %vm2589_vm5, %v3070_v37  ;;  %4071 = vmatprep.subr.bf16.mxu0 %v6174_v0  ;;  %v6057_v37 = vld [vmem:[%s7898_s10 + $0x30] sm:$0xff]  }
 0x60a   :  { %3269 = vmatprep.mubr.bf16.mxu1 %v6174_v0 }
 0x60c   :  { %4072 = vmatpush1.bf16.msra.mxu0 %v6053_v33 }
 0x60d   :  { %4073 = vmatprep.subr.bf16.mxu0 %v6174_v0 }
 0x610   :  { %4074 = vmatpush1.bf16.msra.mxu0 %v6054_v34 }
 0x611   :  { %5190 = vmatmul.mubr.msk.bf16.gmra.mrb[116].mxu1 %vm2589_vm5, %v3071_v40  ;;  %4075 = vmatprep.subr.bf16.mxu0 %v6174_v0 }
 0x612   :  { %3469 = vmatprep.mubr.bf16.mxu1 %v6174_v0 }
 0x614   :  { %4076 = vmatpush1.bf16.msra.mxu0 %v6055_v35 }
 0x615   :  { %4077 = vmatprep.subr.bf16.mxu0 %v6174_v0 }
 0x618   :  { %4078 = vmatpush1.bf16.msra.mxu0 %v6056_v36 }
 0x619   :  { %5223 = vmatmul.mubr.msk.bf16.vlgmr.msra.gmra.mrb[96].mxu1 %vm2589_vm5, %v3316_v44  ;;  %4079 = vmatprep.subr.bf16.mxu0 %v6174_v0 }
 0x61a   :  { %3688 = vmatpush1.bf16.msra.mxu1 %v6024_v43  ;;  %3479 = vmatprep.mubr.bf16.mxu1 %v6174_v0 }
 0x61b   :  { %3689 = vmatprep.subr.bf16.mxu1 %v6029_v45 }
 0x61c   :  { %4080 = vmatpush1.bf16.msra.mxu0 %v6057_v37 }
 0x61d   :  { %4081 = vmatprep.subr.bf16.mxu0 %v6174_v0 }
 0x61e   :  { %3690 = vmatpush1.bf16.msra.mxu1 %v6027_v46 }
 0x61f   :  { %3691 = vmatprep.subr.bf16.mxu1 %v6032_v47 }
 0x620   :  { %4082 = vmatpush1.bf16.msra.mxu0 %v6061_v1 }
 0x621   :  { %5224 = vmatmul.mubr.msk.bf16.gmra.mrb[100].mxu1 %vm2589_vm5, %v3317_v52  ;;  %4083 = vmatprep.subr.bf16.mxu0 %v6174_v0 }
 0x622   :  { %3489 = vmatprep.mubr.bf16.mxu1 %v6174_v0  ;;  %3692 = vmatpush1.bf16.msra.mxu1 %v6030_v50 }
 0x623   :  { %3693 = vmatprep.subr.bf16.mxu1 %v6035_v54 }
 0x624   :  { %4084 = vmatpush1.bf16.msra.mxu0 %v6065_v23 }
 0x625   :  { %4085 = vmatprep.subr.bf16.mxu0 %v6174_v0 }
 0x626   :  { %3694 = vmatpush1.bf16.msra.mxu1 %v6033_v56 }
 0x627   :  { %3695 = vmatprep.subr.bf16.mxu1 %v6038_v60 }
 0x629   :  { %5225 = vmatmul.mubr.msk.bf16.gmra.mrb[104].mxu1 %vm2589_vm5, %v3318_v4 }
 0x62a   :  { %3499 = vmatprep.mubr.bf16.mxu1 %v6174_v0  ;;  %3696 = vmatpush1.bf16.msra.mxu1 %v6036_v16 }
 0x62b   :  { %3697 = vmatprep.subr.bf16.mxu1 %v6041_v55 }
 0x62e   :  { %3698 = vmatpush1.bf16.msra.mxu1 %v6039_v5 }
 0x62f   :  { %3699 = vmatprep.subr.bf16.mxu1 %v6044_v19 }
 0x631   :  { %5226 = vmatmul.mubr.msk.bf16.gmra.mrb[108].mxu1 %vm2589_vm5, %v3319_v58 }
 0x632   :  { %3509 = vmatprep.mubr.bf16.mxu1 %v6174_v0  ;;  %3700 = vmatpush1.bf16.msra.mxu1 %v6042_v9 }
 0x633   :  { %5260 = vmatprep.subr.msk.bf16.mxu1 %vm2762_vm4, %v5259_v51 }
 0x636   :  { %3702 = vmatpush1.bf16.msra.mxu1 %v3682_v57 }
 0x639   :  { %5227 = vmatmul.mubr.msk.bf16.gmra.mrb[112].mxu1 %vm2589_vm5, %v3320_v8 }
 0x63a   :  { %3519 = vmatprep.mubr.bf16.mxu1 %v6174_v0 }
 0x641   :  { %5228 = vmatmul.mubr.msk.bf16.gmra.mrb[116].mxu1 %vm2589_vm5, %v3321_v13  ;;  %v6047_v13 = vld [vmem:[%s7896_s8] sm:$0xff]  }
 0x642   :  { %3719 = vmatprep.mubr.bf16.mxu1 %v6174_v0 }
 0x649   :  { %5261 = vmatmul.mubr.msk.bf16.vlgmr.msra.gmra.mrb[96].mxu1 %vm2589_vm5, %v3566_v63  ;;  %v6058_v63 = vld [vmem:[#allocation3] sm:$0xff]  }
 0x64a   :  { %3729 = vmatprep.mubr.bf16.mxu1 %v6174_v0 }
 0x651   :  { %5262 = vmatmul.mubr.msk.bf16.gmra.mrb[100].mxu1 %vm2589_vm5, %v3567_v14  ;;  %v6060_v14 = vld [vmem:[#allocation3 + $0x10] sm:$0xff]  }
 0x652   :  { %3739 = vmatprep.mubr.bf16.mxu1 %v6174_v0 }
 0x659   :  { %5263 = vmatmul.mubr.msk.bf16.gmra.mrb[104].mxu1 %vm2589_vm5, %v3568_v20  ;;  %v6063_v20 = vld [vmem:[#allocation3 + $0x20] sm:$0xff]  }
 0x65a   :  { %3749 = vmatprep.mubr.bf16.mxu1 %v6174_v0 }
 0x661   :  { %5264 = vmatmul.mubr.msk.bf16.gmra.mrb[108].mxu1 %vm2589_vm5, %v3569_v17  ;;  %v6066_v17 = vld [vmem:[#allocation3 + $0x30] sm:$0xff]  }
 0x662   :  { %3759 = vmatprep.mubr.bf16.mxu1 %v6174_v0 }
 0x669   :  { %5265 = vmatmul.mubr.msk.bf16.gmra.mrb[112].mxu1 %vm2589_vm5, %v3570_v27  ;;  %v6069_v27 = vld [vmem:[%s7898_s10 + $0x48] sm:$0xff]  }
 0x66a   :  { %3769 = vmatprep.mubr.bf16.mxu1 %v6174_v0  ;;  %4086 = vmatpush1.bf16.msra.mxu0 %v6069_v27 }
 0x671   :  { %5266 = vmatmul.mubr.msk.bf16.gmra.mrb[116].mxu1 %vm2589_vm5, %v3571_v30 }
 0x672   :  { %3874 = vmatprep.mubr.bf16.mxu1 %v6174_v0 }
 0x71c   :  { %v3721_v38 = vpop.f32.mrb[96].mxu1 }
 0x71d   :  { %v3723_v39 = vpop.f32.mrb[97].mxu1 }
 0x71e   :  { %v3725_v40 = vpop.f32.mrb[98].mxu1 }
 0x71f   :  { %v3804_v41 = vpack.c.bf16 %v3725_v40, %v3721_v38  ;;  %v3727_v42 = vpop.f32.mrb[99].mxu1 }
 0x720   :  { %v3805_v43 = vpack.c.bf16 %v3727_v42, %v3723_v39 }
 0x722   :  { %3842 = vmatprep.subr.bf16.mxu1 %v3805_v43 }
 0x723   :  { %3843 = vmatpush1.bf16.msra.mxu1 %v3804_v41 }
 0x724   :  { %v3731_v44 = vpop.f32.mrb[100].mxu1 }
 0x725   :  { %v3733_v45 = vpop.f32.mrb[101].mxu1 }
 0x726   :  { %v3735_v46 = vpop.f32.mrb[102].mxu1 }
 0x727   :  { %v3806_v47 = vpack.c.bf16 %v3735_v46, %v3731_v44  ;;  %v3737_v48 = vpop.f32.mrb[103].mxu1 }
 0x728   :  { %v3807_v49 = vpack.c.bf16 %v3737_v48, %v3733_v45 }
 0x72a   :  { %3844 = vmatprep.subr.bf16.mxu1 %v3807_v49 }
 0x72b   :  { %3845 = vmatpush1.bf16.msra.mxu1 %v3806_v47 }
 0x72c   :  { %v3741_v50 = vpop.f32.mrb[104].mxu1 }
 0x72d   :  { %v3743_v52 = vpop.f32.mrb[105].mxu1 }
 0x72e   :  { %v3745_v54 = vpop.f32.mrb[106].mxu1 }
 0x72f   :  { %v3808_v56 = vpack.c.bf16 %v3745_v54, %v3741_v50  ;;  %v3747_v60 = vpop.f32.mrb[107].mxu1 }
 0x730   :  { %v3809_v62 = vpack.c.bf16 %v3747_v60, %v3743_v52 }
 0x732   :  { %3846 = vmatprep.subr.bf16.mxu1 %v3809_v62 }
 0x733   :  { %3847 = vmatpush1.bf16.msra.mxu1 %v3808_v56 }
 0x734   :  { %v3751_v3 = vpop.f32.mrb[108].mxu1 }
 0x735   :  { %v3753_v16 = vpop.f32.mrb[109].mxu1 }
 0x736   :  { %v3755_v4 = vpop.f32.mrb[110].mxu1 }
 0x737   :  { %v3810_v55 = vpack.c.bf16 %v3755_v4, %v3751_v3  ;;  %v3757_v5 = vpop.f32.mrb[111].mxu1  ;;  %v6175_v3 = vmov 0.0   ;;  %v6075_v4 = vld [vmem:[%s7902_s14 + $0x30] sm:$0xff]  }
 0x738   :  { %v3811_v19 = vpack.c.bf16 %v3757_v5, %v3753_v16  ;;  %5408 = vmatprep.subr.bf16.mxu0 %v6175_v3  ;;  %v6073_v16 = vld [vmem:[%s7902_s14 + $0x28] sm:$0xff]  }
 0x73a   :  { %3848 = vmatprep.subr.bf16.mxu1 %v3811_v19 }
 0x73b   :  { %3849 = vmatpush1.bf16.msra.mxu1 %v3810_v55 }
 0x73c   :  { %v3761_v21 = vpop.f32.mrb[112].mxu1 }
 0x73d   :  { %v3763_v7 = vpop.f32.mrb[113].mxu1 }
 0x73e   :  { %v3765_v22 = vpop.f32.mrb[114].mxu1 }
 0x73f   :  { %v3812_v9 = vpack.c.bf16 %v3765_v22, %v3761_v21  ;;  %v3767_v58 = vpop.f32.mrb[115].mxu1  ;;  %v5301_v21 = vld [vmem:[%s7900_s12] ss:$0 sm:$0xff] }
 0x740   :  { %v3813_v51 = vpack.c.bf16 %v3767_v58, %v3763_v7 }
 0x742   :  { %3850 = vmatprep.subr.bf16.mxu1 %v3813_v51 }
 0x743   :  { %3851 = vmatpush1.bf16.msra.mxu1 %v3812_v9 }
 0x744   :  { %v3771_v53 = vpop.f32.mrb[116].mxu1 }
 0x745   :  { %v3773_v57 = vpop.f32.mrb[117].mxu1 }
 0x746   :  { %v3775_v2 = vpop.f32.mrb[118].mxu1 }
 0x747   :  { %v3814_v6 = vpack.c.bf16 %v3775_v2, %v3771_v53  ;;  %v3777_v8 = vpop.f32.mrb[119].mxu1 }
 0x748   :  { %v3815_v10 = vpack.c.bf16 %v3777_v8, %v3773_v57 }
 0x749   :  { %v3837_v11 = vsel %vm255_vm0, %v3814_v6, 0 }
 0x74a   :  { %5269 = vmatprep.subr.msk.bf16.mxu1 %vm255_vm0, %v3815_v10 }
 0x74b   :  { %3853 = vmatpush1.bf16.msra.mxu1 %v3837_v11 }
 0x74c   :  { %3915 = vmatprep.subr.bf16.mxu1 %v3805_v43 }
 0x74e   :  { %5270 = vmatmul.mubr.msk.bf16.vlgmr.msra.gmra.mrb[120].mxu1 %vm1794_vm2, %v6047_v13 }
 0x74f   :  { %3916 = vmatpush1.bf16.msra.mxu1 %v3804_v41  ;;  %3884 = vmatprep.mubr.bf16.mxu1 %v6174_v0 }
 0x750   :  { %3917 = vmatprep.subr.bf16.mxu1 %v3807_v49 }
 0x753   :  { %3918 = vmatpush1.bf16.msra.mxu1 %v3806_v47 }
 0x754   :  { %3919 = vmatprep.subr.bf16.mxu1 %v3809_v62 }
 0x756   :  { %5271 = vmatmul.mubr.msk.bf16.gmra.mrb[124].mxu1 %vm1794_vm2, %v6048_v61 }
 0x757   :  { %3920 = vmatpush1.bf16.msra.mxu1 %v3808_v56  ;;  %3947 = vmatprep.mubr.bf16.mxu1 %v6174_v0 }
 0x758   :  { %3921 = vmatprep.subr.bf16.mxu1 %v3811_v19 }
 0x75b   :  { %3922 = vmatpush1.bf16.msra.mxu1 %v3810_v55  ;;  %v6077_v55 = vld [vmem:[%s7902_s14 + $0x38] sm:$0xff]  }
 0x75c   :  { %3923 = vmatprep.subr.bf16.mxu1 %v3813_v51 }
 0x75f   :  { %3924 = vmatpush1.bf16.msra.mxu1 %v3812_v9 }
 0x760   :  { %5274 = vmatprep.subr.msk.bf16.mxu1 %vm255_vm0, %v3815_v10 }
 0x763   :  { %3926 = vmatpush1.bf16.msra.mxu1 %v3837_v11 }
 0x764   :  { %4196 = vmatprep.subr.bf16.mxu1 %v6174_v0 }
 0x766   :  { %5275 = vmatmul.mubr.msk.bf16.vlgmr.msra.gmra.mrb[128].mxu1 %vm1794_vm2, %v6049_v15 }
 0x767   :  { %3957 = vmatprep.mubr.bf16.mxu1 %v6174_v0  ;;  %4197 = vmatpush1.bf16.msra.mxu1 %v6058_v63 }
 0x768   :  { %4198 = vmatprep.subr.bf16.mxu1 %v6174_v0 }
 0x76b   :  { %4199 = vmatpush1.bf16.msra.mxu1 %v6059_v59 }
 0x76c   :  { %4200 = vmatprep.subr.bf16.mxu1 %v6174_v0 }
 0x76e   :  { %5276 = vmatmul.mubr.msk.bf16.gmra.mrb[132].mxu1 %vm1794_vm2, %v6050_v12 }
 0x76f   :  { %4201 = vmatpush1.bf16.msra.mxu1 %v6060_v14 }
 0x770   :  { %4202 = vmatprep.subr.bf16.mxu1 %v6174_v0 }
 0x773   :  { %4203 = vmatpush1.bf16.msra.mxu1 %v6062_v18 }
 0x774   :  { %4204 = vmatprep.subr.bf16.mxu1 %v6174_v0 }
 0x777   :  { %4205 = vmatpush1.bf16.msra.mxu1 %v6063_v20 }
 0x778   :  { %4206 = vmatprep.subr.bf16.mxu1 %v6174_v0 }
 0x77b   :  { %4207 = vmatpush1.bf16.msra.mxu1 %v6064_v24 }
 0x77c   :  { %4208 = vmatprep.subr.bf16.mxu1 %v6174_v0 }
 0x77f   :  { %4209 = vmatpush1.bf16.msra.mxu1 %v6066_v17 }
 0x780   :  { %4210 = vmatprep.subr.bf16.mxu1 %v6174_v0 }
 0x783   :  { %4211 = vmatpush1.bf16.msra.mxu1 %v6067_v25 }
 0x784   :  { %4212 = vmatprep.subr.bf16.mxu1 %v6174_v0 }
 0x787   :  { %4213 = vmatpush1.bf16.msra.mxu1 %v6068_v26 }
 0x788   :  { %4214 = vmatprep.subr.bf16.mxu1 %v6174_v0 }
 0x78b   :  { %4215 = vmatpush1.bf16.msra.mxu1 %v6070_v28  ;;  %v4266_v28 = vld [vmem:[#allocation5] sm:$0xf] }
 0x78c   :  { %5424 = vmatprep.subr.bf16.mxu1 %v6175_v3 }
 0x821   :  { %v3876_v29 = vpop.f32.mrb[120].mxu1 }
 0x822   :  { %v3878_v30 = vpop.f32.mrb[121].mxu1 }
 0x823   :  { %v3880_v31 = vpop.f32.mrb[122].mxu1 }
 0x824   :  { %v3882_v32 = vpop.f32.mrb[123].mxu1 }
 0x829   :  { %v3886_v33 = vpop.f32.mrb[124].mxu1 }
 0x82a   :  { %v3888_v34 = vpop.f32.mrb[125].mxu1 }
 0x82b   :  { %v3890_v35 = vpop.f32.mrb[126].mxu1 }
 0x82c   :  { %v3892_v36 = vpop.f32.mrb[127].mxu1 }
 0x839   :  { %v3949_v37 = vpop.f32.mrb[128].mxu1 }
 0x83a   :  { %v3968_v38 = vmax.f32 %v3876_v29, %v3949_v37  ;;  %v3951_v39 = vpop.f32.mrb[129].mxu1  ;;  %v4322_v29 = vld [vmem:[#allocation5 + $0x4] sm:$0xf] }
 0x83b   :  { %v3969_v40 = vmax.f32 %v3878_v30, %v3951_v39  ;;  %v3953_v41 = vpop.f32.mrb[130].mxu1  ;;  %v6071_v30 = vld [vmem:[%s7902_s14] sm:$0xff]  }
 0x83c   :  { %v3970_v42 = vmax.f32 %v3880_v31, %v3953_v41  ;;  %v3955_v43 = vpop.f32.mrb[131].mxu1  ;;  %v6072_v31 = vld [vmem:[%s7902_s14 + $0x8] sm:$0xff]  }
 0x83d   :  { %v3971_v44 = vmax.f32 %v3882_v32, %v3955_v43  ;;  %v6074_v32 = vld [vmem:[%s7902_s14 + $0x10] sm:$0xff]  }
 0x83e   :  { %v3976_v45 = vpack.c.bf16 %v3970_v42, %v3968_v38  ;;  %v6081_v38 = vld [vmem:[%s7902_s14 + $0x50] sm:$0xff]  }
 0x83f   :  { %v3977_v0 = vpack.c.bf16 %v3971_v44, %v3969_v40 }
 0x841   :  { %v3959_v46 = vpop.f32.mrb[132].mxu1  ;;  %5287 = vmatprep.mubr.msk.bf16.mxu0 %vm4060_vm6, %v3977_v0  ;;  %5299 = vmatprep.mubr.msk.bf16.mxu1 %vm4060_vm6, %v3977_v0 }
 0x842   :  { %v3972_v47 = vmax.f32 %v3886_v33, %v3959_v46  ;;  %v3961_v48 = vpop.f32.mrb[133].mxu1  ;;  %4100 = vmatmul.mubr.bf16.vlgmr.msra.gmra.mrb[56].mxu0 %v3976_v45  ;;  %4229 = vmatmul.mubr.bf16.vlgmr.msra.gmra.mrb[136].mxu1 %v3976_v45  ;;  %v6076_v33 = vld [vmem:[%s7902_s14 + $0x18] sm:$0xff]  }
 0x843   :  { %v3973_v49 = vmax.f32 %v3888_v34, %v3961_v48  ;;  %v3963_v50 = vpop.f32.mrb[134].mxu1  ;;  %5425 = vmatpush3.bf16.msra.mxu1 %v6073_v16  ;;  %v6078_v34 = vld [vmem:[%s7902_s14 + $0x20] sm:$0xff]   ;;  %v4657_v48 = vld [vmem:[#allocation5 + $0xc] sm:$0xf]  ;;  %v6089_v16 = vld [vmem:[%s7902_s14 + $0x90] sm:$0xff]  }
 0x844   :  { %v3974_v52 = vmax.f32 %v3890_v35, %v3963_v50  ;;  %v3965_v54 = vpop.f32.mrb[135].mxu1  ;;  %5426 = vmatprep.subr.bf16.mxu1 %v6175_v3  ;;  %v6079_v35 = vld [vmem:[%s7902_s14 + $0x40] sm:$0xff]  }
 0x845   :  { %v3975_v56 = vmax.f32 %v3892_v36, %v3965_v54  ;;  %v6080_v36 = vld [vmem:[%s7902_s14 + $0x48] sm:$0xff]   ;;  %v6083_v50 = vld [vmem:[%s7902_s14 + $0x60] sm:$0xff]  }
 0x846   :  { %v3978_v60 = vpack.c.bf16 %v3974_v52, %v3972_v47  ;;  %v4526_v47 = vld [vmem:[#allocation5 + $0x8] sm:$0xf]  ;;  %v6084_v52 = vld [vmem:[%s7902_s14 + $0x78] sm:$0xff]  }
 0x847   :  { %v3979_v62 = vpack.c.bf16 %v3975_v56, %v3973_v49  ;;  %5427 = vmatpush3.bf16.msra.mxu1 %v6075_v4  ;;  %v6082_v49 = vld [vmem:[%s7902_s14 + $0x58] sm:$0xff]   ;;  %v6085_v54 = vld [vmem:[%s7902_s14 + $0x68] sm:$0xff]   ;;  %v6086_v56 = vld [vmem:[%s7902_s14 + $0x80] sm:$0xff]  }
 0x848   :  { %5428 = vmatprep.subr.bf16.mxu1 %v6175_v3  ;;  %v6090_v4 = vld [vmem:[%s7902_s14 + $0x98] sm:$0xff]  }
 0x849   :  { %5288 = vmatprep.mubr.msk.bf16.mxu0 %vm4060_vm6, %v3979_v62  ;;  %5300 = vmatprep.mubr.msk.bf16.mxu1 %vm4060_vm6, %v3979_v62  ;;  %v6088_v62 = vld [vmem:[%s7902_s14 + $0x88] sm:$0xff]  }
 0x84a   :  { %4108 = vmatmul.mubr.bf16.gmra.mrb[60].mxu0 %v3978_v60  ;;  %4237 = vmatmul.mubr.bf16.gmra.mrb[140].mxu1 %v3978_v60  ;;  %v6087_v60 = vld [vmem:[%s7902_s14 + $0x70] sm:$0xff]  }
 0x84b   :  { %5412 = vmatprep.mubr.msk.bf16.mxu0 %vm6176_vm7, %v6175_v3  ;;  %5434 = vmatprep.mubr.msk.bf16.mxu1 %vm6176_vm7, %v6175_v3 }
 0x84c   :  { %5429 = vmatpush3.bf16.msra.mxu1 %v6077_v55 }
 0x84d   :  { %5430 = vmatprep.subr.bf16.mxu1 %v6175_v3 }
 0x850   :  { %5431 = vmatpush3.bf16.msra.mxu1 %v6079_v35 }
 0x851   :  { %5432 = vmatprep.subr.bf16.mxu1 %v6175_v3 }
 0x854   :  { %5433 = vmatpush3.bf16.msra.mxu1 %v6080_v36 }
 0x855   :  { %5452 = vmatprep.subr.bf16.mxu1 %v6175_v3 }
 0x915   :  { %v4101_v5 = vpop.f32.mrb[56].mxu0  ;;  %v4230_v19 = vpop.f32.mrb[136].mxu1 }
 0x916   :  { %v4245_v7 = vmax.f32 %v4101_v5, %v4230_v19  ;;  %v4103_v22 = vpop.f32.mrb[57].mxu0  ;;  %v4232_v9 = vpop.f32.mrb[137].mxu1 }
 0x917   :  { %v4104_v58 = vpop.f32.mrb[58].mxu0  ;;  %v4233_v51 = vpop.f32.mrb[138].mxu1 }
 0x918   :  { %v4256_v53 = vadd.f32 %v5301_v21, %v4245_v7  ;;  %v4246_v57 = vmax.f32 %v4104_v58, %v4233_v51  ;;  %v4106_v2 = vpop.f32.mrb[59].mxu0  ;;  %v4235_v6 = vpop.f32.mrb[139].mxu1 }
 0x91a   :  { %v4257_v8 = vadd.f32 %v5301_v21, %v4246_v57  ;;  %v4260_v10 = vmax.f32 %v4256_v53, 0.0 }
 0x91c   :  { %v4261_v11 = vmax.f32 %v4257_v8, 0.0 }
 0x91d   :  { %v4109_v13 = vpop.f32.mrb[60].mxu0  ;;  %v4238_v61 = vpop.f32.mrb[140].mxu1 }
 0x91e   :  { %v7773_v15 = vpack.c.bf16 %v4261_v11, %v4260_v10  ;;  %v4247_v63 = vmax.f32 %v4109_v13, %v4238_v61  ;;  %v4111_v59 = vpop.f32.mrb[61].mxu0  ;;  %v4240_v12 = vpop.f32.mrb[141].mxu1 }
 0x91f   :  { %v4112_v14 = vpop.f32.mrb[62].mxu0  ;;  %v4241_v1 = vpop.f32.mrb[142].mxu1  ;;  %v6092_v59 = vld [vmem:[#allocation7 + $0x8] sm:$0xff]   ;;  %v6093_v12 = vld [vmem:[#allocation7 + $0x10] sm:$0xff]  }
 0x920   :  { %v4258_v18 = vadd.f32 %v5301_v21, %v4247_v63  ;;  %v4248_v20 = vmax.f32 %v4112_v14, %v4241_v1  ;;  %v4114_v23 = vpop.f32.mrb[63].mxu0  ;;  %v4243_v24 = vpop.f32.mrb[143].mxu1  ;;  %5409 = vmatpush3.bf16.msra.mxu0 %v7773_v15  ;;  %v6091_v63 = vld [vmem:[#allocation7] sm:$0xff]   ;;  %v6094_v14 = vld [vmem:[#allocation7 + $0x18] ss:$0 sps:$4 sm:$0x11]  }
 0x921   :  { %5410 = vmatprep.subr.bf16.mxu0 %v6175_v3  ;;  %v4838_v1 = vsel %vm4836_vm9, %v6094_v14, 0 }
 0x922   :  { %v4259_v17 = vadd.f32 %v5301_v21, %v4248_v20  ;;  %v4262_v25 = vmax.f32 %v4258_v18, 0.0 }
 0x924   :  { %v4263_v26 = vmax.f32 %v4259_v17, 0.0 }
 0x926   :  { %v4265_v27 = vpack.c.bf16 %v4263_v26, %v4262_v25  ;;  %v5360_v26 = vld [vmem:[%s7903_s15] ss:$0 sm:$0xff] }
 0x928   :  { %5411 = vmatpush3.bf16.msra.mxu0 %v4265_v27 }
 0x929   :  { %5416 = vmatprep.subr.bf16.mxu0 %v6175_v3 }
 0x92b   :  { %5413 = vmatmul.mubr.msk.bf16.vlgmr.msra.gmra.mrb[64].mxu0 %vm4060_vm6, %v4266_v28 }
 0x92c   :  { %5417 = vmatpush3.bf16.msra.mxu0 %v7773_v15  ;;  %5420 = vmatprep.mubr.msk.bf16.mxu0 %vm6176_vm7, %v6175_v3 }
 0x92d   :  { %5418 = vmatprep.subr.bf16.mxu0 %v6175_v3 }
 0x930   :  { %5419 = vmatpush3.bf16.msra.mxu0 %v4265_v27 }
 0x931   :  { %5438 = vmatprep.subr.bf16.mxu0 %v6175_v3 }
 0x933   :  { %5421 = vmatmul.mubr.msk.bf16.vlgmr.msra.gmra.mrb[68].mxu0 %vm4060_vm6, %v4322_v29 }
 0x934   :  { %5439 = vmatpush3.bf16.msra.mxu0 %v6071_v30  ;;  %5448 = vmatprep.mubr.msk.bf16.mxu0 %vm6176_vm7, %v6175_v3 }
 0x935   :  { %5440 = vmatprep.subr.bf16.mxu0 %v6175_v3 }
 0x938   :  { %5441 = vmatpush3.bf16.msra.mxu0 %v6072_v31 }
 0x939   :  { %5442 = vmatprep.subr.bf16.mxu0 %v6175_v3 }
 0x93c   :  { %5443 = vmatpush3.bf16.msra.mxu0 %v6074_v32 }
 0x93d   :  { %5444 = vmatprep.subr.bf16.mxu0 %v6175_v3 }
 0x940   :  { %5445 = vmatpush3.bf16.msra.mxu0 %v6076_v33  ;;  %v5361_v33 = vld [vmem:[%s7905_s17] ss:$0 sm:$0xff] }
 0x941   :  { %5446 = vmatprep.subr.bf16.mxu0 %v6175_v3 }
 0x944   :  { %5447 = vmatpush3.bf16.msra.mxu0 %v6078_v34 }
 0x945   :  { %5460 = vmatprep.subr.bf16.mxu0 %v6175_v3 }
 0x9fe   :  { %v4304_v37 = vpop.f32.mrb[64].mxu0 }
 0x9ff   :  { %v4310_v39 = vpack.c.bf16 %v4304_v37, %v4304_v37  ;;  %v5414_v40 = vpop.f32.mrb[65].mxu0 }
 0xa00   :  { %v4307_v41 = vpop.f32.mrb[66].mxu0 }
 0xa01   :  { %v5415_v42 = vpop.f32.mrb[67].mxu0  ;;  %5449 = vmatmul.mubr.msk.bf16.vlgmr.msra.gmra.mrb[72].mxu0 %vm4408_vm8, %v4310_v39 }
 0xa02   :  { %5461 = vmatpush3.bf16.msra.mxu0 %v6081_v38  ;;  %5470 = vmatprep.mubr.msk.bf16.mxu0 %vm6176_vm7, %v6175_v3 }
 0xa03   :  { %5462 = vmatprep.subr.bf16.mxu0 %v6175_v3 }
 0xa06   :  { %v4360_v43 = vpop.f32.mrb[68].mxu0  ;;  %5463 = vmatpush3.bf16.msra.mxu0 %v6082_v49 }
 0xa07   :  { %v4366_v44 = vpack.c.bf16 %v4360_v43, %v4360_v43  ;;  %v5422_v45 = vpop.f32.mrb[69].mxu0  ;;  %5464 = vmatprep.subr.bf16.mxu0 %v6175_v3 }
 0xa08   :  { %v4363_v0 = vpop.f32.mrb[70].mxu0 }
 0xa09   :  { %5435 = vmatmul.mubr.msk.bf16.vlgmr.msra.gmra.mrb[144].mxu1 %vm4408_vm8, %v4366_v44  ;;  %v5423_v46 = vpop.f32.mrb[71].mxu0 }
 0xa0a   :  { %5453 = vmatpush3.bf16.msra.mxu1 %v7773_v15  ;;  %5456 = vmatprep.mubr.msk.bf16.mxu1 %vm6176_vm7, %v6175_v3 }
 0xa0b   :  { %5454 = vmatprep.subr.bf16.mxu1 %v6175_v3  ;;  %5465 = vmatpush3.bf16.msra.mxu0 %v6083_v50 }
 0xa0c   :  { %5466 = vmatprep.subr.bf16.mxu0 %v6175_v3 }
 0xa0e   :  { %5455 = vmatpush3.bf16.msra.mxu1 %v4265_v27 }
 0xa0f   :  { %5474 = vmatprep.subr.bf16.mxu1 %v6175_v3  ;;  %5467 = vmatpush3.bf16.msra.mxu0 %v6085_v54 }
 0xa10   :  { %5468 = vmatprep.subr.bf16.mxu0 %v6175_v3 }
 0xa11   :  { %5457 = vmatmul.mubr.msk.bf16.vlgmr.msra.gmra.mrb[148].mxu1 %vm4060_vm6, %v4526_v47 }
 0xa12   :  { %5475 = vmatpush3.bf16.msra.mxu1 %v7773_v15  ;;  %5478 = vmatprep.mubr.msk.bf16.mxu1 %vm6176_vm7, %v6175_v3 }
 0xa13   :  { %5476 = vmatprep.subr.bf16.mxu1 %v6175_v3  ;;  %5469 = vmatpush3.bf16.msra.mxu0 %v6087_v60 }
 0xa14   :  { %5496 = vmatprep.subr.bf16.mxu0 %v6175_v3 }
 0xa16   :  { %5477 = vmatpush3.bf16.msra.mxu1 %v4265_v27 }
 0xa17   :  { %5482 = vmatprep.subr.bf16.mxu1 %v6175_v3 }
 0xa19   :  { %5479 = vmatmul.mubr.msk.bf16.vlgmr.msra.gmra.mrb[152].mxu1 %vm4060_vm6, %v4657_v48 }
 0xa1a   :  { %5492 = vmatprep.mubr.msk.bf16.mxu1 %vm6176_vm7, %v6175_v3  ;;  %5483 = vmatpush3.bf16.msra.mxu1 %v6084_v52 }
 0xa1b   :  { %5484 = vmatprep.subr.bf16.mxu1 %v6175_v3 }
 0xa1e   :  { %5485 = vmatpush3.bf16.msra.mxu1 %v6086_v56 }
 0xa1f   :  { %5486 = vmatprep.subr.bf16.mxu1 %v6175_v3 }
 0xa22   :  { %5487 = vmatpush3.bf16.msra.mxu1 %v6088_v62 }
 0xa23   :  { %5488 = vmatprep.subr.bf16.mxu1 %v6175_v3 }
 0xa26   :  { %5489 = vmatpush3.bf16.msra.mxu1 %v6089_v16 }
 0xa27   :  { %5490 = vmatprep.subr.bf16.mxu1 %v6175_v3 }
 0xa2a   :  { %5491 = vmatpush3.bf16.msra.mxu1 %v6090_v4 }
 0xad4   :  { %v4519_v55 = vpop.f32.mrb[72].mxu0 }
 0xad5   :  { %v5450_v5 = vpop.f32.mrb[73].mxu0 }
 0xad6   :  { %v4522_v19 = vpop.f32.mrb[74].mxu0 }
 0xad7   :  { %v5451_v21 = vpop.f32.mrb[75].mxu0 }
 0xadc   :  { %v4446_v7 = vpop.f32.mrb[144].mxu1 }
 0xadd   :  { %v4520_v22 = vadd.f32 %v4519_v55, %v4446_v7  ;;  %v5436_v9 = vpop.f32.mrb[145].mxu1 }
 0xade   :  { %v4449_v58 = vpop.f32.mrb[146].mxu1 }
 0xadf   :  { %v5437_v51 = vpop.f32.mrb[147].mxu1 }
 0xae4   :  { %v4564_v53 = vpop.f32.mrb[148].mxu1 }
 0xae5   :  { %v4570_v57 = vpack.c.bf16 %v4564_v53, %v4564_v53  ;;  %v5458_v2 = vpop.f32.mrb[149].mxu1 }
 0xae6   :  { %v4567_v6 = vpop.f32.mrb[150].mxu1 }
 0xae7   :  { %5471 = vmatmul.mubr.msk.bf16.vlgmr.msra.gmra.mrb[76].mxu0 %vm4408_vm8, %v4570_v57  ;;  %v5459_v8 = vpop.f32.mrb[151].mxu1 }
 0xae8   :  { %5504 = vmatprep.mubr.msk.bf16.mxu0 %vm6176_vm7, %v6175_v3  ;;  %5497 = vmatpush3.bf16.msra.mxu0 %v6091_v63 }
 0xae9   :  { %5498 = vmatprep.subr.bf16.mxu0 %v6175_v3 }
 0xaec   :  { %v4695_v10 = vpop.f32.mrb[152].mxu1  ;;  %5499 = vmatpush3.bf16.msra.mxu0 %v6092_v59 }
 0xaed   :  { %v4701_v11 = vpack.c.bf16 %v4695_v10, %v4695_v10  ;;  %v5480_v13 = vpop.f32.mrb[153].mxu1  ;;  %5500 = vmatprep.subr.bf16.mxu0 %v6175_v3 }
 0xaee   :  { %v4698_v61 = vpop.f32.mrb[154].mxu1 }
 0xaef   :  { %5493 = vmatmul.mubr.msk.bf16.vlgmr.msra.gmra.mrb[156].mxu1 %vm4408_vm8, %v4701_v11  ;;  %v5481_v15 = vpop.f32.mrb[155].mxu1 }
 0xaf0   :  { %5501 = vmatpush3.bf16.msra.mxu0 %v6093_v12 }
 0xaf1   :  { %5502 = vmatprep.subr.bf16.mxu0 %v6175_v3 }
 0xaf4   :  { %5503 = vmatpush3.bf16.msra.mxu0 %v4838_v1 }
 0xbba   :  { %v4649_v18 = vpop.f32.mrb[76].mxu0 }
 0xbbb   :  { %v4655_v20 = vadd.f32 %v4649_v18, %v4520_v22  ;;  %v5472_v23 = vpop.f32.mrb[77].mxu0 }
 0xbbc   :  { %v4652_v24 = vpop.f32.mrb[78].mxu0 }
 0xbbd   :  { %v5473_v17 = vpop.f32.mrb[79].mxu0 }
 0xbc2   :  { %v4780_v25 = vpop.f32.mrb[156].mxu1 }
 0xbc3   :  { %v4786_v27 = vadd.f32 %v4780_v25, %v4655_v20  ;;  %v5494_v28 = vpop.f32.mrb[157].mxu1 }
 0xbc4   :  { %v4783_v29 = vpop.f32.mrb[158].mxu1 }
 0xbc5   :  { %v4794_v30 = vadd.f32 %v5360_v26, %v4786_v27  ;;  %v5495_v31 = vpop.f32.mrb[159].mxu1 }
 0xbc7   :  { %v4795_v3 = vmax.f32 %v4794_v30, 0.0 }
 0xbc9   :  { %v4796_v32 = vpack.c.bf16 %v4795_v3, %v4795_v3 }
 0xbcb   :  { %5505 = vmatmul.mubr.msk.bf16.vlgmr.msra.gmra.mrb[80].mxu0 %vm4832_vm10, %v4796_v32 }
 0xc9e   :  { %v4874_v34 = vpop.f32.mrb[80].mxu0 }
 0xc9f   :  { %v4875_v35 = vadd.f32 %v5361_v33, %v4874_v34  ;;  %v5506_v36 = vpop.f32.mrb[81].mxu0 }
 0xca0   :  { %v4877_v37 = vpop.f32.mrb[82].mxu0 }
 0xca1   :  { %v5507_v38 = vpop.f32.mrb[83].mxu0  ;;  %v4880_v39 = vmul.f32 %v4875_v35, %v4875_v35 }
 0xca3   :  { %4881 = vadd.xlane.f32.xlu0 %v4880_v39 }
 0xd30   :  { %v4882_v40 = vpop.xlane.xlu0 %4881 }
 0xd31   :  { %6095 = vrsqrt.f32 %v4882_v40  ;;  %vm4885_vm11 = vcmp.eq.f32.partialorder %v4882_v40, inf  ;;  %v4888_v43 = vand.u32 2147483648, %v4882_v40  ;;  %vm4887_vm12 = vcmp.eq.f32.partialorder %v4882_v40, 0.0 }
 0xd3b   :  { %v6096_v41 = vpop.eup %6095 }
 0xd3c   :  { %v4884_v42 = vmul.f32 %v6096_v41, %v4882_v40 }
 0xd3e   :  { %v4886_v44 = vsel %vm4885_vm11, %v4882_v40, %v4884_v42 }
 0xd3f   :  { %v4889_v45 = vsel %vm4887_vm12, %v4888_v43, %v4886_v44 }
 0xd40   :  { %v4890_v0 = vadd.f32 0.0001, %v4889_v45 }
 0xd42   :  { %6097 = vrcp.f32 %v4890_v0 }
 0xd4c   :  { %v6098_v46 = vpop.eup %6097 }
 0xd4d   :  { %v4892_v47 = vmul.f32 %v6098_v46, %v4875_v35 }
 0xd4f   :  { %4893 = vst [vmem:[%s7906_s18] sm:$0xff] %v4892_v47 }
 0xd50   :  { %4898 = vsyncpa [#allocation4], 1 }
 0xd51   :  { %4899 = vsyncpa [#allocation6], 1 }

</bundles_post_ra>
